<compile_context>
chip_gen: v6e
topology: v6e:2x2x1
jax: 0.10.0
libtpu: 0.0.40
codegen_flags: <defaults>
</compile_context>

<pallas_src>
import jax
import jax.numpy as jnp
from jax.experimental import pallas as pl
from jax.experimental.pallas import tpu as pltpu

N_NODES = 8     # graph nodes in the demo
F_IN = 16       # input node-feature dim (GATv2Conv(-1, 512) infers this)
HIDDEN = 512    # hidden width hard-coded by the module

NEG_INF = -1e30   # Python float: must NOT be a jnp scalar (captured-constant error)


def _gatv2_tanh(h, adj, wl_ref, bl_ref, wr_ref, br_ref, att_ref, bias_ref):
    """One GATv2Conv (heads=1, add_self_loops=True, negative_slope=0.2) + Tanh.

    h:   (N, d_in) f32 node features
    adj: (N, N)   f32, adj[i, j] = 1 iff edge j -> i exists or i == j
    """
    hb = h.astype(jnp.bfloat16)                                   # MXU-native matmuls
    xl = jnp.dot(hb, wl_ref[...], preferred_element_type=jnp.float32) + bl_ref[...]
    xr = jnp.dot(hb, wr_ref[...], preferred_element_type=jnp.float32) + br_ref[...]

    # GATv2 score: e[i, j] = att . leaky_relu(xr[i] + xl[j]), slope 0.2.
    s = xr[:, None, :] + xl[None, :, :]                           # (N, N, H)
    s = jnp.where(s >= 0.0, s, 0.2 * s)                           # VPU
    e = jnp.sum(s * att_ref[...][None, :, :], axis=-1)            # (N, N), XLU reduce
    e = jnp.where(adj > 0.0, e, NEG_INF)

    # Softmax over sources j; masked entries underflow to exactly 0.
    e_max = jnp.max(e, axis=1, keepdims=True)                     # (N, 1)
    p = jnp.exp(e - e_max)
    denom = jnp.sum(p, axis=1, keepdims=True)
    alpha = p * pl.reciprocal(denom, approx=True)                 # (N, N)

    # Aggregate neighbour values: out[i] = sum_j alpha[i,j] * xl[j] + bias.
    out = jnp.dot(alpha, xl, preferred_element_type=jnp.float32) + bias_ref[...]
    return jnp.tanh(out)


def _actor_kernel(*refs):
    (x_ref, adj_ref, cvm_ref) = refs[:3]
    gat_refs = refs[3:21]
    (w1_ref, b1_ref, w2_ref, b2_ref, w3_ref, b3_ref) = refs[21:27]
    out_ref = refs[27]

    h = x_ref[...]
    adj = adj_ref[...]
    for layer in range(3):                       # static unroll, 3 GAT layers
        lw = gat_refs[6 * layer:6 * layer + 6]
        h = _gatv2_tanh(h, adj, *lw)

    # MLP head: Linear -> LeakyReLU -> Linear -> LeakyReLU -> Linear(512 -> 1).
    z = jnp.dot(h.astype(jnp.bfloat16), w1_ref[...],
                preferred_element_type=jnp.float32) + b1_ref[...]
    z = jnp.where(z >= 0.0, z, 0.01 * z)
    z = jnp.dot(z.astype(jnp.bfloat16), w2_ref[...],
                preferred_element_type=jnp.float32) + b2_ref[...]
    z = jnp.where(z >= 0.0, z, 0.01 * z)
    logits = jnp.dot(z, w3_ref[...], preferred_element_type=jnp.float32) + b3_ref[...]

    # Mask() + Softmax(dim=0) over nodes.
    logits = jnp.where(cvm_ref[...] > 0.0, logits, NEG_INF)
    m = jnp.max(logits, axis=0, keepdims=True)
    p = jnp.exp(logits - m)
    denom = jnp.sum(p, axis=0, keepdims=True)
    out_ref[...] = p * pl.reciprocal(denom, approx=True)


def _vmem_spec():
    return pl.BlockSpec(memory_space=pltpu.MemorySpace.VMEM)


def deep_ham_actor(x, edge_index, current_vertex, params):
    """x: (N, F) float, edge_index: (2, E) int, current_vertex: int scalar."""
    n = x.shape[0]
    src = edge_index[0]
    dst = edge_index[1]

    # adj[i, j] = 1 iff edge j -> i (source j, target i) or i == j
    # (GATv2Conv flow='source_to_target', add_self_loops=True).
    adj = jnp.zeros((n, n), jnp.float32).at[dst, src].set(1.0)
    diag = jnp.arange(n)
    adj = adj.at[diag, diag].set(1.0)

    # TODO(synk): Mask() is not defined in the spec; interpreted as "keep the
    # logits of nodes reachable by an edge from current_vertex, -inf elsewhere"
    # before the Softmax(dim=0).
    hit = (src == current_vertex).astype(jnp.float32)
    cvm = jnp.zeros((n,), jnp.float32).at[dst].add(hit)
    cvm = (cvm > 0.0).astype(jnp.float32).reshape(n, 1)

    args = [x.astype(jnp.float32), adj, cvm]
    for lp in params["gat"]:
        args.extend(lp)
    args.extend(params["head"])

    out = pl.pallas_call(
        _actor_kernel,
        out_shape=jax.ShapeDtypeStruct((n, 1), jnp.float32),
        in_specs=[_vmem_spec() for _ in range(len(args))],
        out_specs=_vmem_spec(),
        compiler_params=pltpu.CompilerParams(vmem_limit_bytes=32 * 1024 * 1024),
    )(*args)
    return out.reshape(n)


def init_params(key):
    ks = jax.random.split(key, 12)

    def w(k, shape, dtype=jnp.bfloat16, scale=0.05):
        return (scale * jax.random.normal(k, shape, dtype=jnp.float32)).astype(dtype)

    gat = []
    d_in = F_IN
    i = 0
    for _ in range(3):
        wl = w(ks[i], (d_in, HIDDEN)); i += 1                     # lin_l weight, bf16
        wr = w(ks[i], (d_in, HIDDEN)); i += 1                     # lin_r weight, bf16
        att = w(ks[i], (1, HIDDEN), dtype=jnp.float32); i += 1    # att vector (row)
        bl = jnp.zeros((1, HIDDEN), jnp.float32)
        br = jnp.zeros((1, HIDDEN), jnp.float32)
        bias = jnp.zeros((1, HIDDEN), jnp.float32)
        gat.append((wl, bl, wr, br, att, bias))
        d_in = HIDDEN

    # TODO(synk): the spec's trailing nn.Linear(512, 512) cannot produce the
    # (N,)-shaped output required by `.reshape((x.size()[0],))`; the policy
    # head's last linear is implemented as 512 -> 1 (per-node logit) so that
    # Mask + Softmax(dim=0) + reshape are well defined.
    head = (
        w(ks[9], (HIDDEN, HIDDEN)),                   # Linear(512, 512), bf16
        jnp.zeros((1, HIDDEN), jnp.float32),
        w(ks[10], (HIDDEN, HIDDEN)),                  # Linear(512, 512), bf16
        jnp.zeros((1, HIDDEN), jnp.float32),
        w(ks[11], (HIDDEN, 1), dtype=jnp.float32),    # Linear(512, 1) per-node logit
        jnp.zeros((1, 1), jnp.float32),
    )
    return {"gat": gat, "head": head}


if __name__ == "__main__":
    key = jax.random.PRNGKey(0)
    k_x, k_p = jax.random.split(key)

    x = jax.random.normal(k_x, (N_NODES, F_IN), dtype=jnp.float32)

    # Ring graph, both directions: (2, 2N) int32 edge_index.
    fwd = jnp.arange(N_NODES, dtype=jnp.int32)
    bwd = (fwd + 1) % N_NODES
    edge_index = jnp.stack(
        [jnp.concatenate([fwd, bwd]), jnp.concatenate([bwd, fwd])], axis=0)
    current_vertex = jnp.int32(0)

    params = init_params(k_p)
    out = deep_ham_actor(x, edge_index, current_vertex, params)
    jax.block_until_ready(out)

    assert out.shape == (N_NODES,) and out.dtype == jnp.float32
    assert bool(jnp.all(jnp.isfinite(out)))
    assert abs(float(jnp.sum(out)) - 1.0) < 1e-2   # softmax output sums to ~1
    print("KERNEL_OK")
</pallas_src>

<mosaic_0001>
module attributes {stable_mosaic.version = 11 : i64} {
  func.func @_actor_kernel(%arg0: memref<8x16xf32, #tpu.memory_space<vmem>>, %arg1: memref<8x8xf32, #tpu.memory_space<vmem>>, %arg2: memref<8x1xf32, #tpu.memory_space<vmem>>, %arg3: memref<16x512xbf16, #tpu.memory_space<vmem>>, %arg4: memref<1x512xf32, #tpu.memory_space<vmem>>, %arg5: memref<16x512xbf16, #tpu.memory_space<vmem>>, %arg6: memref<1x512xf32, #tpu.memory_space<vmem>>, %arg7: memref<1x512xf32, #tpu.memory_space<vmem>>, %arg8: memref<1x512xf32, #tpu.memory_space<vmem>>, %arg9: memref<512x512xbf16, #tpu.memory_space<vmem>>, %arg10: memref<1x512xf32, #tpu.memory_space<vmem>>, %arg11: memref<512x512xbf16, #tpu.memory_space<vmem>>, %arg12: memref<1x512xf32, #tpu.memory_space<vmem>>, %arg13: memref<1x512xf32, #tpu.memory_space<vmem>>, %arg14: memref<1x512xf32, #tpu.memory_space<vmem>>, %arg15: memref<512x512xbf16, #tpu.memory_space<vmem>>, %arg16: memref<1x512xf32, #tpu.memory_space<vmem>>, %arg17: memref<512x512xbf16, #tpu.memory_space<vmem>>, %arg18: memref<1x512xf32, #tpu.memory_space<vmem>>, %arg19: memref<1x512xf32, #tpu.memory_space<vmem>>, %arg20: memref<1x512xf32, #tpu.memory_space<vmem>>, %arg21: memref<512x512xbf16, #tpu.memory_space<vmem>>, %arg22: memref<1x512xf32, #tpu.memory_space<vmem>>, %arg23: memref<512x512xbf16, #tpu.memory_space<vmem>>, %arg24: memref<1x512xf32, #tpu.memory_space<vmem>>, %arg25: memref<512x1xf32, #tpu.memory_space<vmem>>, %arg26: memref<1x1xf32, #tpu.memory_space<vmem>>, %arg27: memref<8x1xf32, #tpu.memory_space<vmem>>) attributes {dimension_semantics = [], scalar_prefetch = 0 : i64, scratch_operands = 0 : i64, tpu.core_type = #tpu.core_type<tc>} {
    %c0 = arith.constant 0 : index
    %c0_0 = arith.constant 0 : index
    %0 = vector.load %arg0[%c0, %c0_0] : memref<8x16xf32, #tpu.memory_space<vmem>>, vector<8x16xf32>
    %c0_1 = arith.constant 0 : index
    %c0_2 = arith.constant 0 : index
    %1 = vector.load %arg1[%c0_1, %c0_2] : memref<8x8xf32, #tpu.memory_space<vmem>>, vector<8x8xf32>
    %2 = arith.truncf %0 : vector<8x16xf32> to vector<8x16xbf16>
    %c0_3 = arith.constant 0 : index
    %c0_4 = arith.constant 0 : index
    %3 = vector.load %arg3[%c0_3, %c0_4] : memref<16x512xbf16, #tpu.memory_space<vmem>>, vector<16x512xbf16>
    %cst = arith.constant dense<0.000000e+00> : vector<8x512xf32>
    %4 = tpu.matmul %2, %3, %cst {dimension_numbers = #tpu.dot_dimension_numbers<[1], [0], [0], [1], [0, 0, 1, 1], [], []>} : vector<8x16xbf16>, vector<16x512xbf16>, vector<8x512xf32> -> vector<8x512xf32>
    %c0_5 = arith.constant 0 : index
    %c0_6 = arith.constant 0 : index
    %5 = vector.load %arg4[%c0_5, %c0_6] : memref<1x512xf32, #tpu.memory_space<vmem>>, vector<1x512xf32>
    %6 = vector.broadcast %5 : vector<1x512xf32> to vector<8x512xf32>
    %7 = arith.addf %4, %6 : vector<8x512xf32>
    %c0_7 = arith.constant 0 : index
    %c0_8 = arith.constant 0 : index
    %8 = vector.load %arg5[%c0_7, %c0_8] : memref<16x512xbf16, #tpu.memory_space<vmem>>, vector<16x512xbf16>
    %cst_9 = arith.constant dense<0.000000e+00> : vector<8x512xf32>
    %9 = tpu.matmul %2, %8, %cst_9 {dimension_numbers = #tpu.dot_dimension_numbers<[1], [0], [0], [1], [0, 0, 1, 1], [], []>} : vector<8x16xbf16>, vector<16x512xbf16>, vector<8x512xf32> -> vector<8x512xf32>
    %c0_10 = arith.constant 0 : index
    %c0_11 = arith.constant 0 : index
    %10 = vector.load %arg6[%c0_10, %c0_11] : memref<1x512xf32, #tpu.memory_space<vmem>>, vector<1x512xf32>
    %11 = vector.broadcast %10 : vector<1x512xf32> to vector<8x512xf32>
    %12 = arith.addf %9, %11 : vector<8x512xf32>
    %13 = vector.shape_cast %12 : vector<8x512xf32> to vector<8x1x512xf32>
    %14 = vector.shape_cast %7 : vector<8x512xf32> to vector<1x8x512xf32>
    %15 = vector.broadcast %13 : vector<8x1x512xf32> to vector<8x8x512xf32>
    %16 = vector.broadcast %14 : vector<1x8x512xf32> to vector<8x8x512xf32>
    %17 = arith.addf %15, %16 : vector<8x8x512xf32>
    %cst_12 = arith.constant 0.000000e+00 : f32
    %18 = vector.broadcast %cst_12 : f32 to vector<8x8x512xf32>
    %19 = arith.cmpf oge, %17, %18 : vector<8x8x512xf32>
    %cst_13 = arith.constant 2.000000e-01 : f32
    %20 = vector.broadcast %cst_13 : f32 to vector<8x8x512xf32>
    %21 = arith.mulf %20, %17 : vector<8x8x512xf32>
    %22 = arith.select %19, %17, %21 : vector<8x8x512xi1>, vector<8x8x512xf32>
    %c0_14 = arith.constant 0 : index
    %c0_15 = arith.constant 0 : index
    %23 = vector.load %arg7[%c0_14, %c0_15] : memref<1x512xf32, #tpu.memory_space<vmem>>, vector<1x512xf32>
    %24 = vector.shape_cast %23 : vector<1x512xf32> to vector<1x1x512xf32>
    %25 = vector.broadcast %24 : vector<1x1x512xf32> to vector<8x8x512xf32>
    %26 = arith.mulf %22, %25 : vector<8x8x512xf32>
    %cst_16 = arith.constant dense<0.000000e+00> : vector<8x8xf32>
    %27 = vector.multi_reduction <add>, %26, %cst_16 [2] : vector<8x8x512xf32> to vector<8x8xf32>
    %cst_17 = arith.constant 0.000000e+00 : f32
    %28 = vector.broadcast %cst_17 : f32 to vector<8x8xf32>
    %29 = arith.cmpf ogt, %1, %28 : vector<8x8xf32>
    %cst_18 = arith.constant -1.000000e+30 : f32
    %30 = vector.broadcast %cst_18 : f32 to vector<8x8xf32>
    %31 = arith.select %29, %27, %30 : vector<8x8xi1>, vector<8x8xf32>
    %cst_19 = arith.constant dense<0xFF800000> : vector<8xf32>
    %32 = vector.multi_reduction <maximumf>, %31, %cst_19 [1] : vector<8x8xf32> to vector<8xf32>
    %33 = vector.shape_cast %32 : vector<8xf32> to vector<8x1xf32>
    %34 = vector.broadcast %33 : vector<8x1xf32> to vector<8x8xf32>
    %35 = arith.subf %31, %34 : vector<8x8xf32>
    %36 = math.exp %35 : vector<8x8xf32>
    %cst_20 = arith.constant dense<0.000000e+00> : vector<8xf32>
    %37 = vector.multi_reduction <add>, %36, %cst_20 [1] : vector<8x8xf32> to vector<8xf32>
    %38 = vector.shape_cast %37 : vector<8xf32> to vector<8x1xf32>
    %39 = tpu.reciprocal %38 {approx = true} : vector<8x1xf32> -> vector<8x1xf32>
    %40 = vector.broadcast %39 : vector<8x1xf32> to vector<8x8xf32>
    %41 = arith.mulf %36, %40 : vector<8x8xf32>
    %cst_21 = arith.constant dense<0.000000e+00> : vector<8x512xf32>
    %42 = tpu.matmul %41, %7, %cst_21 {dimension_numbers = #tpu.dot_dimension_numbers<[1], [0], [0], [1], [0, 0, 1, 1], [], []>} : vector<8x8xf32>, vector<8x512xf32>, vector<8x512xf32> -> vector<8x512xf32>
    %c0_22 = arith.constant 0 : index
    %c0_23 = arith.constant 0 : index
    %43 = vector.load %arg8[%c0_22, %c0_23] : memref<1x512xf32, #tpu.memory_space<vmem>>, vector<1x512xf32>
    %44 = vector.broadcast %43 : vector<1x512xf32> to vector<8x512xf32>
    %45 = arith.addf %42, %44 : vector<8x512xf32>
    %46 = math.tanh %45 : vector<8x512xf32>
    %47 = arith.truncf %46 : vector<8x512xf32> to vector<8x512xbf16>
    %c0_24 = arith.constant 0 : index
    %c0_25 = arith.constant 0 : index
    %48 = vector.load %arg9[%c0_24, %c0_25] : memref<512x512xbf16, #tpu.memory_space<vmem>>, vector<512x512xbf16>
    %cst_26 = arith.constant dense<0.000000e+00> : vector<8x512xf32>
    %49 = tpu.matmul %47, %48, %cst_26 {dimension_numbers = #tpu.dot_dimension_numbers<[1], [0], [0], [1], [0, 0, 1, 1], [], []>} : vector<8x512xbf16>, vector<512x512xbf16>, vector<8x512xf32> -> vector<8x512xf32>
    %c0_27 = arith.constant 0 : index
    %c0_28 = arith.constant 0 : index
    %50 = vector.load %arg10[%c0_27, %c0_28] : memref<1x512xf32, #tpu.memory_space<vmem>>, vector<1x512xf32>
    %51 = vector.broadcast %50 : vector<1x512xf32> to vector<8x512xf32>
    %52 = arith.addf %49, %51 : vector<8x512xf32>
    %c0_29 = arith.constant 0 : index
    %c0_30 = arith.constant 0 : index
    %53 = vector.load %arg11[%c0_29, %c0_30] : memref<512x512xbf16, #tpu.memory_space<vmem>>, vector<512x512xbf16>
    %cst_31 = arith.constant dense<0.000000e+00> : vector<8x512xf32>
    %54 = tpu.matmul %47, %53, %cst_31 {dimension_numbers = #tpu.dot_dimension_numbers<[1], [0], [0], [1], [0, 0, 1, 1], [], []>} : vector<8x512xbf16>, vector<512x512xbf16>, vector<8x512xf32> -> vector<8x512xf32>
    %c0_32 = arith.constant 0 : index
    %c0_33 = arith.constant 0 : index
    %55 = vector.load %arg12[%c0_32, %c0_33] : memref<1x512xf32, #tpu.memory_space<vmem>>, vector<1x512xf32>
    %56 = vector.broadcast %55 : vector<1x512xf32> to vector<8x512xf32>
    %57 = arith.addf %54, %56 : vector<8x512xf32>
    %58 = vector.shape_cast %57 : vector<8x512xf32> to vector<8x1x512xf32>
    %59 = vector.shape_cast %52 : vector<8x512xf32> to vector<1x8x512xf32>
    %60 = vector.broadcast %58 : vector<8x1x512xf32> to vector<8x8x512xf32>
    %61 = vector.broadcast %59 : vector<1x8x512xf32> to vector<8x8x512xf32>
    %62 = arith.addf %60, %61 : vector<8x8x512xf32>
    %cst_34 = arith.constant 0.000000e+00 : f32
    %63 = vector.broadcast %cst_34 : f32 to vector<8x8x512xf32>
    %64 = arith.cmpf oge, %62, %63 : vector<8x8x512xf32>
    %cst_35 = arith.constant 2.000000e-01 : f32
    %65 = vector.broadcast %cst_35 : f32 to vector<8x8x512xf32>
    %66 = arith.mulf %65, %62 : vector<8x8x512xf32>
    %67 = arith.select %64, %62, %66 : vector<8x8x512xi1>, vector<8x8x512xf32>
    %c0_36 = arith.constant 0 : index
    %c0_37 = arith.constant 0 : index
    %68 = vector.load %arg13[%c0_36, %c0_37] : memref<1x512xf32, #tpu.memory_space<vmem>>, vector<1x512xf32>
    %69 = vector.shape_cast %68 : vector<1x512xf32> to vector<1x1x512xf32>
    %70 = vector.broadcast %69 : vector<1x1x512xf32> to vector<8x8x512xf32>
    %71 = arith.mulf %67, %70 : vector<8x8x512xf32>
    %cst_38 = arith.constant dense<0.000000e+00> : vector<8x8xf32>
    %72 = vector.multi_reduction <add>, %71, %cst_38 [2] : vector<8x8x512xf32> to vector<8x8xf32>
    %cst_39 = arith.constant 0.000000e+00 : f32
    %73 = vector.broadcast %cst_39 : f32 to vector<8x8xf32>
    %74 = arith.cmpf ogt, %1, %73 : vector<8x8xf32>
    %cst_40 = arith.constant -1.000000e+30 : f32
    %75 = vector.broadcast %cst_40 : f32 to vector<8x8xf32>
    %76 = arith.select %74, %72, %75 : vector<8x8xi1>, vector<8x8xf32>
    %cst_41 = arith.constant dense<0xFF800000> : vector<8xf32>
    %77 = vector.multi_reduction <maximumf>, %76, %cst_41 [1] : vector<8x8xf32> to vector<8xf32>
    %78 = vector.shape_cast %77 : vector<8xf32> to vector<8x1xf32>
    %79 = vector.broadcast %78 : vector<8x1xf32> to vector<8x8xf32>
    %80 = arith.subf %76, %79 : vector<8x8xf32>
    %81 = math.exp %80 : vector<8x8xf32>
    %cst_42 = arith.constant dense<0.000000e+00> : vector<8xf32>
    %82 = vector.multi_reduction <add>, %81, %cst_42 [1] : vector<8x8xf32> to vector<8xf32>
    %83 = vector.shape_cast %82 : vector<8xf32> to vector<8x1xf32>
    %84 = tpu.reciprocal %83 {approx = true} : vector<8x1xf32> -> vector<8x1xf32>
    %85 = vector.broadcast %84 : vector<8x1xf32> to vector<8x8xf32>
    %86 = arith.mulf %81, %85 : vector<8x8xf32>
    %cst_43 = arith.constant dense<0.000000e+00> : vector<8x512xf32>
    %87 = tpu.matmul %86, %52, %cst_43 {dimension_numbers = #tpu.dot_dimension_numbers<[1], [0], [0], [1], [0, 0, 1, 1], [], []>} : vector<8x8xf32>, vector<8x512xf32>, vector<8x512xf32> -> vector<8x512xf32>
    %c0_44 = arith.constant 0 : index
    %c0_45 = arith.constant 0 : index
    %88 = vector.load %arg14[%c0_44, %c0_45] : memref<1x512xf32, #tpu.memory_space<vmem>>, vector<1x512xf32>
    %89 = vector.broadcast %88 : vector<1x512xf32> to vector<8x512xf32>
    %90 = arith.addf %87, %89 : vector<8x512xf32>
    %91 = math.tanh %90 : vector<8x512xf32>
    %92 = arith.truncf %91 : vector<8x512xf32> to vector<8x512xbf16>
    %c0_46 = arith.constant 0 : index
    %c0_47 = arith.constant 0 : index
    %93 = vector.load %arg15[%c0_46, %c0_47] : memref<512x512xbf16, #tpu.memory_space<vmem>>, vector<512x512xbf16>
    %cst_48 = arith.constant dense<0.000000e+00> : vector<8x512xf32>
    %94 = tpu.matmul %92, %93, %cst_48 {dimension_numbers = #tpu.dot_dimension_numbers<[1], [0], [0], [1], [0, 0, 1, 1], [], []>} : vector<8x512xbf16>, vector<512x512xbf16>, vector<8x512xf32> -> vector<8x512xf32>
    %c0_49 = arith.constant 0 : index
    %c0_50 = arith.constant 0 : index
    %95 = vector.load %arg16[%c0_49, %c0_50] : memref<1x512xf32, #tpu.memory_space<vmem>>, vector<1x512xf32>
    %96 = vector.broadcast %95 : vector<1x512xf32> to vector<8x512xf32>
    %97 = arith.addf %94, %96 : vector<8x512xf32>
    %c0_51 = arith.constant 0 : index
    %c0_52 = arith.constant 0 : index
    %98 = vector.load %arg17[%c0_51, %c0_52] : memref<512x512xbf16, #tpu.memory_space<vmem>>, vector<512x512xbf16>
    %cst_53 = arith.constant dense<0.000000e+00> : vector<8x512xf32>
    %99 = tpu.matmul %92, %98, %cst_53 {dimension_numbers = #tpu.dot_dimension_numbers<[1], [0], [0], [1], [0, 0, 1, 1], [], []>} : vector<8x512xbf16>, vector<512x512xbf16>, vector<8x512xf32> -> vector<8x512xf32>
    %c0_54 = arith.constant 0 : index
    %c0_55 = arith.constant 0 : index
    %100 = vector.load %arg18[%c0_54, %c0_55] : memref<1x512xf32, #tpu.memory_space<vmem>>, vector<1x512xf32>
    %101 = vector.broadcast %100 : vector<1x512xf32> to vector<8x512xf32>
    %102 = arith.addf %99, %101 : vector<8x512xf32>
    %103 = vector.shape_cast %102 : vector<8x512xf32> to vector<8x1x512xf32>
    %104 = vector.shape_cast %97 : vector<8x512xf32> to vector<1x8x512xf32>
    %105 = vector.broadcast %103 : vector<8x1x512xf32> to vector<8x8x512xf32>
    %106 = vector.broadcast %104 : vector<1x8x512xf32> to vector<8x8x512xf32>
    %107 = arith.addf %105, %106 : vector<8x8x512xf32>
    %cst_56 = arith.constant 0.000000e+00 : f32
    %108 = vector.broadcast %cst_56 : f32 to vector<8x8x512xf32>
    %109 = arith.cmpf oge, %107, %108 : vector<8x8x512xf32>
    %cst_57 = arith.constant 2.000000e-01 : f32
    %110 = vector.broadcast %cst_57 : f32 to vector<8x8x512xf32>
    %111 = arith.mulf %110, %107 : vector<8x8x512xf32>
    %112 = arith.select %109, %107, %111 : vector<8x8x512xi1>, vector<8x8x512xf32>
    %c0_58 = arith.constant 0 : index
    %c0_59 = arith.constant 0 : index
    %113 = vector.load %arg19[%c0_58, %c0_59] : memref<1x512xf32, #tpu.memory_space<vmem>>, vector<1x512xf32>
    %114 = vector.shape_cast %113 : vector<1x512xf32> to vector<1x1x512xf32>
    %115 = vector.broadcast %114 : vector<1x1x512xf32> to vector<8x8x512xf32>
    %116 = arith.mulf %112, %115 : vector<8x8x512xf32>
    %cst_60 = arith.constant dense<0.000000e+00> : vector<8x8xf32>
    %117 = vector.multi_reduction <add>, %116, %cst_60 [2] : vector<8x8x512xf32> to vector<8x8xf32>
    %cst_61 = arith.constant 0.000000e+00 : f32
    %118 = vector.broadcast %cst_61 : f32 to vector<8x8xf32>
    %119 = arith.cmpf ogt, %1, %118 : vector<8x8xf32>
    %cst_62 = arith.constant -1.000000e+30 : f32
    %120 = vector.broadcast %cst_62 : f32 to vector<8x8xf32>
    %121 = arith.select %119, %117, %120 : vector<8x8xi1>, vector<8x8xf32>
    %cst_63 = arith.constant dense<0xFF800000> : vector<8xf32>
    %122 = vector.multi_reduction <maximumf>, %121, %cst_63 [1] : vector<8x8xf32> to vector<8xf32>
    %123 = vector.shape_cast %122 : vector<8xf32> to vector<8x1xf32>
    %124 = vector.broadcast %123 : vector<8x1xf32> to vector<8x8xf32>
    %125 = arith.subf %121, %124 : vector<8x8xf32>
    %126 = math.exp %125 : vector<8x8xf32>
    %cst_64 = arith.constant dense<0.000000e+00> : vector<8xf32>
    %127 = vector.multi_reduction <add>, %126, %cst_64 [1] : vector<8x8xf32> to vector<8xf32>
    %128 = vector.shape_cast %127 : vector<8xf32> to vector<8x1xf32>
    %129 = tpu.reciprocal %128 {approx = true} : vector<8x1xf32> -> vector<8x1xf32>
    %130 = vector.broadcast %129 : vector<8x1xf32> to vector<8x8xf32>
    %131 = arith.mulf %126, %130 : vector<8x8xf32>
    %cst_65 = arith.constant dense<0.000000e+00> : vector<8x512xf32>
    %132 = tpu.matmul %131, %97, %cst_65 {dimension_numbers = #tpu.dot_dimension_numbers<[1], [0], [0], [1], [0, 0, 1, 1], [], []>} : vector<8x8xf32>, vector<8x512xf32>, vector<8x512xf32> -> vector<8x512xf32>
    %c0_66 = arith.constant 0 : index
    %c0_67 = arith.constant 0 : index
    %133 = vector.load %arg20[%c0_66, %c0_67] : memref<1x512xf32, #tpu.memory_space<vmem>>, vector<1x512xf32>
    %134 = vector.broadcast %133 : vector<1x512xf32> to vector<8x512xf32>
    %135 = arith.addf %132, %134 : vector<8x512xf32>
    %136 = math.tanh %135 : vector<8x512xf32>
    %137 = arith.truncf %136 : vector<8x512xf32> to vector<8x512xbf16>
    %c0_68 = arith.constant 0 : index
    %c0_69 = arith.constant 0 : index
    %138 = vector.load %arg21[%c0_68, %c0_69] : memref<512x512xbf16, #tpu.memory_space<vmem>>, vector<512x512xbf16>
    %cst_70 = arith.constant dense<0.000000e+00> : vector<8x512xf32>
    %139 = tpu.matmul %137, %138, %cst_70 {dimension_numbers = #tpu.dot_dimension_numbers<[1], [0], [0], [1], [0, 0, 1, 1], [], []>} : vector<8x512xbf16>, vector<512x512xbf16>, vector<8x512xf32> -> vector<8x512xf32>
    %c0_71 = arith.constant 0 : index
    %c0_72 = arith.constant 0 : index
    %140 = vector.load %arg22[%c0_71, %c0_72] : memref<1x512xf32, #tpu.memory_space<vmem>>, vector<1x512xf32>
    %141 = vector.broadcast %140 : vector<1x512xf32> to vector<8x512xf32>
    %142 = arith.addf %139, %141 : vector<8x512xf32>
    %cst_73 = arith.constant 0.000000e+00 : f32
    %143 = vector.broadcast %cst_73 : f32 to vector<8x512xf32>
    %144 = arith.cmpf oge, %142, %143 : vector<8x512xf32>
    %cst_74 = arith.constant 0.00999999977 : f32
    %145 = vector.broadcast %cst_74 : f32 to vector<8x512xf32>
    %146 = arith.mulf %145, %142 : vector<8x512xf32>
    %147 = arith.select %144, %142, %146 : vector<8x512xi1>, vector<8x512xf32>
    %148 = arith.truncf %147 : vector<8x512xf32> to vector<8x512xbf16>
    %c0_75 = arith.constant 0 : index
    %c0_76 = arith.constant 0 : index
    %149 = vector.load %arg23[%c0_75, %c0_76] : memref<512x512xbf16, #tpu.memory_space<vmem>>, vector<512x512xbf16>
    %cst_77 = arith.constant dense<0.000000e+00> : vector<8x512xf32>
    %150 = tpu.matmul %148, %149, %cst_77 {dimension_numbers = #tpu.dot_dimension_numbers<[1], [0], [0], [1], [0, 0, 1, 1], [], []>} : vector<8x512xbf16>, vector<512x512xbf16>, vector<8x512xf32> -> vector<8x512xf32>
    %c0_78 = arith.constant 0 : index
    %c0_79 = arith.constant 0 : index
    %151 = vector.load %arg24[%c0_78, %c0_79] : memref<1x512xf32, #tpu.memory_space<vmem>>, vector<1x512xf32>
    %152 = vector.broadcast %151 : vector<1x512xf32> to vector<8x512xf32>
    %153 = arith.addf %150, %152 : vector<8x512xf32>
    %cst_80 = arith.constant 0.000000e+00 : f32
    %154 = vector.broadcast %cst_80 : f32 to vector<8x512xf32>
    %155 = arith.cmpf oge, %153, %154 : vector<8x512xf32>
    %cst_81 = arith.constant 0.00999999977 : f32
    %156 = vector.broadcast %cst_81 : f32 to vector<8x512xf32>
    %157 = arith.mulf %156, %153 : vector<8x512xf32>
    %158 = arith.select %155, %153, %157 : vector<8x512xi1>, vector<8x512xf32>
    %c0_82 = arith.constant 0 : index
    %c0_83 = arith.constant 0 : index
    %159 = vector.load %arg25[%c0_82, %c0_83] : memref<512x1xf32, #tpu.memory_space<vmem>>, vector<512x1xf32>
    %cst_84 = arith.constant dense<0.000000e+00> : vector<8x1xf32>
    %160 = tpu.matmul %158, %159, %cst_84 {dimension_numbers = #tpu.dot_dimension_numbers<[1], [0], [0], [1], [0, 0, 1, 1], [], []>} : vector<8x512xf32>, vector<512x1xf32>, vector<8x1xf32> -> vector<8x1xf32>
    %c0_85 = arith.constant 0 : index
    %c0_86 = arith.constant 0 : index
    %161 = vector.load %arg26[%c0_85, %c0_86] : memref<1x1xf32, #tpu.memory_space<vmem>>, vector<1x1xf32>
    %162 = vector.broadcast %161 : vector<1x1xf32> to vector<8x1xf32>
    %163 = arith.addf %160, %162 : vector<8x1xf32>
    %c0_87 = arith.constant 0 : index
    %c0_88 = arith.constant 0 : index
    %164 = vector.load %arg2[%c0_87, %c0_88] : memref<8x1xf32, #tpu.memory_space<vmem>>, vector<8x1xf32>
    %cst_89 = arith.constant 0.000000e+00 : f32
    %165 = vector.broadcast %cst_89 : f32 to vector<8x1xf32>
    %166 = arith.cmpf ogt, %164, %165 : vector<8x1xf32>
    %cst_90 = arith.constant -1.000000e+30 : f32
    %167 = vector.broadcast %cst_90 : f32 to vector<8x1xf32>
    %168 = arith.select %166, %163, %167 : vector<8x1xi1>, vector<8x1xf32>
    %cst_91 = arith.constant dense<0xFF800000> : vector<1xf32>
    %169 = vector.multi_reduction <maximumf>, %168, %cst_91 [0] : vector<8x1xf32> to vector<1xf32>
    %170 = vector.shape_cast %169 : vector<1xf32> to vector<1x1xf32>
    %171 = vector.broadcast %170 : vector<1x1xf32> to vector<8x1xf32>
    %172 = arith.subf %168, %171 : vector<8x1xf32>
    %173 = math.exp %172 : vector<8x1xf32>
    %cst_92 = arith.constant dense<0.000000e+00> : vector<1xf32>
    %174 = vector.multi_reduction <add>, %173, %cst_92 [0] : vector<8x1xf32> to vector<1xf32>
    %175 = vector.shape_cast %174 : vector<1xf32> to vector<1x1xf32>
    %176 = tpu.reciprocal %175 {approx = true} : vector<1x1xf32> -> vector<1x1xf32>
    %177 = vector.broadcast %176 : vector<1x1xf32> to vector<8x1xf32>
    %178 = arith.mulf %173, %177 : vector<8x1xf32>
    %c0_93 = arith.constant 0 : index
    %c0_94 = arith.constant 0 : index
    %179 = vector.load %arg27[%c0_93, %c0_94] : memref<8x1xf32, #tpu.memory_space<vmem>>, vector<8x1xf32>
    tpu.vector_store %arg27[%c0_93, %c0_94], %178 {strides = array<i32>} : memref<8x1xf32, #tpu.memory_space<vmem>>, vector<8x1xf32>,
    return
  }
}

</mosaic_0001>

<bundles_post_ra>
// kernel: tpu_custom_call.1
= control target key start
LH: loop header
LB: loop body
LE: loop exit
PB: predicated region body
PF: predicated region fallthrough
CT: control target
= control target key end

     0   :  { %s11862_s0 = inlined_call_operand.vmem [shape: f32[8,16], index: 0, kind: input, shape index: {}]   ;;  %s11863_s1 = inlined_call_operand.vmem [shape: f32[8,8], index: 1, kind: input, shape index: {}]   ;;  %s11864_s2 = inlined_call_operand.vmem [shape: f32[8,1], index: 2, kind: input, shape index: {}]   ;;  %s11865_s3 = inlined_call_operand.vmem [shape: bf16[16,512], index: 3, kind: input, shape index: {}]   ;;  %s11866_s4 = inlined_call_operand.vmem [shape: f32[1,512], index: 4, kind: input, shape index: {}]   ;;  %s11867_s5 = inlined_call_operand.vmem [shape: bf16[16,512], index: 5, kind: input, shape index: {}]   ;;  %s11868_s6 = inlined_call_operand.vmem [shape: f32[1,512], index: 6, kind: input, shape index: {}]   ;;  %s11869_s7 = inlined_call_operand.vmem [shape: f32[1,512], index: 7, kind: input, shape index: {}]   ;;  %s11870_s8 = inlined_call_operand.vmem [shape: f32[1,512], index: 8, kind: input, shape index: {}]   ;;  %s11871_s9 = inlined_call_operand.hbm [shape: bf16[512,512], index: 9, kind: input, shape index: {}]   ;;  %s11872_s10 = inlined_call_operand.vmem [shape: f32[1,512], index: 10, kind: input, shape index: {}]   ;;  %s11873_s11 = inlined_call_operand.hbm [shape: bf16[512,512], index: 11, kind: input, shape index: {}]   ;;  %s11874_s12 = inlined_call_operand.vmem [shape: f32[1,512], index: 12, kind: input, shape index: {}]   ;;  %s11875_s13 = inlined_call_operand.vmem [shape: f32[1,512], index: 13, kind: input, shape index: {}]   ;;  %s11876_s14 = inlined_call_operand.vmem [shape: f32[1,512], index: 14, kind: input, shape index: {}]   ;;  %s11877_s15 = inlined_call_operand.hbm [shape: bf16[512,512], index: 15, kind: input, shape index: {}]   ;;  %s11878_s16 = inlined_call_operand.vmem [shape: f32[1,512], index: 16, kind: input, shape index: {}]   ;;  %s11879_s17 = inlined_call_operand.hbm [shape: bf16[512,512], index: 17, kind: input, shape index: {}]   ;;  %s11880_s18 = inlined_call_operand.vmem [shape: f32[1,512], index: 18, kind: input, shape index: {}]   ;;  %s11881_s19 = inlined_call_operand.vmem [shape: f32[1,512], index: 19, kind: input, shape index: {}]   ;;  %s11882_s20 = inlined_call_operand.vmem [shape: f32[1,512], index: 20, kind: input, shape index: {}]   ;;  %s11883_s21 = inlined_call_operand.hbm [shape: bf16[512,512], index: 21, kind: input, shape index: {}]   ;;  %s11884_s22 = inlined_call_operand.vmem [shape: f32[1,512], index: 22, kind: input, shape index: {}]   ;;  %s11885_s23 = inlined_call_operand.hbm [shape: bf16[512,512], index: 23, kind: input, shape index: {}]   ;;  %s11886_s24 = inlined_call_operand.vmem [shape: f32[1,512], index: 24, kind: input, shape index: {}]   ;;  %s11887_s25 = inlined_call_operand.vmem [shape: f32[512,1], index: 25, kind: input, shape index: {}]   ;;  %s11888_s26 = inlined_call_operand.<no memory space> [shape: f32[1,1], index: 26, kind: input, shape index: {}]   ;;  %s11889_s27 = inlined_call_operand.vmem [shape: f32[8,1], index: 27, kind: output, shape index: {}]  }
   0x1   :  { %11893 = sst [smem:[#allocation17_spill]] %s11862_s0  ;;  %v32_v0 = vstv %s11888_s26 }
   0x2   :  { %11894 = sst [smem:[#allocation18_spill]] %s11863_s1  ;;  %33 = vst [vmem:[#allocation2] sm:$0x1] %v32_v0 }
   0x3   :  { %11895 = sst [smem:[#allocation19_spill]] %s11864_s2 }
   0x4   :  { %11896 = sst [smem:[#allocation20_spill]] %s11865_s3 }
   0x5   :  { %11897 = sst [smem:[#allocation21_spill]] %s11866_s4 }
   0x6   :  { %11898 = sst [smem:[#allocation22_spill]] %s11867_s5 }
   0x7   :  { %11899 = sst [smem:[#allocation23_spill]] %s11868_s6 }
   0x8   :  { %11900 = sst [smem:[#allocation24_spill]] %s11869_s7 }
   0x9   :  { %11901 = sst [smem:[#allocation25_spill]] %s11870_s8 }
   0xa   :  { %11902 = sst [smem:[#allocation26_spill]] %s11871_s9 }
   0xb   :  { %11903 = sst [smem:[#allocation27_spill]] %s11872_s10 }
   0xc   :  { %11904 = sst [smem:[#allocation28_spill]] %s11873_s11 }
   0xd   :  { %34 = vsyncpa [#allocation4], 0 }
   0xe   :  { %35 = vsyncpa [#allocation6], 0 }
   0xf   :  { %36 = vsyncpa [#allocation9], 0 }
  0x10   :  { %37 = vsyncpa [#allocation12], 0  ;;  %s10707_s8 = smov [#allocation5]   ;;  %s10708_s9 = smov [#allocation8]  }
  0x11   :  { %s75_s30 = sshll.u32 %s10707_s8, 4  ;;  %s107_s5 = sshll.u32 %s10708_s9, 4  ;;  %s76_s30 = int_to_ptr.vmem [resolvable:$true] %s75_s30  ;;  %s108_s5 = int_to_ptr.vmem [resolvable:$true] %s107_s5 }
  0x12   :  { %s10587_s28 = scalar_lea.vmem %s76_s30, 16384  ;;  %p10592_p1 = scmp.lt.s32.totalorder %s76_s30, %s76_s30 }
  0x13   :  { %p10588_p0 = scmp.ne.s32.totalorder %s76_s30, %s10587_s28  ;;  %p10593_p2 = scmp.lt.s32.totalorder %s10587_s28, %s10587_s28 }
  0x15   :  { %p10594_p3 = por %p10593_p2, %p10592_p1 }
  0x17   :  { %p10595_p4 = pnand %p10594_p3, %p10588_p0 }
  0x19   :  { %10598 = shalt.err (!%p10595_p4)
}
  0x1a   :  { %s10709_s0 = smov 256   ;;  %s10710_s26 = smov 16  }
  0x1b   :  { %s11905_s1 = sld [smem:[#allocation28_spill]]  ;;  %s10607_s6 = scalar_lea.vmem %s108_s5, 16384 }
  0x1c   :  { %p10608_p5 = scmp.ne.s32.totalorder %s108_s5, %s10607_s6  ;;  %p10612_p6 = scmp.lt.s32.totalorder %s108_s5, %s108_s5 }
  0x1d   :  { %p10613_p7 = scmp.lt.s32.totalorder %s10607_s6, %s10607_s6 }
  0x1f   :  { %p10614_p8 = por %p10613_p7, %p10612_p6 }
  0x21   :  { %81 = dma.hbm_to_vmem [thread:$0]  %s11905_s1, 16384, %s76_s30, [#allocation6], %s10709_s0, %s10709_s0, %s10710_s26  }
  0x22   :  { %p10615_p9 = pnand %p10614_p8, %p10608_p5 }
  0x24   :  { %10618 = shalt.err (!%p10615_p9)
}
  0x25   :  { %113 = dma.hbm_to_vmem [thread:$0]  %s11879_s17, 16384, %s108_s5, [#allocation9], %s10709_s0, %s10709_s0, %s10710_s26  }
  0x26   :  { %s10711_s3 = smov [#allocation3]   ;;  %s10712_s4 = smov [#allocation7]  }
  0x27   :  { %s61_s7 = sshll.u32 %s10711_s3, 4  ;;  %s93_s8 = sshll.u32 %s10712_s4, 4  ;;  %s62_s7 = int_to_ptr.vmem [resolvable:$true] %s61_s7  ;;  %s94_s8 = int_to_ptr.vmem [resolvable:$true] %s93_s8 }
  0x28   :  { %s10627_s30 = scalar_lea.vmem %s62_s7, 16384  ;;  %p10632_p11 = scmp.lt.s32.totalorder %s62_s7, %s62_s7 }
  0x29   :  { %p10628_p10 = scmp.ne.s32.totalorder %s62_s7, %s10627_s30  ;;  %p10633_p12 = scmp.lt.s32.totalorder %s10627_s30, %s10627_s30 }
  0x2b   :  { %p10634_p13 = por %p10633_p12, %p10632_p11 }
  0x2d   :  { %p10635_p0 = pnand %p10634_p13, %p10628_p10 }
  0x2f   :  { %10638 = shalt.err (!%p10635_p0)
}
  0x30   :  { %s11906_s10 = sld [smem:[#allocation26_spill]]  ;;  %s10647_s17 = scalar_lea.vmem %s94_s8, 16384 }
  0x31   :  { %p10648_p1 = scmp.ne.s32.totalorder %s94_s8, %s10647_s17  ;;  %p10652_p2 = scmp.lt.s32.totalorder %s94_s8, %s94_s8 }
  0x32   :  { %p10653_p3 = scmp.lt.s32.totalorder %s10647_s17, %s10647_s17 }
  0x34   :  { %p10654_p4 = por %p10653_p3, %p10652_p2 }
  0x36   :  { %67 = dma.hbm_to_vmem [thread:$0]  %s11906_s10, 16384, %s62_s7, [#allocation4], %s10709_s0, %s10709_s0, %s10710_s26  }
  0x37   :  { %p10655_p5 = pnand %p10654_p4, %p10648_p1 }
  0x39   :  { %10658 = shalt.err (!%p10655_p5)
}
  0x3a   :  { %99 = dma.hbm_to_vmem [thread:$0]  %s11877_s15, 16384, %s94_s8, [#allocation6], %s10709_s0, %s10709_s0, %s10710_s26  }
  0x3b   :  { %s10713_s1 = smov [#allocation10]   ;;  %s10714_s11 = smov [#allocation11]  }
  0x3c   :  { %s125_s6 = sshll.u32 %s10713_s1, 4  ;;  %s139_s2 = sshll.u32 %s10714_s11, 4  ;;  %s126_s6 = int_to_ptr.vmem [resolvable:$true] %s125_s6  ;;  %s140_s2 = int_to_ptr.vmem [resolvable:$true] %s139_s2 }
  0x3d   :  { %s10667_s3 = scalar_lea.vmem %s126_s6, 16384  ;;  %p10672_p7 = scmp.lt.s32.totalorder %s126_s6, %s126_s6 }
  0x3e   :  { %p10668_p6 = scmp.ne.s32.totalorder %s126_s6, %s10667_s3  ;;  %p10673_p8 = scmp.lt.s32.totalorder %s10667_s3, %s10667_s3 }
  0x40   :  { %p10674_p9 = por %p10673_p8, %p10672_p7 }
  0x42   :  { %p10675_p10 = pnand %p10674_p9, %p10668_p6 }
  0x44   :  { %10678 = shalt.err (!%p10675_p10)
}
  0x45   :  { %131 = dma.hbm_to_vmem [thread:$0]  %s11883_s21, 16384, %s126_s6, [#allocation9], %s10709_s0, %s10709_s0, %s10710_s26  }
  0x46   :  { %s10687_s15 = scalar_lea.vmem %s140_s2, 16384  ;;  %p10692_p12 = scmp.lt.s32.totalorder %s140_s2, %s140_s2 }
  0x47   :  { %p10688_p11 = scmp.ne.s32.totalorder %s140_s2, %s10687_s15  ;;  %p10693_p13 = scmp.lt.s32.totalorder %s10687_s15, %s10687_s15 }
  0x49   :  { %p10694_p0 = por %p10693_p13, %p10692_p12 }
  0x4b   :  { %p10695_p1 = pnand %p10694_p0, %p10688_p11 }
  0x4d   :  { %10698 = shalt.err (!%p10695_p1)
}
  0x4e   :  { %145 = dma.hbm_to_vmem [thread:$0]  %s11885_s23, 16384, %s140_s2, [#allocation12], %s10709_s0, %s10709_s0, %s10710_s26  }
  0x4f   :  { %10699 = dma.done.wait [#allocation4], 16384  }
  0x50   :  { %10700 = vsyncadd [#allocation4], 4294950912 }
  0x51   :  { %10701 = dma.done.wait [#allocation6], 32768  }
  0x52   :  { %10702 = vsyncadd [#allocation6], 4294934528 }
  0x53   :  { %10703 = dma.done.wait [#allocation9], 32768  }
  0x54   :  { %10704 = vsyncadd [#allocation9], 4294934528 }
  0x55   :  { %10705 = dma.done.wait [#allocation12], 16384  }
  0x56   :  { %10706 = vsyncadd [#allocation12], 4294950912  ;;  %v10715_v1 = vmov 0   ;;  %s11907_s28 = sld [smem:[#allocation20_spill]]  ;;  %vm220_vm0 = vcmask 130048   ;;  %v180_v12 = vlaneseq }
  0x57   :  { %256 = vmatprep.mubr.bf16.mxu0 %v10715_v1  ;;  %297 = vmatprep.mubr.bf16.mxu1 %v10715_v1  ;;  %s11908_s6 = sld [smem:[#allocation17_spill]]  ;;  %v10716_v28 = vmov 1966171168  }
  0x58   :  { %s11909_s3 = sld [smem:[#allocation22_spill]]  ;;  %v10925_v13 = vshrl.u32 %v180_v12, 7  ;;  %v443_v29 = vunpack.c.l.s4 %v10716_v28 }
  0x59   :  { %s11910_s10 = sld [smem:[#allocation21_spill]] }
  0x5a   :  { %v10931_v15 = vsub.s32 1, %v10925_v13  ;;  %v10934_v16 = vsub.s32 3, %v10925_v13  ;;  %v10937_v17 = vsub.s32 0, %v10925_v13  ;;  %v10940_v18 = vsub.s32 2, %v10925_v13  ;;  %s11911_s0 = sld [smem:[#allocation23_spill]] }
  0x5b   :  { %v444_v38 = vunpack.c.0.s8 %v443_v29  ;;  %s11912_s29 = sld [smem:[#allocation24_spill]] }
  0x5c   :  { %v9375_v2 = vld [vmem:[%s11907_s28 + $0x4] ss:$16 sps:$4 sm:$0xff]   ;;  %v9377_v3 = vld [vmem:[%s11907_s28 + $0xc] ss:$16 sps:$4 sm:$0xff]   ;;  %v9379_v4 = vld [vmem:[%s11907_s28] ss:$16 sps:$4 sm:$0xff]  }
  0x5d   :  { %238 = vmatprep.subr.bf16.mxu0 %v9375_v2  ;;  %v9380_v5 = vld [vmem:[%s11907_s28 + $0x8] ss:$16 sps:$4 sm:$0xff]   ;;  %v171_v6 = vld [vmem:[%s11908_s6] sm:$0xff]  ;;  %279 = vmatprep.subr.bf16.mxu1 %v9377_v3  ;;  %v10966_v46 = vsub.s32 %v444_v38, %v10925_v13  ;;  %s11913_s11 = sld [smem:[#allocation18_spill]] }
  0x5e   :  { %v173_v7 = vpack.c.bf16 %v171_v6, %v171_v6  ;;  %v9381_v8 = vld [vmem:[%s11909_s3] ss:$16 sps:$4 sm:$0xff]   ;;  %239 = vmatpush1.bf16.msra.mxu0 %v9379_v4  ;;  %280 = vmatpush1.bf16.msra.mxu1 %v9380_v5  ;;  %v9383_v9 = vld [vmem:[%s11909_s3 + $0x4] ss:$16 sps:$4 sm:$0xff]   ;;  %v9384_v10 = vld [vmem:[%s11909_s3 + $0x8] ss:$16 sps:$4 sm:$0xff]  }
  0x5f   :  { %v9386_v11 = vld [vmem:[%s11909_s3 + $0xc] ss:$16 sps:$4 sm:$0xff]   ;;  %366 = vmatprep.subr.bf16.mxu0 %v9383_v9  ;;  %v178_v14 = vld [vmem:[%s11910_s10] sm:$0xf]  ;;  %s11914_s7 = sld [smem:[#allocation25_spill]] }
  0x60   :  { %407 = vmatprep.subr.bf16.mxu1 %v9386_v11  ;;  %v187_v19 = vrot.slane %v178_v14, %v10931_v15  ;;  %v195_v20 = vrot.slane %v178_v14, %v10934_v16  ;;  %v183_v21 = vrot.slane %v178_v14, %v10937_v17  ;;  %v191_v23 = vrot.slane %v178_v14, %v10940_v18  ;;  %v310_v27 = vld [vmem:[%s11911_s0] sm:$0xf]  ;;  %s11915_s8 = sld [smem:[#allocation27_spill]] }
  0x61   :  { %8511 = vmatmul.mubr.msk.bf16.vlgmr.msra.gmra.mxu0 %vm220_vm0, %v173_v7  ;;  %8512 = vmatmul.mubr.msk.bf16.vlgmr.msra.gmra.mxu1 %vm220_vm0, %v173_v7  ;;  %v315_v39 = vrot.slane %v310_v27, %v10937_v17  ;;  %v323_v40 = vrot.slane %v310_v27, %v10940_v18  ;;  %v319_v41 = vrot.slane %v310_v27, %v10931_v15  ;;  %v794_v60 = vld [vmem:[%s11912_s29] sm:$0xf] }
  0x62   :  { %367 = vmatpush1.bf16.msra.mxu0 %v9381_v8  ;;  %408 = vmatpush1.bf16.msra.mxu1 %v9384_v10  ;;  %v327_v42 = vrot.slane %v310_v27, %v10934_v16  ;;  %v10983_v8 = vrot.slane %v794_v60, %v10931_v15  ;;  %v10992_v11 = vrot.slane %v794_v60, %v10940_v18 }
  0x63   :  { %384 = vmatprep.mubr.bf16.mxu0 %v10715_v1  ;;  %425 = vmatprep.mubr.bf16.mxu1 %v10715_v1  ;;  %v10995_v14 = vrot.slane %v794_v60, %v10934_v16 }
  0x69   :  { %8517 = vmatmul.mubr.msk.bf16.vlgmr.msra.gmra.mxu0 %vm220_vm0, %v173_v7  ;;  %8518 = vmatmul.mubr.msk.bf16.vlgmr.msra.gmra.mxu1 %vm220_vm0, %v173_v7  ;;  %v10980_v7 = vrot.slane %v794_v60, %v10937_v17 }
 0x121   :  { %v258_v22 = vpop.f32.mrf.mxu0  ;;  %v299_v24 = vpop.f32.mrf.mxu1 }
 0x122   :  { %v10953_v32 = vadd.f32 %v258_v22, %v183_v21  ;;  %v10955_v33 = vadd.f32 %v299_v24, %v191_v23 }
 0x123   :  { %v260_v25 = vpop.f32.mrf.mxu0  ;;  %v301_v26 = vpop.f32.mrf.mxu1 }
 0x124   :  { %v10949_v30 = vadd.f32 %v260_v25, %v187_v19  ;;  %v10951_v31 = vadd.f32 %v301_v26, %v195_v20 }
 0x125   :  { %v262_v34 = vpop.f32.mrf.mxu0  ;;  %v303_v35 = vpop.f32.mrf.mxu1 }
 0x126   :  { %1014 = vmatprep.subr.mxu0 %v10949_v30  ;;  %1085 = vmatprep.subr.mxu1 %v10951_v31 }
 0x127   :  { %v263_v36 = vpop.f32.mrf.mxu0  ;;  %v304_v37 = vpop.f32.mrf.mxu1  ;;  %1015 = vmatpush1.msra.mxu0 %v10953_v32  ;;  %1086 = vmatpush1.msra.mxu1 %v10955_v33 }
 0x129   :  { %v386_v43 = vpop.f32.mrf.mxu0  ;;  %v427_v44 = vpop.f32.mrf.mxu1 }
 0x12a   :  { %v387_v48 = vadd.f32 %v386_v43, %v315_v39  ;;  %v428_v49 = vadd.f32 %v427_v44, %v323_v40 }
 0x12b   :  { %v388_v45 = vpop.f32.mrf.mxu0  ;;  %v429_v47 = vpop.f32.mrf.mxu1 }
 0x12c   :  { %v389_v50 = vadd.f32 %v388_v45, %v319_v41  ;;  %v430_v51 = vadd.f32 %v429_v47, %v327_v42 }
 0x12d   :  { %v390_v52 = vpop.f32.mrf.mxu0  ;;  %v431_v53 = vpop.f32.mrf.mxu1 }
 0x12e   :  { %v438_v54 = vcombine.low %v387_v48, %v389_v50  ;;  %v439_v55 = vcombine.high %v387_v48, %v389_v50  ;;  %v440_v56 = vcombine.low %v428_v49, %v430_v51  ;;  %v441_v57 = vcombine.high %v428_v49, %v430_v51 }
 0x12f   :  { %v391_v58 = vpop.f32.mrf.mxu0  ;;  %v432_v59 = vpop.f32.mrf.mxu1 }
 0x130   :  { %v448_v61 = vrot.slane %v438_v54, %v10966_v46  ;;  %v455_v62 = vrot.slane %v439_v55, %v10966_v46  ;;  %v462_v63 = vrot.slane %v440_v56, %v10966_v46  ;;  %v469_v0 = vrot.slane %v441_v57, %v10966_v46 }
 0x132   :  { %v470_v1 = vcombine.low %v448_v61, %v462_v63  ;;  %v471_v2 = vcombine.high %v448_v61, %v462_v63  ;;  %v472_v3 = vcombine.low %v455_v62, %v469_v0  ;;  %v473_v4 = vcombine.high %v455_v62, %v469_v0 }
 0x134   :  { %v480_v5 = vrot.slane %v470_v1, %v10966_v46  ;;  %v10977_v6 = vrot.slane %v473_v4, %v10966_v46  ;;  %v10986_v9 = vrot.slane %v472_v3, %v10966_v46  ;;  %v10989_v10 = vrot.slane %v471_v2, %v10966_v46 }
 0x136   :  { %v589_v19 = vrot.slane %v10977_v6, %v10937_v17  ;;  %v593_v20 = vrot.slane %v10977_v6, %v10931_v15  ;;  %v597_v21 = vrot.slane %v10977_v6, %v10940_v18  ;;  %v601_v22 = vrot.slane %v10977_v6, %v10934_v16 }
 0x137   :  { %v509_v23 = vrot.slane %v480_v5, %v10937_v17  ;;  %v513_v24 = vrot.slane %v480_v5, %v10931_v15  ;;  %v517_v25 = vrot.slane %v480_v5, %v10940_v18  ;;  %v521_v26 = vrot.slane %v480_v5, %v10934_v16 }
 0x138   :  { %v686_v27 = vadd.f32 %v589_v19, %v10953_v32  ;;  %v687_v28 = vadd.f32 %v593_v20, %v10949_v30  ;;  %v688_v29 = vadd.f32 %v597_v21, %v10955_v33  ;;  %v689_v34 = vadd.f32 %v601_v22, %v10951_v31 }
 0x139   :  { %v666_v35 = vadd.f32 %v509_v23, %v10953_v32  ;;  %v667_v36 = vadd.f32 %v513_v24, %v10949_v30  ;;  %v668_v37 = vadd.f32 %v517_v25, %v10955_v33  ;;  %v669_v38 = vadd.f32 %v521_v26, %v10951_v31 }
 0x13a   :  { %vm718_vm1 = vcmp.ge.f32.partialorder %v686_v27, 0.0  ;;  %vm719_vm2 = vcmp.ge.f32.partialorder %v687_v28, 0.0  ;;  %vm720_vm3 = vcmp.ge.f32.partialorder %v688_v29, 0.0  ;;  %vm721_vm4 = vcmp.ge.f32.partialorder %v689_v34, 0.0 }
 0x13b   :  { %v750_v39 = vmul.f32 0.2, %v686_v27  ;;  %v751_v40 = vmul.f32 0.2, %v687_v28  ;;  %v752_v41 = vmul.f32 0.2, %v688_v29  ;;  %v502_v42 = vcombine.high %v480_v5, %v480_v5 }
 0x13c   :  { %v753_v43 = vmul.f32 0.2, %v689_v34  ;;  %vm698_vm5 = vcmp.ge.f32.partialorder %v666_v35, 0.0  ;;  %vm699_vm6 = vcmp.ge.f32.partialorder %v667_v36, 0.0  ;;  %vm700_vm7 = vcmp.ge.f32.partialorder %v668_v37, 0.0 }
 0x13d   :  { %v782_v44 = vsel %vm718_vm1, %v686_v27, %v750_v39  ;;  %v783_v45 = vsel %vm719_vm2, %v687_v28, %v751_v40  ;;  %v784_v47 = vsel %vm720_vm3, %v688_v29, %v752_v41  ;;  %vm701_vm8 = vcmp.ge.f32.partialorder %v669_v38, 0.0 }
 0x13e   :  { %v785_v48 = vsel %vm721_vm4, %v689_v34, %v753_v43  ;;  %v836_v49 = vmul.f32 %v10980_v7, %v782_v44  ;;  %v837_v50 = vmul.f32 %v10983_v8, %v783_v45  ;;  %v838_v51 = vmul.f32 %v10992_v11, %v784_v47 }
 0x13f   :  { %v839_v52 = vmul.f32 %v10995_v14, %v785_v48  ;;  %v730_v53 = vmul.f32 0.2, %v666_v35  ;;  %v731_v54 = vmul.f32 0.2, %v667_v36  ;;  %v732_v55 = vmul.f32 0.2, %v668_v37 }
 0x140   :  { %v873_v56 = vadd.f32 %v837_v50, %v836_v49  ;;  %v733_v57 = vmul.f32 0.2, %v669_v38  ;;  %v541_v58 = vrot.slane %v502_v42, %v10937_v17  ;;  %v545_v59 = vrot.slane %v502_v42, %v10931_v15 }
 0x141   :  { %v762_v60 = vsel %vm698_vm5, %v666_v35, %v730_v53  ;;  %v763_v61 = vsel %vm699_vm6, %v667_v36, %v731_v54  ;;  %v764_v62 = vsel %vm700_vm7, %v668_v37, %v732_v55  ;;  %v549_v63 = vrot.slane %v502_v42, %v10940_v18 }
 0x142   :  { %v874_v0 = vadd.f32 %v873_v56, %v838_v51  ;;  %v765_v1 = vsel %vm701_vm8, %v669_v38, %v733_v57  ;;  %v816_v2 = vmul.f32 %v10980_v7, %v762_v60  ;;  %v817_v3 = vmul.f32 %v10983_v8, %v763_v61 }
 0x143   :  { %v818_v4 = vmul.f32 %v10992_v11, %v764_v62  ;;  %v819_v5 = vmul.f32 %v10995_v14, %v765_v1  ;;  %v553_v19 = vrot.slane %v502_v42, %v10934_v16  ;;  %v674_v20 = vadd.f32 %v541_v58, %v10953_v32 }
 0x144   :  { %v875_v21 = vadd.f32 %v874_v0, %v839_v52  ;;  %v848_v22 = vadd.f32 %v817_v3, %v816_v2  ;;  %v675_v23 = vadd.f32 %v545_v59, %v10949_v30  ;;  %v676_v24 = vadd.f32 %v549_v63, %v10955_v33 }
 0x145   :  { %v677_v25 = vadd.f32 %v553_v19, %v10951_v31  ;;  %vm706_vm9 = vcmp.ge.f32.partialorder %v674_v20, 0.0  ;;  %v738_v26 = vmul.f32 0.2, %v674_v20  ;;  %v525_v27 = vrot.slane %v10989_v10, %v10937_v17 }
 0x146   :  { %876 = vadd.xlane.f32.xlu1 %v875_v21  ;;  %v849_v28 = vadd.f32 %v848_v22, %v818_v4  ;;  %vm707_vm10 = vcmp.ge.f32.partialorder %v675_v23, 0.0  ;;  %vm708_vm11 = vcmp.ge.f32.partialorder %v676_v24, 0.0  ;;  %v739_v29 = vmul.f32 0.2, %v675_v23 }
 0x147   :  { %vm709_vm12 = vcmp.ge.f32.partialorder %v677_v25, 0.0  ;;  %v740_v34 = vmul.f32 0.2, %v676_v24  ;;  %v741_v35 = vmul.f32 0.2, %v677_v25  ;;  %v770_v36 = vsel %vm706_vm9, %v674_v20, %v738_v26 }
 0x148   :  { %v850_v37 = vadd.f32 %v849_v28, %v819_v5  ;;  %v771_v38 = vsel %vm707_vm10, %v675_v23, %v739_v29  ;;  %v824_v39 = vmul.f32 %v10980_v7, %v770_v36  ;;  %v529_v40 = vrot.slane %v10989_v10, %v10931_v15 }
 0x149   :  { %v772_v41 = vsel %vm708_vm11, %v676_v24, %v740_v34  ;;  %v773_v42 = vsel %vm709_vm12, %v677_v25, %v741_v35  ;;  %v825_v43 = vmul.f32 %v10983_v8, %v771_v38  ;;  %v533_v44 = vrot.slane %v10989_v10, %v10940_v18 }
 0x14a   :  { %851 = vadd.xlane.f32.xlu0 %v850_v37  ;;  %v826_v45 = vmul.f32 %v10992_v11, %v772_v41  ;;  %v827_v47 = vmul.f32 %v10995_v14, %v773_v42  ;;  %v537_v48 = vrot.slane %v10989_v10, %v10934_v16  ;;  %v670_v49 = vadd.f32 %v525_v27, %v10953_v32 }
 0x14b   :  { %v858_v50 = vadd.f32 %v825_v43, %v824_v39  ;;  %v671_v51 = vadd.f32 %v529_v40, %v10949_v30  ;;  %v672_v52 = vadd.f32 %v533_v44, %v10955_v33  ;;  %v504_v53 = vcombine.high %v10989_v10, %v10989_v10 }
 0x14c   :  { %v673_v54 = vadd.f32 %v537_v48, %v10951_v31  ;;  %vm702_vm13 = vcmp.ge.f32.partialorder %v670_v49, 0.0  ;;  %v734_v55 = vmul.f32 0.2, %v670_v49  ;;  %v573_v56 = vrot.slane %v10986_v9, %v10937_v17 }
 0x14d   :  { %v859_v57 = vadd.f32 %v858_v50, %v826_v45  ;;  %vm703_vm14 = vcmp.ge.f32.partialorder %v671_v51, 0.0  ;;  %vm704_vm15 = vcmp.ge.f32.partialorder %v672_v52, 0.0  ;;  %v735_v58 = vmul.f32 0.2, %v671_v51 }
 0x14e   :  { %vm705_vm0 = vcmp.ge.f32.partialorder %v673_v54, 0.0  ;;  %v736_v59 = vmul.f32 0.2, %v672_v52  ;;  %v737_v60 = vmul.f32 0.2, %v673_v54  ;;  %v766_v61 = vsel %vm702_vm13, %v670_v49, %v734_v55 }
 0x14f   :  { %v860_v62 = vadd.f32 %v859_v57, %v827_v47  ;;  %v767_v63 = vsel %vm703_vm14, %v671_v51, %v735_v58  ;;  %v820_v0 = vmul.f32 %v10980_v7, %v766_v61  ;;  %v557_v10 = vrot.slane %v504_v53, %v10937_v17 }
 0x150   :  { %v768_v1 = vsel %vm704_vm15, %v672_v52, %v736_v59  ;;  %v769_v2 = vsel %vm705_vm0, %v673_v54, %v737_v60  ;;  %v821_v3 = vmul.f32 %v10983_v8, %v767_v63  ;;  %v561_v4 = vrot.slane %v504_v53, %v10931_v15 }
 0x151   :  { %861 = vadd.xlane.f32.xlu1 %v860_v62  ;;  %v822_v5 = vmul.f32 %v10992_v11, %v768_v1  ;;  %v823_v19 = vmul.f32 %v10995_v14, %v769_v2  ;;  %v565_v20 = vrot.slane %v504_v53, %v10940_v18  ;;  %v569_v21 = vrot.slane %v504_v53, %v10934_v16 }
 0x152   :  { %v853_v22 = vadd.f32 %v821_v3, %v820_v0  ;;  %v678_v23 = vadd.f32 %v557_v10, %v10953_v32  ;;  %v679_v24 = vadd.f32 %v561_v4, %v10949_v30  ;;  %v577_v25 = vrot.slane %v10986_v9, %v10931_v15 }
 0x153   :  { %v680_v26 = vadd.f32 %v565_v20, %v10955_v33  ;;  %v681_v27 = vadd.f32 %v569_v21, %v10951_v31  ;;  %v581_v28 = vrot.slane %v10986_v9, %v10940_v18  ;;  %v585_v29 = vrot.slane %v10986_v9, %v10934_v16 }
 0x154   :  { %v854_v34 = vadd.f32 %v853_v22, %v822_v5  ;;  %vm710_vm1 = vcmp.ge.f32.partialorder %v678_v23, 0.0  ;;  %vm711_vm2 = vcmp.ge.f32.partialorder %v679_v24, 0.0  ;;  %v742_v35 = vmul.f32 0.2, %v678_v23 }
 0x155   :  { %vm712_vm3 = vcmp.ge.f32.partialorder %v680_v26, 0.0  ;;  %vm713_vm4 = vcmp.ge.f32.partialorder %v681_v27, 0.0  ;;  %v743_v36 = vmul.f32 0.2, %v679_v24  ;;  %v744_v37 = vmul.f32 0.2, %v680_v26 }
 0x156   :  { %v855_v38 = vadd.f32 %v854_v34, %v823_v19  ;;  %v745_v39 = vmul.f32 0.2, %v681_v27  ;;  %v774_v40 = vsel %vm710_vm1, %v678_v23, %v742_v35  ;;  %v682_v41 = vadd.f32 %v573_v56, %v10953_v32 }
 0x157   :  { %v775_v42 = vsel %vm711_vm2, %v679_v24, %v743_v36  ;;  %v776_v43 = vsel %vm712_vm3, %v680_v26, %v744_v37  ;;  %v828_v44 = vmul.f32 %v10980_v7, %v774_v40  ;;  %v683_v45 = vadd.f32 %v577_v25, %v10949_v30 }
 0x158   :  { %856 = vadd.xlane.f32.xlu0 %v855_v38  ;;  %v777_v47 = vsel %vm713_vm4, %v681_v27, %v745_v39  ;;  %v829_v48 = vmul.f32 %v10983_v8, %v775_v42  ;;  %v830_v49 = vmul.f32 %v10992_v11, %v776_v43  ;;  %v684_v50 = vadd.f32 %v581_v28, %v10955_v33 }
 0x159   :  { %v831_v51 = vmul.f32 %v10995_v14, %v777_v47  ;;  %v685_v52 = vadd.f32 %v585_v29, %v10951_v31  ;;  %vm714_vm5 = vcmp.ge.f32.partialorder %v682_v41, 0.0  ;;  %vm715_vm6 = vcmp.ge.f32.partialorder %v683_v45, 0.0 }
 0x15a   :  { %v863_v53 = vadd.f32 %v829_v48, %v828_v44  ;;  %vm716_vm7 = vcmp.ge.f32.partialorder %v684_v50, 0.0  ;;  %v746_v54 = vmul.f32 0.2, %v682_v41  ;;  %v747_v55 = vmul.f32 0.2, %v683_v45 }
 0x15b   :  { %vm717_vm8 = vcmp.ge.f32.partialorder %v685_v52, 0.0  ;;  %v748_v56 = vmul.f32 0.2, %v684_v50  ;;  %v749_v57 = vmul.f32 0.2, %v685_v52  ;;  %v505_v58 = vcombine.high %v10977_v6, %v10977_v6 }
 0x15c   :  { %v864_v59 = vadd.f32 %v863_v53, %v830_v49  ;;  %v778_v60 = vsel %vm714_vm5, %v682_v41, %v746_v54  ;;  %v779_v61 = vsel %vm715_vm6, %v683_v45, %v747_v55  ;;  %v503_v62 = vcombine.high %v10986_v9, %v10986_v9 }
 0x15d   :  { %v780_v63 = vsel %vm716_vm7, %v684_v50, %v748_v56  ;;  %v781_v0 = vsel %vm717_vm8, %v685_v52, %v749_v57  ;;  %v832_v10 = vmul.f32 %v10980_v7, %v778_v60  ;;  %v833_v1 = vmul.f32 %v10983_v8, %v779_v61 }
 0x15e   :  { %v865_v2 = vadd.f32 %v864_v59, %v831_v51  ;;  %v834_v3 = vmul.f32 %v10992_v11, %v780_v63  ;;  %v835_v4 = vmul.f32 %v10995_v14, %v781_v0  ;;  %v621_v5 = vrot.slane %v505_v58, %v10937_v17 }
 0x15f   :  { %v868_v6 = vadd.f32 %v833_v1, %v832_v10  ;;  %v625_v19 = vrot.slane %v505_v58, %v10931_v15  ;;  %v629_v20 = vrot.slane %v505_v58, %v10940_v18  ;;  %v633_v9 = vrot.slane %v505_v58, %v10934_v16 }
 0x160   :  { %866 = vadd.xlane.f32.xlu1 %v865_v2  ;;  %v694_v21 = vadd.f32 %v621_v5, %v10953_v32  ;;  %v605_v22 = vrot.slane %v503_v62, %v10937_v17  ;;  %v609_v23 = vrot.slane %v503_v62, %v10931_v15  ;;  %v613_v24 = vrot.slane %v503_v62, %v10940_v18 }
 0x161   :  { %v869_v25 = vadd.f32 %v868_v6, %v834_v3  ;;  %v695_v26 = vadd.f32 %v625_v19, %v10949_v30  ;;  %v696_v27 = vadd.f32 %v629_v20, %v10955_v33  ;;  %v697_v28 = vadd.f32 %v633_v9, %v10951_v31 }
 0x162   :  { %vm726_vm9 = vcmp.ge.f32.partialorder %v694_v21, 0.0  ;;  %v758_v29 = vmul.f32 0.2, %v694_v21  ;;  %v617_v34 = vrot.slane %v503_v62, %v10934_v16  ;;  %v690_v35 = vadd.f32 %v605_v22, %v10953_v32 }
 0x163   :  { %v870_v36 = vadd.f32 %v869_v25, %v835_v4  ;;  %vm727_vm10 = vcmp.ge.f32.partialorder %v695_v26, 0.0  ;;  %vm728_vm11 = vcmp.ge.f32.partialorder %v696_v27, 0.0  ;;  %vm729_vm12 = vcmp.ge.f32.partialorder %v697_v28, 0.0  ;;  %v11132_v25 = vld [vmem:[%s11913_s11] sm:$0xff] }
 0x164   :  { %v759_v37 = vmul.f32 0.2, %v695_v26  ;;  %v760_v38 = vmul.f32 0.2, %v696_v27  ;;  %v761_v39 = vmul.f32 0.2, %v697_v28  ;;  %v790_v40 = vsel %vm726_vm9, %v694_v21, %v758_v29 }
 0x165   :  { %871 = vadd.xlane.f32.xlu0 %v870_v36  ;;  %v844_v41 = vmul.f32 %v10980_v7, %v790_v40  ;;  %v691_v42 = vadd.f32 %v609_v23, %v10949_v30  ;;  %v692_v43 = vadd.f32 %v613_v24, %v10955_v33  ;;  %v693_v44 = vadd.f32 %v617_v34, %v10951_v31 }
 0x166   :  { %v791_v45 = vsel %vm727_vm10, %v695_v26, %v759_v37  ;;  %v792_v47 = vsel %vm728_vm11, %v696_v27, %v760_v38  ;;  %vm722_vm13 = vcmp.ge.f32.partialorder %v690_v35, 0.0  ;;  %v793_v48 = vsel %vm729_vm12, %v697_v28, %v761_v39 }
 0x167   :  { %v845_v32 = vmul.f32 %v10983_v8, %v791_v45  ;;  %vm723_vm14 = vcmp.ge.f32.partialorder %v691_v42, 0.0  ;;  %vm724_vm15 = vcmp.ge.f32.partialorder %v692_v43, 0.0  ;;  %v754_v49 = vmul.f32 0.2, %v690_v35  ;;  %v9392_v45 = vld [vmem:[#allocation3 + $0x2e4] ss:$16 sps:$4 sm:$0xff]  }
 0x168   :  { %v755_v50 = vmul.f32 0.2, %v691_v42  ;;  %v846_v51 = vmul.f32 %v10992_v11, %v792_v47  ;;  %v756_v53 = vmul.f32 0.2, %v692_v43  ;;  %v757_v54 = vmul.f32 0.2, %v693_v44  ;;  %1965 = vmatprep.subr.bf16.mxu1 %v9392_v45 }
 0x169   :  { %v883_v52 = vadd.f32 %v845_v32, %v844_v41  ;;  %vm725_vm0 = vcmp.ge.f32.partialorder %v693_v44, 0.0  ;;  %v786_v30 = vsel %vm722_vm13, %v690_v35, %v754_v49  ;;  %v847_v31 = vmul.f32 %v10995_v14, %v793_v48  ;;  %v9387_v48 = vld [vmem:[#allocation3 + $0xe0] ss:$16 sps:$4 sm:$0xff]  }
 0x16a   :  { %v787_v33 = vsel %vm723_vm14, %v691_v42, %v755_v50  ;;  %v788_v56 = vsel %vm724_vm15, %v692_v43, %v756_v53  ;;  %v840_v57 = vmul.f32 %v10980_v7, %v786_v30  ;;  %v789_v60 = vsel %vm725_vm0, %v693_v44, %v757_v54  ;;  %v9389_v44 = vld [vmem:[#allocation3 + $0xe4] ss:$16 sps:$4 sm:$0xff]   ;;  %v9390_v49 = vld [vmem:[#allocation3 + $0x2e0] ss:$16 sps:$4 sm:$0xff]  }
 0x16b   :  { %v884_v55 = vadd.f32 %v883_v52, %v846_v51  ;;  %v841_v58 = vmul.f32 %v10983_v8, %v787_v33  ;;  %v842_v61 = vmul.f32 %v10992_v11, %v788_v56  ;;  %v843_v63 = vmul.f32 %v10995_v14, %v789_v60  ;;  %1924 = vmatprep.subr.bf16.mxu0 %v9389_v44  ;;  %v9395_v51 = vld [vmem:[#allocation3 + $0xc4] ss:$16 sps:$4 sm:$0xff]   ;;  %v9393_v53 = vld [vmem:[#allocation3 + $0xc0] ss:$16 sps:$4 sm:$0xff]  }
 0x16c   :  { %v898_v3 = vand.u32 127, %v180_v12  ;;  %vm931_vm1 = vcmask 1041409   ;;  %vm933_vm2 = vcmask 1042434   ;;  %vm935_vm3 = vcmask 1043459   ;;  %v9398_v52 = vld [vmem:[#allocation3 + $0x2c4] ss:$16 sps:$4 sm:$0xff]  }
 0x16d   :  { %v885_v59 = vadd.f32 %v884_v55, %v847_v31  ;;  %v878_v62 = vadd.f32 %v841_v58, %v840_v57  ;;  %vm937_vm4 = vcmask 1044484   ;;  %vm939_vm5 = vcmask 1045509   ;;  %v9396_v54 = vld [vmem:[#allocation3 + $0x2c0] ss:$16 sps:$4 sm:$0xff]   ;;  %v9401_v30 = vld [vmem:[#allocation3 + $0xa4] ss:$16 sps:$4 sm:$0xff]  }
 0x16e   :  { %v11117_v7 = vsub.s32 %v898_v3, %v10925_v13  ;;  %vm941_vm6 = vcmask 1046534   ;;  %vm943_vm7 = vcmask 1047559   ;;  %vm888_vm8 = vcmp.gt.f32.partialorder %v11132_v25, 0.0  ;;  %v9404_v33 = vld [vmem:[#allocation3 + $0x2a4] ss:$16 sps:$4 sm:$0xff]  }
 0x16f   :  { %886 = vadd.xlane.f32.xlu1 %v885_v59  ;;  %v879_v0 = vadd.f32 %v878_v62, %v842_v61  ;;  %vm11892_vm9 = vcmask 64512   ;;  %v10717_v43 = vmov 0.0   ;;  %v9399_v31 = vld [vmem:[#allocation3 + $0xa0] ss:$16 sps:$4 sm:$0xff]   ;;  %v9407_v56 = vld [vmem:[#allocation3 + $0x84] ss:$16 sps:$4 sm:$0xff]  }
 0x170   :  { %1048 = vmatprep.mubr.f32.mxu0 %v10717_v43  ;;  %1119 = vmatprep.mubr.f32.mxu1 %v10717_v43  ;;  %v9402_v55 = vld [vmem:[#allocation3 + $0x2a0] ss:$16 sps:$4 sm:$0xff]   ;;  %v9410_v57 = vld [vmem:[#allocation3 + $0x284] ss:$16 sps:$4 sm:$0xff]  }
 0x171   :  { %v880_v10 = vadd.f32 %v879_v0, %v843_v63  ;;  %v9405_v58 = vld [vmem:[#allocation3 + $0x80] ss:$16 sps:$4 sm:$0xff]   ;;  %v9413_v60 = vld [vmem:[#allocation3 + $0x64] ss:$16 sps:$4 sm:$0xff]  }
 0x172   :  { %v9408_v59 = vld [vmem:[#allocation3 + $0x280] ss:$16 sps:$4 sm:$0xff]   ;;  %v9416_v61 = vld [vmem:[#allocation3 + $0x264] ss:$16 sps:$4 sm:$0xff]  }
 0x173   :  { %881 = vadd.xlane.f32.xlu0 %v880_v10  ;;  %v9411_v62 = vld [vmem:[#allocation3 + $0x60] ss:$16 sps:$4 sm:$0xff]   ;;  %v9419_v0 = vld [vmem:[#allocation3 + $0x44] ss:$16 sps:$4 sm:$0xff]  }
 0x174   :  { %v9414_v63 = vld [vmem:[#allocation3 + $0x260] ss:$16 sps:$4 sm:$0xff]   ;;  %v9422_v10 = vld [vmem:[#allocation3 + $0x244] ss:$16 sps:$4 sm:$0xff]  }
 0x175   :  { %v9425_v3 = vld [vmem:[#allocation3 + $0x24] ss:$16 sps:$4 sm:$0xff]   ;;  %v9465_v45 = vld [vmem:[#allocation3 + $0x140] ss:$16 sps:$4 sm:$0xff]  }
 0x176   :  { %v9470_v44 = vld [vmem:[#allocation3 + $0x344] ss:$16 sps:$4 sm:$0xff]   ;;  %v10155_v25 = vld [vmem:[#allocation10 + $0xe0] ss:$16 sps:$4 sm:$0xff]  }
 0x1cf   :  { %v877_v1 = vpop.xlane.xlu1 %876 }
 0x1d0   :  { %v922_v24 = vrot.slane %v877_v1, %v11117_v7  ;;  %v9417_v1 = vld [vmem:[#allocation3 + $0x40] ss:$16 sps:$4 sm:$0xff]  }
 0x1d3   :  { %v852_v2 = vpop.xlane.xlu0 %851 }
 0x1d4   :  { %v902_v6 = vrot.slane %v852_v2, %v11117_v7  ;;  %v9420_v2 = vld [vmem:[#allocation3 + $0x240] ss:$16 sps:$4 sm:$0xff]  }
 0x1da   :  { %v862_v4 = vpop.xlane.xlu1 %861 }
 0x1db   :  { %v910_v14 = vrot.slane %v862_v4, %v11117_v7  ;;  %v9428_v4 = vld [vmem:[#allocation3 + $0x224] ss:$16 sps:$4 sm:$0xff]  }
 0x1e1   :  { %v857_v5 = vpop.xlane.xlu0 %856 }
 0x1e2   :  { %v906_v8 = vrot.slane %v857_v5, %v11117_v7  ;;  %v9423_v5 = vld [vmem:[#allocation3 + $0x20] ss:$16 sps:$4 sm:$0xff]  }
 0x1e4   :  { %v932_v19 = vsel %vm931_vm1, %v906_v8, %v902_v6  ;;  %v9426_v8 = vld [vmem:[#allocation3 + $0x220] ss:$16 sps:$4 sm:$0xff]   ;;  %v9434_v6 = vld [vmem:[#allocation3 + $0x204] ss:$16 sps:$4 sm:$0xff]  }
 0x1e5   :  { %v934_v12 = vsel %vm933_vm2, %v910_v14, %v932_v19  ;;  %v9429_v14 = vld [vmem:[#allocation3] ss:$16 sps:$4 sm:$0xff]  }
 0x1e6   :  { %v9432_v19 = vld [vmem:[#allocation3 + $0x200] ss:$16 sps:$4 sm:$0xff]  }
 0x1e9   :  { %v867_v11 = vpop.xlane.xlu1 %866 }
 0x1ea   :  { %v914_v20 = vrot.slane %v867_v11, %v11117_v7  ;;  %v9431_v11 = vld [vmem:[#allocation3 + $0x4] ss:$16 sps:$4 sm:$0xff]  }
 0x1ec   :  { %v936_v21 = vsel %vm935_vm3, %v914_v20, %v934_v12  ;;  %v9437_v20 = vld [vmem:[#allocation3 + $0x1e4] ss:$16 sps:$4 sm:$0xff]   ;;  %v9435_v12 = vld [vmem:[#allocation3 + $0x1e0] ss:$16 sps:$4 sm:$0xff]  }
 0x1ee   :  { %v872_v9 = vpop.xlane.xlu0 %871 }
 0x1ef   :  { %v918_v13 = vrot.slane %v872_v9, %v11117_v7  ;;  %v9440_v9 = vld [vmem:[#allocation3 + $0x3e4] ss:$16 sps:$4 sm:$0xff]  }
 0x1f1   :  { %v938_v22 = vsel %vm937_vm4, %v918_v13, %v936_v21  ;;  %v9438_v13 = vld [vmem:[#allocation3 + $0x3e0] ss:$16 sps:$4 sm:$0xff]   ;;  %v9443_v21 = vld [vmem:[#allocation3 + $0x1c4] ss:$16 sps:$4 sm:$0xff]  }
 0x1f2   :  { %v940_v28 = vsel %vm939_vm5, %v922_v24, %v938_v22  ;;  %v9446_v22 = vld [vmem:[#allocation3 + $0x3c4] ss:$16 sps:$4 sm:$0xff]   ;;  %v9444_v24 = vld [vmem:[#allocation3 + $0x3c0] ss:$16 sps:$4 sm:$0xff]  }
 0x1f8   :  { %v887_v23 = vpop.xlane.xlu1 %886 }
 0x1f9   :  { %v930_v26 = vrot.slane %v887_v23, %v11117_v7  ;;  %v9441_v23 = vld [vmem:[#allocation3 + $0x1c0] ss:$16 sps:$4 sm:$0xff]  }
 0x1fc   :  { %v882_v27 = vpop.xlane.xlu0 %881 }
 0x1fd   :  { %v926_v29 = vrot.slane %v882_v27, %v11117_v7  ;;  %v9452_v27 = vld [vmem:[#allocation3 + $0x3a4] ss:$16 sps:$4 sm:$0xff]  }
 0x1ff   :  { %v942_v34 = vsel %vm941_vm6, %v926_v29, %v940_v28  ;;  %v9447_v28 = vld [vmem:[#allocation3 + $0x1a0] ss:$16 sps:$4 sm:$0xff]  }
 0x200   :  { %v944_v35 = vsel %vm943_vm7, %v930_v26, %v942_v34  ;;  %v9449_v26 = vld [vmem:[#allocation3 + $0x1a4] ss:$16 sps:$4 sm:$0xff]   ;;  %v9450_v29 = vld [vmem:[#allocation3 + $0x3a0] ss:$16 sps:$4 sm:$0xff]  }
 0x201   :  { %v946_v36 = vsel %vm888_vm8, %v944_v35, -1e+30  ;;  %v9455_v34 = vld [vmem:[#allocation3 + $0x184] ss:$16 sps:$4 sm:$0xff]  }
 0x202   :  { %v948_v37 = vsel %vm11892_vm9, %v946_v36, -inf  ;;  %v9458_v35 = vld [vmem:[#allocation3 + $0x384] ss:$16 sps:$4 sm:$0xff]  }
 0x203   :  { %949 = vmax.xlane.f32.xlu0 %v948_v37  ;;  %v9456_v37 = vld [vmem:[#allocation3 + $0x380] ss:$16 sps:$4 sm:$0xff]  }
 0x28c   :  { %v950_v38 = vpop.xlane.xlu0 %949 }
 0x28d   :  { %v951_v39 = vsub.f32 %v946_v36, %v950_v38  ;;  %v9453_v36 = vld [vmem:[#allocation3 + $0x180] ss:$16 sps:$4 sm:$0xff]   ;;  %v9461_v38 = vld [vmem:[#allocation3 + $0x164] ss:$16 sps:$4 sm:$0xff]  }
 0x28f   :  { %v952_v40 = vmul.f32 1.442695, %v951_v39  ;;  %v9464_v39 = vld [vmem:[#allocation3 + $0x364] ss:$16 sps:$4 sm:$0xff]  }
 0x291   :  { %10539 = vpow2.f32 %v952_v40  ;;  %v9459_v40 = vld [vmem:[#allocation3 + $0x160] ss:$16 sps:$4 sm:$0xff]  }
 0x29e   :  { %v10540_v41 = vpop.eup %10539 }
 0x29f   :  { %v954_v42 = vsel %vm11892_vm9, %v10540_v41, 0.0 }
 0x2a0   :  { %955 = vadd.xlane.f32.xlu1 %v954_v42  ;;  %v9467_v42 = vld [vmem:[#allocation3 + $0x144] ss:$16 sps:$4 sm:$0xff]  }
 0x329   :  { %v956_v47 = vpop.xlane.xlu1 %955 }
 0x32a   :  { %10541 = vrcp.f32 %v956_v47  ;;  %v9468_v47 = vld [vmem:[#allocation3 + $0x340] ss:$16 sps:$4 sm:$0xff]  }
 0x337   :  { %v10542_v32 = vpop.eup %10541 }
 0x338   :  { %v958_v50 = vmul.f32 %v10542_v32, %v10540_v41  ;;  %v9462_v41 = vld [vmem:[#allocation3 + $0x360] ss:$16 sps:$4 sm:$0xff]  }
 0x339   :  { %v9471_v32 = vld [vmem:[#allocation3 + $0x120] ss:$16 sps:$4 sm:$0xff]  }
 0x33a   :  { %8519 = vmatmul.mubr.msk.f32.vlgmr.msra.gmra.mxu0 %vm11892_vm9, %v958_v50  ;;  %8520 = vmatmul.mubr.msk.f32.vlgmr.msra.gmra.mxu1 %vm11892_vm9, %v958_v50  ;;  %v9476_v50 = vld [vmem:[#allocation3 + $0x324] ss:$16 sps:$4 sm:$0xff]  }
 0x33b   :  { %1925 = vmatpush1.bf16.msra.mxu0 %v9387_v48  ;;  %1966 = vmatpush1.bf16.msra.mxu1 %v9390_v49  ;;  %v9473_v48 = vld [vmem:[#allocation3 + $0x124] ss:$16 sps:$4 sm:$0xff]   ;;  %v9474_v49 = vld [vmem:[#allocation3 + $0x320] ss:$16 sps:$4 sm:$0xff]  }
 0x33c   :  { %1926 = vmatprep.subr.bf16.mxu0 %v9395_v51  ;;  %1967 = vmatprep.subr.bf16.mxu1 %v9398_v52  ;;  %v9479_v51 = vld [vmem:[#allocation3 + $0x104] ss:$16 sps:$4 sm:$0xff]  }
 0x33d   :  { %v9482_v52 = vld [vmem:[#allocation3 + $0x304] ss:$16 sps:$4 sm:$0xff]  }
 0x33f   :  { %1927 = vmatpush1.bf16.msra.mxu0 %v9393_v53  ;;  %1968 = vmatpush1.bf16.msra.mxu1 %v9396_v54  ;;  %v9477_v53 = vld [vmem:[#allocation3 + $0x100] ss:$16 sps:$4 sm:$0xff]  }
 0x340   :  { %1928 = vmatprep.subr.bf16.mxu0 %v9401_v30  ;;  %1969 = vmatprep.subr.bf16.mxu1 %v9404_v33  ;;  %v9480_v54 = vld [vmem:[#allocation3 + $0x300] ss:$16 sps:$4 sm:$0xff]   ;;  %v9485_v30 = vld [vmem:[#allocation3 + $0xec] ss:$16 sps:$4 sm:$0xff]  }
 0x341   :  { %v9488_v33 = vld [vmem:[#allocation3 + $0x2ec] ss:$16 sps:$4 sm:$0xff]  }
 0x343   :  { %1929 = vmatpush1.bf16.msra.mxu0 %v9399_v31  ;;  %1970 = vmatpush1.bf16.msra.mxu1 %v9402_v55  ;;  %v959_v31 = vld [vmem:[%s11914_s7] sm:$0xf] }
 0x344   :  { %1930 = vmatprep.subr.bf16.mxu0 %v9407_v56  ;;  %1971 = vmatprep.subr.bf16.mxu1 %v9410_v57  ;;  %v964_v55 = vrot.slane %v959_v31, %v10937_v17  ;;  %v972_v56 = vrot.slane %v959_v31, %v10940_v18  ;;  %v968_v57 = vrot.slane %v959_v31, %v10931_v15 }
 0x347   :  { %1931 = vmatpush1.bf16.msra.mxu0 %v9405_v58  ;;  %1972 = vmatpush1.bf16.msra.mxu1 %v9408_v59  ;;  %v976_v58 = vrot.slane %v959_v31, %v10934_v16  ;;  %v9542_v31 = vld [vmem:[#allocation3 + $0x3cc] ss:$16 sps:$4 sm:$0xff]  }
 0x348   :  { %1932 = vmatprep.subr.bf16.mxu0 %v9413_v60  ;;  %1973 = vmatprep.subr.bf16.mxu1 %v9416_v61 }
 0x34b   :  { %1933 = vmatpush1.bf16.msra.mxu0 %v9411_v62  ;;  %1974 = vmatpush1.bf16.msra.mxu1 %v9414_v63 }
 0x34c   :  { %1934 = vmatprep.subr.bf16.mxu0 %v9419_v0  ;;  %1975 = vmatprep.subr.bf16.mxu1 %v9422_v10 }
 0x34f   :  { %1935 = vmatpush1.bf16.msra.mxu0 %v9417_v1  ;;  %1976 = vmatpush1.bf16.msra.mxu1 %v9420_v2 }
 0x350   :  { %1936 = vmatprep.subr.bf16.mxu0 %v9425_v3  ;;  %1977 = vmatprep.subr.bf16.mxu1 %v9428_v4 }
 0x353   :  { %1937 = vmatpush1.bf16.msra.mxu0 %v9423_v5  ;;  %1978 = vmatpush1.bf16.msra.mxu1 %v9426_v8 }
 0x354   :  { %1938 = vmatprep.subr.bf16.mxu0 %v9431_v11  ;;  %1979 = vmatprep.subr.bf16.mxu1 %v9434_v6  ;;  %v9483_v11 = vld [vmem:[#allocation3 + $0xe8] ss:$16 sps:$4 sm:$0xff]  }
 0x357   :  { %1939 = vmatpush1.bf16.msra.mxu0 %v9429_v14  ;;  %1980 = vmatpush1.bf16.msra.mxu1 %v9432_v19  ;;  %v9486_v19 = vld [vmem:[#allocation3 + $0x2e8] ss:$16 sps:$4 sm:$0xff]  }
 0x358   :  { %1940 = vmatprep.subr.bf16.mxu0 %v9437_v20  ;;  %1981 = vmatprep.subr.bf16.mxu1 %v9440_v9  ;;  %v9491_v9 = vld [vmem:[#allocation3 + $0xcc] ss:$16 sps:$4 sm:$0xff]  }
 0x35b   :  { %1941 = vmatpush2.bf16.msra.mxu0 %v9435_v12  ;;  %1982 = vmatpush2.bf16.msra.mxu1 %v9438_v13  ;;  %v9494_v12 = vld [vmem:[#allocation3 + $0x2cc] ss:$16 sps:$4 sm:$0xff]   ;;  %v9489_v13 = vld [vmem:[#allocation3 + $0xc8] ss:$16 sps:$4 sm:$0xff]  }
 0x35c   :  { %1942 = vmatprep.subr.bf16.mxu0 %v9443_v21  ;;  %1983 = vmatprep.subr.bf16.mxu1 %v9446_v22  ;;  %v9492_v21 = vld [vmem:[#allocation3 + $0x2c8] ss:$16 sps:$4 sm:$0xff]   ;;  %v9497_v22 = vld [vmem:[#allocation3 + $0xac] ss:$16 sps:$4 sm:$0xff]  }
 0x35f   :  { %1943 = vmatpush2.bf16.msra.mxu0 %v9441_v23  ;;  %1984 = vmatpush2.bf16.msra.mxu1 %v9444_v24  ;;  %v9500_v23 = vld [vmem:[#allocation3 + $0x2ac] ss:$16 sps:$4 sm:$0xff]   ;;  %v9495_v24 = vld [vmem:[#allocation3 + $0xa8] ss:$16 sps:$4 sm:$0xff]  }
 0x360   :  { %1944 = vmatprep.subr.bf16.mxu0 %v9449_v26  ;;  %1985 = vmatprep.subr.bf16.mxu1 %v9452_v27  ;;  %v9498_v26 = vld [vmem:[#allocation3 + $0x2a8] ss:$16 sps:$4 sm:$0xff]   ;;  %v9503_v27 = vld [vmem:[#allocation3 + $0x8c] ss:$16 sps:$4 sm:$0xff]  }
 0x363   :  { %1945 = vmatpush2.bf16.msra.mxu0 %v9447_v28  ;;  %1986 = vmatpush2.bf16.msra.mxu1 %v9450_v29  ;;  %v9506_v28 = vld [vmem:[#allocation3 + $0x28c] ss:$16 sps:$4 sm:$0xff]   ;;  %v9501_v29 = vld [vmem:[#allocation3 + $0x88] ss:$16 sps:$4 sm:$0xff]  }
 0x364   :  { %1946 = vmatprep.subr.bf16.mxu0 %v9455_v34  ;;  %1987 = vmatprep.subr.bf16.mxu1 %v9458_v35  ;;  %v9504_v34 = vld [vmem:[#allocation3 + $0x288] ss:$16 sps:$4 sm:$0xff]   ;;  %v9509_v35 = vld [vmem:[#allocation3 + $0x6c] ss:$16 sps:$4 sm:$0xff]  }
 0x367   :  { %1947 = vmatpush2.bf16.msra.mxu0 %v9453_v36  ;;  %1988 = vmatpush2.bf16.msra.mxu1 %v9456_v37  ;;  %v9512_v36 = vld [vmem:[#allocation3 + $0x26c] ss:$16 sps:$4 sm:$0xff]   ;;  %v9507_v37 = vld [vmem:[#allocation3 + $0x68] ss:$16 sps:$4 sm:$0xff]  }
 0x368   :  { %1948 = vmatprep.subr.bf16.mxu0 %v9461_v38  ;;  %1989 = vmatprep.subr.bf16.mxu1 %v9464_v39  ;;  %v9510_v38 = vld [vmem:[#allocation3 + $0x268] ss:$16 sps:$4 sm:$0xff]   ;;  %v9515_v39 = vld [vmem:[#allocation3 + $0x4c] ss:$16 sps:$4 sm:$0xff]  }
 0x36b   :  { %1949 = vmatpush2.bf16.msra.mxu0 %v9459_v40  ;;  %1990 = vmatpush2.bf16.msra.mxu1 %v9462_v41  ;;  %v9518_v40 = vld [vmem:[#allocation3 + $0x24c] ss:$16 sps:$4 sm:$0xff]   ;;  %v9513_v41 = vld [vmem:[#allocation3 + $0x48] ss:$16 sps:$4 sm:$0xff]  }
 0x36c   :  { %1950 = vmatprep.subr.bf16.mxu0 %v9467_v42  ;;  %1991 = vmatprep.subr.bf16.mxu1 %v9470_v44  ;;  %v9516_v42 = vld [vmem:[#allocation3 + $0x248] ss:$16 sps:$4 sm:$0xff]   ;;  %v9521_v44 = vld [vmem:[#allocation3 + $0x2c] ss:$16 sps:$4 sm:$0xff]  }
 0x36f   :  { %1951 = vmatpush2.bf16.msra.mxu0 %v9465_v45  ;;  %1992 = vmatpush2.bf16.msra.mxu1 %v9468_v47  ;;  %v9524_v45 = vld [vmem:[#allocation3 + $0x22c] ss:$16 sps:$4 sm:$0xff]   ;;  %v9519_v47 = vld [vmem:[#allocation3 + $0x28] ss:$16 sps:$4 sm:$0xff]  }
 0x370   :  { %1952 = vmatprep.subr.bf16.mxu0 %v9473_v48  ;;  %1993 = vmatprep.subr.bf16.mxu1 %v9476_v50  ;;  %v9527_v48 = vld [vmem:[#allocation3 + $0xc] ss:$16 sps:$4 sm:$0xff]   ;;  %v9525_v50 = vld [vmem:[#allocation3 + $0x8] ss:$16 sps:$4 sm:$0xff]  }
 0x373   :  { %1953 = vmatpush2.bf16.msra.mxu0 %v9471_v32  ;;  %1994 = vmatpush2.bf16.msra.mxu1 %v9474_v49  ;;  %v9522_v32 = vld [vmem:[#allocation3 + $0x228] ss:$16 sps:$4 sm:$0xff]   ;;  %v9530_v49 = vld [vmem:[#allocation3 + $0x20c] ss:$16 sps:$4 sm:$0xff]  }
 0x374   :  { %1954 = vmatprep.subr.bf16.mxu0 %v9479_v51  ;;  %1995 = vmatprep.subr.bf16.mxu1 %v9482_v52  ;;  %v9528_v51 = vld [vmem:[#allocation3 + $0x208] ss:$16 sps:$4 sm:$0xff]   ;;  %v9533_v52 = vld [vmem:[#allocation3 + $0x1ec] ss:$16 sps:$4 sm:$0xff]  }
 0x377   :  { %1955 = vmatpush2.bf16.msra.mxu0 %v9477_v53  ;;  %1996 = vmatpush2.bf16.msra.mxu1 %v9480_v54  ;;  %v9536_v53 = vld [vmem:[#allocation3 + $0x3ec] ss:$16 sps:$4 sm:$0xff]   ;;  %v9531_v54 = vld [vmem:[#allocation3 + $0x1e8] ss:$16 sps:$4 sm:$0xff]  }
 0x378   :  { %2006 = vmatprep.subr.bf16.mxu0 %v9485_v30  ;;  %2047 = vmatprep.subr.bf16.mxu1 %v9488_v33  ;;  %v9534_v30 = vld [vmem:[#allocation3 + $0x3e8] ss:$16 sps:$4 sm:$0xff]   ;;  %v9539_v33 = vld [vmem:[#allocation3 + $0x1cc] ss:$16 sps:$4 sm:$0xff]  }
 0x3fa   :  { %v1050_v59 = vpop.f32.mrf.mxu0  ;;  %v1121_v60 = vpop.f32.mrf.mxu1 }
 0x3fb   :  { %v1051_v61 = vadd.f32 %v1050_v59, %v964_v55  ;;  %v1122_v62 = vadd.f32 %v1121_v60, %v972_v56  ;;  %v9537_v55 = vld [vmem:[#allocation3 + $0x1c8] ss:$16 sps:$4 sm:$0xff]  }
 0x3fc   :  { %v1052_v63 = vpop.f32.mrf.mxu0  ;;  %v1123_v0 = vpop.f32.mrf.mxu1  ;;  %v9540_v56 = vld [vmem:[#allocation3 + $0x3c8] ss:$16 sps:$4 sm:$0xff]  }
 0x3fd   :  { %10543 = vtanh.f32 %v1051_v61  ;;  %v1053_v10 = vadd.f32 %v1052_v63, %v968_v57  ;;  %v1124_v1 = vadd.f32 %v1123_v0, %v976_v58  ;;  %v9545_v57 = vld [vmem:[#allocation3 + $0x1ac] ss:$16 sps:$4 sm:$0xff]   ;;  %v9543_v59 = vld [vmem:[#allocation3 + $0x1a8] ss:$16 sps:$4 sm:$0xff]  }
 0x3fe   :  { %10545 = vtanh.f32 %v1122_v62  ;;  %v9548_v58 = vld [vmem:[#allocation3 + $0x3ac] ss:$16 sps:$4 sm:$0xff]   ;;  %v9546_v60 = vld [vmem:[#allocation3 + $0x3a8] ss:$16 sps:$4 sm:$0xff]  }
 0x3ff   :  { %10547 = vtanh.f32 %v1053_v10  ;;  %v9551_v61 = vld [vmem:[#allocation3 + $0x18c] ss:$16 sps:$4 sm:$0xff]   ;;  %v9549_v63 = vld [vmem:[#allocation3 + $0x188] ss:$16 sps:$4 sm:$0xff]  }
 0x400   :  { %10549 = vtanh.f32 %v1124_v1  ;;  %v9554_v62 = vld [vmem:[#allocation3 + $0x38c] ss:$16 sps:$4 sm:$0xff]   ;;  %v9552_v0 = vld [vmem:[#allocation3 + $0x388] ss:$16 sps:$4 sm:$0xff]  }
 0x401   :  { %v9557_v10 = vld [vmem:[#allocation3 + $0x16c] ss:$16 sps:$4 sm:$0xff]  }
 0x402   :  { %v9560_v1 = vld [vmem:[#allocation3 + $0x36c] ss:$16 sps:$4 sm:$0xff]  }
 0x40a   :  { %v10544_v2 = vpop.eup %10543 }
 0x40b   :  { %v10546_v3 = vpop.eup %10545  ;;  %v11157_v6 = vpack.c.bf16 %v10544_v2, %v10544_v2  ;;  %v9555_v2 = vld [vmem:[#allocation3 + $0x168] ss:$16 sps:$4 sm:$0xff]  }
 0x40c   :  { %v10548_v4 = vpop.eup %10547  ;;  %v11161_v20 = vpack.c.bf16 %v10546_v3, %v10546_v3  ;;  %v9558_v3 = vld [vmem:[#allocation3 + $0x368] ss:$16 sps:$4 sm:$0xff]  }
 0x40d   :  { %v10550_v5 = vpop.eup %10549  ;;  %v11155_v8 = vpack.c.bf16 %v10548_v4, %v10548_v4  ;;  %v9563_v4 = vld [vmem:[#allocation3 + $0x14c] ss:$16 sps:$4 sm:$0xff]  }
 0x40e   :  { %v11159_v14 = vpack.c.bf16 %v10550_v5, %v10550_v5  ;;  %v9566_v5 = vld [vmem:[#allocation3 + $0x34c] ss:$16 sps:$4 sm:$0xff]  }
 0x40f   :  { %1956 = vmatprep.mubr.bf16.mxu0 %v11155_v8 }
 0x410   :  { %1997 = vmatprep.mubr.bf16.mxu1 %v11159_v14  ;;  %1957 = vmatmul.mubr.bf16.vlgmr.msra.gmra.mxu0 %v11157_v6 }
 0x411   :  { %1998 = vmatmul.mubr.bf16.vlgmr.msra.gmra.mxu1 %v11161_v20  ;;  %2007 = vmatpush1.bf16.msra.mxu0 %v9483_v11  ;;  %v9561_v11 = vld [vmem:[#allocation3 + $0x148] ss:$16 sps:$4 sm:$0xff]  }
 0x412   :  { %2048 = vmatpush1.bf16.msra.mxu1 %v9486_v19  ;;  %2038 = vmatprep.mubr.bf16.mxu0 %v11155_v8  ;;  %v9564_v19 = vld [vmem:[#allocation3 + $0x348] ss:$16 sps:$4 sm:$0xff]  }
 0x413   :  { %2079 = vmatprep.mubr.bf16.mxu1 %v11159_v14  ;;  %2008 = vmatprep.subr.bf16.mxu0 %v9491_v9  ;;  %v9569_v9 = vld [vmem:[#allocation3 + $0x12c] ss:$16 sps:$4 sm:$0xff]  }
 0x414   :  { %2049 = vmatprep.subr.bf16.mxu1 %v9494_v12  ;;  %v9572_v12 = vld [vmem:[#allocation3 + $0x32c] ss:$16 sps:$4 sm:$0xff]  }
 0x415   :  { %2009 = vmatpush1.bf16.msra.mxu0 %v9489_v13  ;;  %v9567_v13 = vld [vmem:[#allocation3 + $0x128] ss:$16 sps:$4 sm:$0xff]  }
 0x416   :  { %2050 = vmatpush1.bf16.msra.mxu1 %v9492_v21  ;;  %2010 = vmatprep.subr.bf16.mxu0 %v9497_v22  ;;  %v9570_v21 = vld [vmem:[#allocation3 + $0x328] ss:$16 sps:$4 sm:$0xff]   ;;  %v9575_v22 = vld [vmem:[#allocation3 + $0x10c] ss:$16 sps:$4 sm:$0xff]  }
 0x417   :  { %2051 = vmatprep.subr.bf16.mxu1 %v9500_v23  ;;  %v9578_v23 = vld [vmem:[#allocation3 + $0x30c] ss:$16 sps:$4 sm:$0xff]  }
 0x419   :  { %2011 = vmatpush1.bf16.msra.mxu0 %v9495_v24  ;;  %v9573_v24 = vld [vmem:[#allocation3 + $0x108] ss:$16 sps:$4 sm:$0xff]  }
 0x41a   :  { %2052 = vmatpush1.bf16.msra.mxu1 %v9498_v26  ;;  %2012 = vmatprep.subr.bf16.mxu0 %v9503_v27  ;;  %v9576_v26 = vld [vmem:[#allocation3 + $0x308] ss:$16 sps:$4 sm:$0xff]   ;;  %v9581_v27 = vld [vmem:[#allocation5 + $0xe4] ss:$16 sps:$4 sm:$0xff]  }
 0x41b   :  { %2053 = vmatprep.subr.bf16.mxu1 %v9506_v28  ;;  %v9584_v28 = vld [vmem:[#allocation5 + $0x2e4] ss:$16 sps:$4 sm:$0xff]  }
 0x41d   :  { %2013 = vmatpush1.bf16.msra.mxu0 %v9501_v29  ;;  %v9579_v29 = vld [vmem:[#allocation5 + $0xe0] ss:$16 sps:$4 sm:$0xff]  }
 0x41e   :  { %2054 = vmatpush1.bf16.msra.mxu1 %v9504_v34  ;;  %2014 = vmatprep.subr.bf16.mxu0 %v9509_v35  ;;  %v9582_v34 = vld [vmem:[#allocation5 + $0x2e0] ss:$16 sps:$4 sm:$0xff]   ;;  %v9587_v35 = vld [vmem:[#allocation5 + $0xc4] ss:$16 sps:$4 sm:$0xff]  }
 0x41f   :  { %2055 = vmatprep.subr.bf16.mxu1 %v9512_v36  ;;  %v9590_v36 = vld [vmem:[#allocation5 + $0x2c4] ss:$16 sps:$4 sm:$0xff]  }
 0x421   :  { %2015 = vmatpush1.bf16.msra.mxu0 %v9507_v37  ;;  %v9585_v37 = vld [vmem:[#allocation5 + $0xc0] ss:$16 sps:$4 sm:$0xff]  }
 0x422   :  { %2056 = vmatpush1.bf16.msra.mxu1 %v9510_v38  ;;  %2016 = vmatprep.subr.bf16.mxu0 %v9515_v39  ;;  %v9588_v38 = vld [vmem:[#allocation5 + $0x2c0] ss:$16 sps:$4 sm:$0xff]   ;;  %v9593_v39 = vld [vmem:[#allocation5 + $0xa4] ss:$16 sps:$4 sm:$0xff]  }
 0x423   :  { %2057 = vmatprep.subr.bf16.mxu1 %v9518_v40  ;;  %v9596_v40 = vld [vmem:[#allocation5 + $0x2a4] ss:$16 sps:$4 sm:$0xff]  }
 0x425   :  { %2017 = vmatpush1.bf16.msra.mxu0 %v9513_v41  ;;  %v9591_v41 = vld [vmem:[#allocation5 + $0xa0] ss:$16 sps:$4 sm:$0xff]  }
 0x426   :  { %2058 = vmatpush1.bf16.msra.mxu1 %v9516_v42  ;;  %2018 = vmatprep.subr.bf16.mxu0 %v9521_v44  ;;  %v9594_v42 = vld [vmem:[#allocation5 + $0x2a0] ss:$16 sps:$4 sm:$0xff]   ;;  %v9599_v44 = vld [vmem:[#allocation5 + $0x84] ss:$16 sps:$4 sm:$0xff]  }
 0x427   :  { %2059 = vmatprep.subr.bf16.mxu1 %v9524_v45  ;;  %v9602_v45 = vld [vmem:[#allocation5 + $0x284] ss:$16 sps:$4 sm:$0xff]  }
 0x429   :  { %2019 = vmatpush1.bf16.msra.mxu0 %v9519_v47  ;;  %v9597_v47 = vld [vmem:[#allocation5 + $0x80] ss:$16 sps:$4 sm:$0xff]  }
 0x42a   :  { %2060 = vmatpush1.bf16.msra.mxu1 %v9522_v32  ;;  %2020 = vmatprep.subr.bf16.mxu0 %v9527_v48  ;;  %v9600_v32 = vld [vmem:[#allocation5 + $0x280] ss:$16 sps:$4 sm:$0xff]   ;;  %v9605_v48 = vld [vmem:[#allocation5 + $0x64] ss:$16 sps:$4 sm:$0xff]  }
 0x42b   :  { %2061 = vmatprep.subr.bf16.mxu1 %v9530_v49  ;;  %v9608_v49 = vld [vmem:[#allocation5 + $0x264] ss:$16 sps:$4 sm:$0xff]  }
 0x42d   :  { %2021 = vmatpush1.bf16.msra.mxu0 %v9525_v50  ;;  %v9603_v50 = vld [vmem:[#allocation5 + $0x60] ss:$16 sps:$4 sm:$0xff]  }
 0x42e   :  { %2062 = vmatpush1.bf16.msra.mxu1 %v9528_v51  ;;  %2022 = vmatprep.subr.bf16.mxu0 %v9533_v52  ;;  %v9606_v51 = vld [vmem:[#allocation5 + $0x260] ss:$16 sps:$4 sm:$0xff]   ;;  %v9611_v52 = vld [vmem:[#allocation5 + $0x44] ss:$16 sps:$4 sm:$0xff]  }
 0x42f   :  { %2063 = vmatprep.subr.bf16.mxu1 %v9536_v53  ;;  %v9614_v53 = vld [vmem:[#allocation5 + $0x244] ss:$16 sps:$4 sm:$0xff]  }
 0x431   :  { %2023 = vmatpush2.bf16.msra.mxu0 %v9531_v54  ;;  %v9609_v54 = vld [vmem:[#allocation5 + $0x40] ss:$16 sps:$4 sm:$0xff]  }
 0x432   :  { %2064 = vmatpush2.bf16.msra.mxu1 %v9534_v30  ;;  %2024 = vmatprep.subr.bf16.mxu0 %v9539_v33  ;;  %v9612_v30 = vld [vmem:[#allocation5 + $0x240] ss:$16 sps:$4 sm:$0xff]   ;;  %v9617_v33 = vld [vmem:[#allocation5 + $0x24] ss:$16 sps:$4 sm:$0xff]  }
 0x433   :  { %2065 = vmatprep.subr.bf16.mxu1 %v9542_v31  ;;  %v9620_v31 = vld [vmem:[#allocation5 + $0x224] ss:$16 sps:$4 sm:$0xff]  }
 0x435   :  { %2025 = vmatpush2.bf16.msra.mxu0 %v9537_v55  ;;  %v9615_v55 = vld [vmem:[#allocation5 + $0x20] ss:$16 sps:$4 sm:$0xff]  }
 0x436   :  { %2066 = vmatpush2.bf16.msra.mxu1 %v9540_v56  ;;  %2026 = vmatprep.subr.bf16.mxu0 %v9545_v57  ;;  %v9618_v56 = vld [vmem:[#allocation5 + $0x220] ss:$16 sps:$4 sm:$0xff]   ;;  %v9623_v57 = vld [vmem:[#allocation5 + $0x4] ss:$16 sps:$4 sm:$0xff]  }
 0x437   :  { %2067 = vmatprep.subr.bf16.mxu1 %v9548_v58  ;;  %v9626_v58 = vld [vmem:[#allocation5 + $0x204] ss:$16 sps:$4 sm:$0xff]  }
 0x439   :  { %2027 = vmatpush2.bf16.msra.mxu0 %v9543_v59  ;;  %v9621_v59 = vld [vmem:[#allocation5] ss:$16 sps:$4 sm:$0xff]  }
 0x43a   :  { %2068 = vmatpush2.bf16.msra.mxu1 %v9546_v60  ;;  %2028 = vmatprep.subr.bf16.mxu0 %v9551_v61  ;;  %v9624_v60 = vld [vmem:[#allocation5 + $0x200] ss:$16 sps:$4 sm:$0xff]   ;;  %v9629_v61 = vld [vmem:[#allocation5 + $0x1e4] ss:$16 sps:$4 sm:$0xff]  }
 0x43b   :  { %2069 = vmatprep.subr.bf16.mxu1 %v9554_v62  ;;  %v9632_v62 = vld [vmem:[#allocation5 + $0x3e4] ss:$16 sps:$4 sm:$0xff]  }
 0x43d   :  { %2029 = vmatpush2.bf16.msra.mxu0 %v9549_v63  ;;  %v9627_v63 = vld [vmem:[#allocation5 + $0x1e0] ss:$16 sps:$4 sm:$0xff]  }
 0x43e   :  { %2070 = vmatpush2.bf16.msra.mxu1 %v9552_v0  ;;  %2030 = vmatprep.subr.bf16.mxu0 %v9557_v10  ;;  %v9630_v0 = vld [vmem:[#allocation5 + $0x3e0] ss:$16 sps:$4 sm:$0xff]   ;;  %v9635_v10 = vld [vmem:[#allocation5 + $0x1c4] ss:$16 sps:$4 sm:$0xff]  }
 0x43f   :  { %2071 = vmatprep.subr.bf16.mxu1 %v9560_v1  ;;  %v9638_v1 = vld [vmem:[#allocation5 + $0x3c4] ss:$16 sps:$4 sm:$0xff]  }
 0x441   :  { %2031 = vmatpush2.bf16.msra.mxu0 %v9555_v2  ;;  %v9633_v2 = vld [vmem:[#allocation5 + $0x1c0] ss:$16 sps:$4 sm:$0xff]  }
 0x442   :  { %2072 = vmatpush2.bf16.msra.mxu1 %v9558_v3  ;;  %2032 = vmatprep.subr.bf16.mxu0 %v9563_v4  ;;  %v9636_v3 = vld [vmem:[#allocation5 + $0x3c0] ss:$16 sps:$4 sm:$0xff]   ;;  %v9641_v4 = vld [vmem:[#allocation5 + $0x1a4] ss:$16 sps:$4 sm:$0xff]  }
 0x443   :  { %2073 = vmatprep.subr.bf16.mxu1 %v9566_v5  ;;  %v9644_v5 = vld [vmem:[#allocation5 + $0x3a4] ss:$16 sps:$4 sm:$0xff]  }
 0x445   :  { %2033 = vmatpush2.bf16.msra.mxu0 %v9561_v11  ;;  %v9639_v11 = vld [vmem:[#allocation5 + $0x1a0] ss:$16 sps:$4 sm:$0xff]  }
 0x446   :  { %2074 = vmatpush2.bf16.msra.mxu1 %v9564_v19  ;;  %2034 = vmatprep.subr.bf16.mxu0 %v9569_v9  ;;  %v9642_v19 = vld [vmem:[#allocation5 + $0x3a0] ss:$16 sps:$4 sm:$0xff]   ;;  %v9647_v9 = vld [vmem:[#allocation5 + $0x184] ss:$16 sps:$4 sm:$0xff]  }
 0x447   :  { %2075 = vmatprep.subr.bf16.mxu1 %v9572_v12  ;;  %v9650_v12 = vld [vmem:[#allocation5 + $0x384] ss:$16 sps:$4 sm:$0xff]  }
 0x449   :  { %2035 = vmatpush2.bf16.msra.mxu0 %v9567_v13  ;;  %v9645_v13 = vld [vmem:[#allocation5 + $0x180] ss:$16 sps:$4 sm:$0xff]  }
 0x44a   :  { %2076 = vmatpush2.bf16.msra.mxu1 %v9570_v21  ;;  %2036 = vmatprep.subr.bf16.mxu0 %v9575_v22  ;;  %v9648_v21 = vld [vmem:[#allocation5 + $0x380] ss:$16 sps:$4 sm:$0xff]   ;;  %v9653_v22 = vld [vmem:[#allocation5 + $0x164] ss:$16 sps:$4 sm:$0xff]  }
 0x44b   :  { %2077 = vmatprep.subr.bf16.mxu1 %v9578_v23  ;;  %v9656_v23 = vld [vmem:[#allocation5 + $0x364] ss:$16 sps:$4 sm:$0xff]  }
 0x44d   :  { %2037 = vmatpush2.bf16.msra.mxu0 %v9573_v24  ;;  %v9651_v24 = vld [vmem:[#allocation5 + $0x160] ss:$16 sps:$4 sm:$0xff]  }
 0x44e   :  { %2078 = vmatpush2.bf16.msra.mxu1 %v9576_v26  ;;  %2878 = vmatprep.subr.bf16.mxu0 %v9581_v27  ;;  %v9654_v26 = vld [vmem:[#allocation5 + $0x360] ss:$16 sps:$4 sm:$0xff]   ;;  %v9659_v27 = vld [vmem:[#allocation5 + $0x144] ss:$16 sps:$4 sm:$0xff]  }
 0x44f   :  { %2919 = vmatprep.subr.bf16.mxu1 %v9584_v28  ;;  %v9662_v28 = vld [vmem:[#allocation5 + $0x344] ss:$16 sps:$4 sm:$0xff]  }
 0x450   :  { %2039 = vmatmul.mubr.bf16.vlgmr.msra.gmra.mxu0 %v11157_v6 }
 0x451   :  { %2080 = vmatmul.mubr.bf16.vlgmr.msra.gmra.mxu1 %v11161_v20  ;;  %2879 = vmatpush1.bf16.msra.mxu0 %v9579_v29  ;;  %v9657_v29 = vld [vmem:[#allocation5 + $0x140] ss:$16 sps:$4 sm:$0xff]  }
 0x452   :  { %2910 = vmatprep.mubr.bf16.mxu0 %v11155_v8  ;;  %2920 = vmatpush1.bf16.msra.mxu1 %v9582_v34  ;;  %v9660_v34 = vld [vmem:[#allocation5 + $0x340] ss:$16 sps:$4 sm:$0xff]  }
 0x453   :  { %2951 = vmatprep.mubr.bf16.mxu1 %v11159_v14  ;;  %2880 = vmatprep.subr.bf16.mxu0 %v9587_v35  ;;  %v9665_v35 = vld [vmem:[#allocation5 + $0x124] ss:$16 sps:$4 sm:$0xff]  }
 0x454   :  { %2921 = vmatprep.subr.bf16.mxu1 %v9590_v36  ;;  %v9668_v36 = vld [vmem:[#allocation5 + $0x324] ss:$16 sps:$4 sm:$0xff]  }
 0x455   :  { %2881 = vmatpush1.bf16.msra.mxu0 %v9585_v37  ;;  %v9663_v37 = vld [vmem:[#allocation5 + $0x120] ss:$16 sps:$4 sm:$0xff]  }
 0x456   :  { %2922 = vmatpush1.bf16.msra.mxu1 %v9588_v38  ;;  %2882 = vmatprep.subr.bf16.mxu0 %v9593_v39  ;;  %v9666_v38 = vld [vmem:[#allocation5 + $0x320] ss:$16 sps:$4 sm:$0xff]   ;;  %v9671_v39 = vld [vmem:[#allocation5 + $0x104] ss:$16 sps:$4 sm:$0xff]  }
 0x457   :  { %2923 = vmatprep.subr.bf16.mxu1 %v9596_v40  ;;  %v9674_v40 = vld [vmem:[#allocation5 + $0x304] ss:$16 sps:$4 sm:$0xff]  }
 0x459   :  { %2883 = vmatpush1.bf16.msra.mxu0 %v9591_v41  ;;  %v9669_v41 = vld [vmem:[#allocation5 + $0x100] ss:$16 sps:$4 sm:$0xff]  }
 0x45a   :  { %2924 = vmatpush1.bf16.msra.mxu1 %v9594_v42  ;;  %2884 = vmatprep.subr.bf16.mxu0 %v9599_v44  ;;  %v9672_v42 = vld [vmem:[#allocation5 + $0x300] ss:$16 sps:$4 sm:$0xff]   ;;  %v9677_v44 = vld [vmem:[#allocation5 + $0xec] ss:$16 sps:$4 sm:$0xff]  }
 0x45b   :  { %2925 = vmatprep.subr.bf16.mxu1 %v9602_v45  ;;  %v9680_v45 = vld [vmem:[#allocation5 + $0x2ec] ss:$16 sps:$4 sm:$0xff]  }
 0x45d   :  { %2885 = vmatpush1.bf16.msra.mxu0 %v9597_v47  ;;  %v9675_v47 = vld [vmem:[#allocation5 + $0xe8] ss:$16 sps:$4 sm:$0xff]  }
 0x45e   :  { %2926 = vmatpush1.bf16.msra.mxu1 %v9600_v32  ;;  %2886 = vmatprep.subr.bf16.mxu0 %v9605_v48  ;;  %v9678_v32 = vld [vmem:[#allocation5 + $0x2e8] ss:$16 sps:$4 sm:$0xff]   ;;  %v9683_v48 = vld [vmem:[#allocation5 + $0xcc] ss:$16 sps:$4 sm:$0xff]  }
 0x45f   :  { %2927 = vmatprep.subr.bf16.mxu1 %v9608_v49  ;;  %v9686_v49 = vld [vmem:[#allocation5 + $0x2cc] ss:$16 sps:$4 sm:$0xff]  }
 0x461   :  { %2887 = vmatpush1.bf16.msra.mxu0 %v9603_v50  ;;  %v9681_v50 = vld [vmem:[#allocation5 + $0xc8] ss:$16 sps:$4 sm:$0xff]  }
 0x462   :  { %2928 = vmatpush1.bf16.msra.mxu1 %v9606_v51  ;;  %2888 = vmatprep.subr.bf16.mxu0 %v9611_v52  ;;  %v9684_v51 = vld [vmem:[#allocation5 + $0x2c8] ss:$16 sps:$4 sm:$0xff]   ;;  %v9689_v52 = vld [vmem:[#allocation5 + $0xac] ss:$16 sps:$4 sm:$0xff]  }
 0x463   :  { %2929 = vmatprep.subr.bf16.mxu1 %v9614_v53  ;;  %v9692_v53 = vld [vmem:[#allocation5 + $0x2ac] ss:$16 sps:$4 sm:$0xff]  }
 0x465   :  { %2889 = vmatpush1.bf16.msra.mxu0 %v9609_v54  ;;  %v9687_v54 = vld [vmem:[#allocation5 + $0xa8] ss:$16 sps:$4 sm:$0xff]  }
 0x466   :  { %2930 = vmatpush1.bf16.msra.mxu1 %v9612_v30  ;;  %2890 = vmatprep.subr.bf16.mxu0 %v9617_v33  ;;  %v9690_v30 = vld [vmem:[#allocation5 + $0x2a8] ss:$16 sps:$4 sm:$0xff]   ;;  %v9695_v33 = vld [vmem:[#allocation5 + $0x8c] ss:$16 sps:$4 sm:$0xff]  }
 0x467   :  { %2931 = vmatprep.subr.bf16.mxu1 %v9620_v31  ;;  %v9698_v31 = vld [vmem:[#allocation5 + $0x28c] ss:$16 sps:$4 sm:$0xff]  }
 0x469   :  { %2891 = vmatpush1.bf16.msra.mxu0 %v9615_v55  ;;  %v9693_v55 = vld [vmem:[#allocation5 + $0x88] ss:$16 sps:$4 sm:$0xff]  }
 0x46a   :  { %2932 = vmatpush1.bf16.msra.mxu1 %v9618_v56  ;;  %2892 = vmatprep.subr.bf16.mxu0 %v9623_v57  ;;  %v9701_v56 = vld [vmem:[#allocation5 + $0x6c] ss:$16 sps:$4 sm:$0xff]  }
 0x46b   :  { %2933 = vmatprep.subr.bf16.mxu1 %v9626_v58  ;;  %v9704_v57 = vld [vmem:[#allocation5 + $0x26c] ss:$16 sps:$4 sm:$0xff]   ;;  %v9702_v58 = vld [vmem:[#allocation5 + $0x268] ss:$16 sps:$4 sm:$0xff]  }
 0x46d   :  { %2893 = vmatpush1.bf16.msra.mxu0 %v9621_v59  ;;  %v9707_v59 = vld [vmem:[#allocation5 + $0x4c] ss:$16 sps:$4 sm:$0xff]  }
 0x46e   :  { %2934 = vmatpush1.bf16.msra.mxu1 %v9624_v60  ;;  %2894 = vmatprep.subr.bf16.mxu0 %v9629_v61  ;;  %v9710_v60 = vld [vmem:[#allocation5 + $0x24c] ss:$16 sps:$4 sm:$0xff]   ;;  %v9705_v61 = vld [vmem:[#allocation5 + $0x48] ss:$16 sps:$4 sm:$0xff]  }
 0x46f   :  { %2935 = vmatprep.subr.bf16.mxu1 %v9632_v62  ;;  %v9708_v62 = vld [vmem:[#allocation5 + $0x248] ss:$16 sps:$4 sm:$0xff]  }
 0x471   :  { %2895 = vmatpush2.bf16.msra.mxu0 %v9627_v63  ;;  %v9713_v63 = vld [vmem:[#allocation5 + $0x2c] ss:$16 sps:$4 sm:$0xff]  }
 0x472   :  { %2936 = vmatpush2.bf16.msra.mxu1 %v9630_v0  ;;  %2896 = vmatprep.subr.bf16.mxu0 %v9635_v10  ;;  %v9716_v0 = vld [vmem:[#allocation5 + $0x22c] ss:$16 sps:$4 sm:$0xff]   ;;  %v9711_v10 = vld [vmem:[#allocation5 + $0x28] ss:$16 sps:$4 sm:$0xff]  }
 0x473   :  { %2937 = vmatprep.subr.bf16.mxu1 %v9638_v1  ;;  %v9714_v1 = vld [vmem:[#allocation5 + $0x228] ss:$16 sps:$4 sm:$0xff]  }
 0x475   :  { %2897 = vmatpush2.bf16.msra.mxu0 %v9633_v2  ;;  %v9719_v2 = vld [vmem:[#allocation5 + $0xc] ss:$16 sps:$4 sm:$0xff]  }
 0x476   :  { %2938 = vmatpush2.bf16.msra.mxu1 %v9636_v3  ;;  %2898 = vmatprep.subr.bf16.mxu0 %v9641_v4  ;;  %v9722_v3 = vld [vmem:[#allocation5 + $0x20c] ss:$16 sps:$4 sm:$0xff]   ;;  %v9717_v4 = vld [vmem:[#allocation5 + $0x8] ss:$16 sps:$4 sm:$0xff]  }
 0x477   :  { %2939 = vmatprep.subr.bf16.mxu1 %v9644_v5  ;;  %v9720_v5 = vld [vmem:[#allocation5 + $0x208] ss:$16 sps:$4 sm:$0xff]  }
 0x479   :  { %2899 = vmatpush2.bf16.msra.mxu0 %v9639_v11  ;;  %v9725_v11 = vld [vmem:[#allocation5 + $0x1ec] ss:$16 sps:$4 sm:$0xff]  }
 0x47a   :  { %2940 = vmatpush2.bf16.msra.mxu1 %v9642_v19  ;;  %2900 = vmatprep.subr.bf16.mxu0 %v9647_v9  ;;  %v9728_v19 = vld [vmem:[#allocation5 + $0x3ec] ss:$16 sps:$4 sm:$0xff]   ;;  %v9723_v9 = vld [vmem:[#allocation5 + $0x1e8] ss:$16 sps:$4 sm:$0xff]  }
 0x47b   :  { %2941 = vmatprep.subr.bf16.mxu1 %v9650_v12  ;;  %v9726_v12 = vld [vmem:[#allocation5 + $0x3e8] ss:$16 sps:$4 sm:$0xff]  }
 0x47d   :  { %2901 = vmatpush2.bf16.msra.mxu0 %v9645_v13  ;;  %v9731_v13 = vld [vmem:[#allocation5 + $0x1cc] ss:$16 sps:$4 sm:$0xff]  }
 0x47e   :  { %2942 = vmatpush2.bf16.msra.mxu1 %v9648_v21  ;;  %2902 = vmatprep.subr.bf16.mxu0 %v9653_v22  ;;  %v9734_v21 = vld [vmem:[#allocation5 + $0x3cc] ss:$16 sps:$4 sm:$0xff]   ;;  %v9729_v22 = vld [vmem:[#allocation5 + $0x1c8] ss:$16 sps:$4 sm:$0xff]  }
 0x47f   :  { %2943 = vmatprep.subr.bf16.mxu1 %v9656_v23  ;;  %v9732_v23 = vld [vmem:[#allocation5 + $0x3c8] ss:$16 sps:$4 sm:$0xff]  }
 0x481   :  { %2903 = vmatpush2.bf16.msra.mxu0 %v9651_v24  ;;  %v9737_v24 = vld [vmem:[#allocation5 + $0x1ac] ss:$16 sps:$4 sm:$0xff]  }
 0x482   :  { %2944 = vmatpush2.bf16.msra.mxu1 %v9654_v26  ;;  %2904 = vmatprep.subr.bf16.mxu0 %v9659_v27  ;;  %v9740_v26 = vld [vmem:[#allocation5 + $0x3ac] ss:$16 sps:$4 sm:$0xff]   ;;  %v9735_v27 = vld [vmem:[#allocation5 + $0x1a8] ss:$16 sps:$4 sm:$0xff]  }
 0x483   :  { %2945 = vmatprep.subr.bf16.mxu1 %v9662_v28  ;;  %v9738_v28 = vld [vmem:[#allocation5 + $0x3a8] ss:$16 sps:$4 sm:$0xff]  }
 0x485   :  { %2905 = vmatpush2.bf16.msra.mxu0 %v9657_v29  ;;  %v9743_v29 = vld [vmem:[#allocation5 + $0x18c] ss:$16 sps:$4 sm:$0xff]  }
 0x486   :  { %2946 = vmatpush2.bf16.msra.mxu1 %v9660_v34  ;;  %2906 = vmatprep.subr.bf16.mxu0 %v9665_v35  ;;  %v9746_v34 = vld [vmem:[#allocation5 + $0x38c] ss:$16 sps:$4 sm:$0xff]   ;;  %v9741_v35 = vld [vmem:[#allocation5 + $0x188] ss:$16 sps:$4 sm:$0xff]  }
 0x487   :  { %2947 = vmatprep.subr.bf16.mxu1 %v9668_v36  ;;  %v9744_v36 = vld [vmem:[#allocation5 + $0x388] ss:$16 sps:$4 sm:$0xff]  }
 0x489   :  { %2907 = vmatpush2.bf16.msra.mxu0 %v9663_v37  ;;  %v9749_v37 = vld [vmem:[#allocation5 + $0x16c] ss:$16 sps:$4 sm:$0xff]  }
 0x48a   :  { %2948 = vmatpush2.bf16.msra.mxu1 %v9666_v38  ;;  %2908 = vmatprep.subr.bf16.mxu0 %v9671_v39  ;;  %v9752_v38 = vld [vmem:[#allocation5 + $0x36c] ss:$16 sps:$4 sm:$0xff]   ;;  %v9747_v39 = vld [vmem:[#allocation5 + $0x168] ss:$16 sps:$4 sm:$0xff]  }
 0x48b   :  { %2949 = vmatprep.subr.bf16.mxu1 %v9674_v40  ;;  %v9750_v40 = vld [vmem:[#allocation5 + $0x368] ss:$16 sps:$4 sm:$0xff]  }
 0x48d   :  { %2909 = vmatpush2.bf16.msra.mxu0 %v9669_v41  ;;  %v9755_v41 = vld [vmem:[#allocation5 + $0x14c] ss:$16 sps:$4 sm:$0xff]  }
 0x48e   :  { %2950 = vmatpush2.bf16.msra.mxu1 %v9672_v42  ;;  %2960 = vmatprep.subr.bf16.mxu0 %v9677_v44  ;;  %v9758_v42 = vld [vmem:[#allocation5 + $0x34c] ss:$16 sps:$4 sm:$0xff]   ;;  %v9753_v44 = vld [vmem:[#allocation5 + $0x148] ss:$16 sps:$4 sm:$0xff]  }
 0x48f   :  { %3001 = vmatprep.subr.bf16.mxu1 %v9680_v45  ;;  %v9756_v45 = vld [vmem:[#allocation5 + $0x348] ss:$16 sps:$4 sm:$0xff]  }
 0x490   :  { %2911 = vmatmul.mubr.bf16.vlgmr.msra.gmra.mxu0 %v11157_v6 }
 0x491   :  { %2952 = vmatmul.mubr.bf16.vlgmr.msra.gmra.mxu1 %v11161_v20  ;;  %2961 = vmatpush1.bf16.msra.mxu0 %v9675_v47  ;;  %v9761_v47 = vld [vmem:[#allocation5 + $0x12c] ss:$16 sps:$4 sm:$0xff]  }
 0x492   :  { %2992 = vmatprep.mubr.bf16.mxu0 %v11155_v8  ;;  %3002 = vmatpush1.bf16.msra.mxu1 %v9678_v32  ;;  %v9696_v8 = vld [vmem:[#allocation5 + $0x288] ss:$16 sps:$4 sm:$0xff]   ;;  %v9764_v32 = vld [vmem:[#allocation5 + $0x32c] ss:$16 sps:$4 sm:$0xff]  }
 0x493   :  { %3033 = vmatprep.mubr.bf16.mxu1 %v11159_v14  ;;  %2962 = vmatprep.subr.bf16.mxu0 %v9683_v48  ;;  %v9699_v14 = vld [vmem:[#allocation5 + $0x68] ss:$16 sps:$4 sm:$0xff]  }
 0x494   :  { %3003 = vmatprep.subr.bf16.mxu1 %v9686_v49  ;;  %v9759_v48 = vld [vmem:[#allocation5 + $0x128] ss:$16 sps:$4 sm:$0xff]  }
 0x495   :  { %2963 = vmatpush1.bf16.msra.mxu0 %v9681_v50  ;;  %v9762_v49 = vld [vmem:[#allocation5 + $0x328] ss:$16 sps:$4 sm:$0xff]   ;;  %v9767_v50 = vld [vmem:[#allocation5 + $0x10c] ss:$16 sps:$4 sm:$0xff]  }
 0x496   :  { %3004 = vmatpush1.bf16.msra.mxu1 %v9684_v51  ;;  %2964 = vmatprep.subr.bf16.mxu0 %v9689_v52  ;;  %v9770_v51 = vld [vmem:[#allocation5 + $0x30c] ss:$16 sps:$4 sm:$0xff]   ;;  %v9765_v52 = vld [vmem:[#allocation5 + $0x108] ss:$16 sps:$4 sm:$0xff]  }
 0x497   :  { %3005 = vmatprep.subr.bf16.mxu1 %v9692_v53  ;;  %v9768_v53 = vld [vmem:[#allocation5 + $0x308] ss:$16 sps:$4 sm:$0xff]  }
 0x499   :  { %2965 = vmatpush1.bf16.msra.mxu0 %v9687_v54  ;;  %v1262_v54 = vld [vmem:[%s11915_s8] sm:$0xf] }
 0x49a   :  { %3006 = vmatpush1.bf16.msra.mxu1 %v9690_v30  ;;  %2966 = vmatprep.subr.bf16.mxu0 %v9695_v33  ;;  %v1267_v30 = vrot.slane %v1262_v54, %v10937_v17  ;;  %v1271_v33 = vrot.slane %v1262_v54, %v10931_v15 }
 0x49b   :  { %3007 = vmatprep.subr.bf16.mxu1 %v9698_v31 }
 0x49d   :  { %2967 = vmatpush1.bf16.msra.mxu0 %v9693_v55 }
 0x49e   :  { %3008 = vmatpush1.bf16.msra.mxu1 %v9696_v8  ;;  %2968 = vmatprep.subr.bf16.mxu0 %v9701_v56 }
 0x49f   :  { %3009 = vmatprep.subr.bf16.mxu1 %v9704_v57 }
 0x4a1   :  { %2969 = vmatpush1.bf16.msra.mxu0 %v9699_v14 }
 0x4a2   :  { %3010 = vmatpush1.bf16.msra.mxu1 %v9702_v58  ;;  %2970 = vmatprep.subr.bf16.mxu0 %v9707_v59 }
 0x4a3   :  { %3011 = vmatprep.subr.bf16.mxu1 %v9710_v60 }
 0x4a5   :  { %2971 = vmatpush1.bf16.msra.mxu0 %v9705_v61 }
 0x4a6   :  { %3012 = vmatpush1.bf16.msra.mxu1 %v9708_v62  ;;  %2972 = vmatprep.subr.bf16.mxu0 %v9713_v63  ;;  %v1279_v63 = vrot.slane %v1262_v54, %v10934_v16 }
 0x4a7   :  { %3013 = vmatprep.subr.bf16.mxu1 %v9716_v0 }
 0x4a9   :  { %2973 = vmatpush1.bf16.msra.mxu0 %v9711_v10 }
 0x4aa   :  { %3014 = vmatpush1.bf16.msra.mxu1 %v9714_v1  ;;  %2974 = vmatprep.subr.bf16.mxu0 %v9719_v2 }
 0x4ab   :  { %3015 = vmatprep.subr.bf16.mxu1 %v9722_v3 }
 0x4ad   :  { %2975 = vmatpush1.bf16.msra.mxu0 %v9717_v4 }
 0x4ae   :  { %3016 = vmatpush1.bf16.msra.mxu1 %v9720_v5  ;;  %2976 = vmatprep.subr.bf16.mxu0 %v9725_v11 }
 0x4af   :  { %3017 = vmatprep.subr.bf16.mxu1 %v9728_v19 }
 0x4b1   :  { %2977 = vmatpush2.bf16.msra.mxu0 %v9723_v9 }
 0x4b2   :  { %3018 = vmatpush2.bf16.msra.mxu1 %v9726_v12  ;;  %2978 = vmatprep.subr.bf16.mxu0 %v9731_v13 }
 0x4b3   :  { %3019 = vmatprep.subr.bf16.mxu1 %v9734_v21  ;;  %v2216_v21 = vld [vmem:[%s11874_s12] sm:$0xf] }
 0x4b5   :  { %2979 = vmatpush2.bf16.msra.mxu0 %v9729_v22  ;;  %v2221_v22 = vrot.slane %v2216_v21, %v10937_v17 }
 0x4b6   :  { %3020 = vmatpush2.bf16.msra.mxu1 %v9732_v23  ;;  %2980 = vmatprep.subr.bf16.mxu0 %v9737_v24  ;;  %v2225_v23 = vrot.slane %v2216_v21, %v10931_v15 }
 0x4b7   :  { %3021 = vmatprep.subr.bf16.mxu1 %v9740_v26 }
 0x4b9   :  { %2981 = vmatpush2.bf16.msra.mxu0 %v9735_v27 }
 0x4ba   :  { %3022 = vmatpush2.bf16.msra.mxu1 %v9738_v28  ;;  %2982 = vmatprep.subr.bf16.mxu0 %v9743_v29 }
 0x4bb   :  { %3023 = vmatprep.subr.bf16.mxu1 %v9746_v34 }
 0x4bd   :  { %2983 = vmatpush2.bf16.msra.mxu0 %v9741_v35 }
 0x4be   :  { %3024 = vmatpush2.bf16.msra.mxu1 %v9744_v36  ;;  %2984 = vmatprep.subr.bf16.mxu0 %v9749_v37 }
 0x4bf   :  { %3025 = vmatprep.subr.bf16.mxu1 %v9752_v38 }
 0x4c1   :  { %2985 = vmatpush2.bf16.msra.mxu0 %v9747_v39 }
 0x4c2   :  { %3026 = vmatpush2.bf16.msra.mxu1 %v9750_v40  ;;  %2986 = vmatprep.subr.bf16.mxu0 %v9755_v41 }
 0x4c3   :  { %3027 = vmatprep.subr.bf16.mxu1 %v9758_v42 }
 0x4c5   :  { %2987 = vmatpush2.bf16.msra.mxu0 %v9753_v44  ;;  %v2229_v44 = vrot.slane %v2216_v21, %v10940_v18 }
 0x4c6   :  { %3028 = vmatpush2.bf16.msra.mxu1 %v9756_v45  ;;  %2988 = vmatprep.subr.bf16.mxu0 %v9761_v47  ;;  %v2233_v45 = vrot.slane %v2216_v21, %v10934_v16 }
 0x4c7   :  { %3029 = vmatprep.subr.bf16.mxu1 %v9764_v32 }
 0x4c9   :  { %2989 = vmatpush2.bf16.msra.mxu0 %v9759_v48 }
 0x4ca   :  { %3030 = vmatpush2.bf16.msra.mxu1 %v9762_v49  ;;  %2990 = vmatprep.subr.bf16.mxu0 %v9767_v50 }
 0x4cb   :  { %3031 = vmatprep.subr.bf16.mxu1 %v9770_v51 }
 0x4cd   :  { %2991 = vmatpush2.bf16.msra.mxu0 %v9765_v52 }
 0x4ce   :  { %3032 = vmatpush2.bf16.msra.mxu1 %v9768_v53 }
 0x4d0   :  { %2993 = vmatmul.mubr.bf16.vlgmr.msra.gmra.mxu0 %v11157_v6  ;;  %v1958_v31 = vpop.f32.mrf.mxu0 }
 0x4d1   :  { %3034 = vmatmul.mubr.bf16.vlgmr.msra.gmra.mxu1 %v11161_v20  ;;  %v1999_v55 = vpop.f32.mrf.mxu1  ;;  %3645 = vmatprep.mubr.f32.mxu0 %v10717_v43  ;;  %v1959_v8 = vadd.f32 %v1958_v31, %v1267_v30  ;;  %v1275_v20 = vrot.slane %v1262_v54, %v10940_v18 }
 0x4d2   :  { %v1960_v56 = vpop.f32.mrf.mxu0  ;;  %3716 = vmatprep.mubr.f32.mxu1 %v10717_v43 }
 0x4d3   :  { %v1961_v57 = vadd.f32 %v1960_v56, %v1271_v33  ;;  %v2001_v14 = vpop.f32.mrf.mxu1  ;;  %v11188_v61 = vadd.f32 %v1999_v55, %v1959_v8 }
 0x4d4   :  { %v1962_v58 = vpop.f32.mrf.mxu0 }
 0x4d5   :  { %v11186_v59 = vadd.f32 %v2001_v14, %v1961_v57  ;;  %v2003_v60 = vpop.f32.mrf.mxu1 }
 0x4d6   :  { %v1963_v62 = vpop.f32.mrf.mxu0  ;;  %v3402_v60 = vld [vmem:[%s11875_s13] sm:$0xf] }
 0x4d7   :  { %v2004_v6 = vpop.f32.mrf.mxu1  ;;  %3611 = vmatprep.subr.mxu0 %v11186_v59 }
 0x4d8   :  { %3612 = vmatpush1.msra.mxu0 %v11188_v61 }
 0x510   :  { %v2040_v0 = vpop.f32.mrf.mxu0 }
 0x511   :  { %v2081_v10 = vpop.f32.mrf.mxu1  ;;  %v2041_v1 = vadd.f32 %v2040_v0, %v1275_v20 }
 0x512   :  { %v2042_v2 = vpop.f32.mrf.mxu0 }
 0x513   :  { %v2043_v3 = vadd.f32 %v2042_v2, %v1279_v63  ;;  %v2083_v4 = vpop.f32.mrf.mxu1  ;;  %v11196_v9 = vadd.f32 %v2081_v10, %v2041_v1  ;;  %v11221_v1 = vrot.slane %v3402_v60, %v10937_v17  ;;  %v11224_v2 = vrot.slane %v3402_v60, %v10931_v15 }
 0x514   :  { %v2044_v5 = vpop.f32.mrf.mxu0 }
 0x515   :  { %v11194_v11 = vadd.f32 %v2083_v4, %v2043_v3  ;;  %v2085_v19 = vpop.f32.mrf.mxu1  ;;  %v11233_v5 = vrot.slane %v3402_v60, %v10940_v18 }
 0x516   :  { %v2045_v12 = vpop.f32.mrf.mxu0  ;;  %v11236_v19 = vrot.slane %v3402_v60, %v10934_v16 }
 0x517   :  { %v2086_v13 = vpop.f32.mrf.mxu1  ;;  %3682 = vmatprep.subr.mxu1 %v11194_v11 }
 0x518   :  { %3683 = vmatpush1.msra.mxu1 %v11196_v9 }
 0x550   :  { %v2912_v24 = vpop.f32.mrf.mxu0 }
 0x551   :  { %v2913_v26 = vadd.f32 %v2912_v24, %v2221_v22  ;;  %v2953_v27 = vpop.f32.mrf.mxu1 }
 0x552   :  { %v2914_v28 = vpop.f32.mrf.mxu0 }
 0x553   :  { %v2954_v29 = vadd.f32 %v2953_v27, %v2913_v26  ;;  %v2915_v34 = vadd.f32 %v2914_v28, %v2225_v23  ;;  %v2955_v35 = vpop.f32.mrf.mxu1 }
 0x554   :  { %v2916_v36 = vpop.f32.mrf.mxu0 }
 0x555   :  { %v2956_v37 = vadd.f32 %v2955_v35, %v2915_v34  ;;  %v2957_v38 = vpop.f32.mrf.mxu1 }
 0x556   :  { %v2917_v39 = vpop.f32.mrf.mxu0 }
 0x557   :  { %v3046_v40 = vcombine.low %v2954_v29, %v2956_v37  ;;  %v3047_v41 = vcombine.high %v2954_v29, %v2956_v37  ;;  %v2958_v42 = vpop.f32.mrf.mxu1 }
 0x559   :  { %v3056_v56 = vrot.slane %v3046_v40, %v10966_v46  ;;  %v3063_v57 = vrot.slane %v3047_v41, %v10966_v46 }
 0x590   :  { %v2994_v47 = vpop.f32.mrf.mxu0 }
 0x591   :  { %v2995_v32 = vadd.f32 %v2994_v47, %v2229_v44  ;;  %v3035_v48 = vpop.f32.mrf.mxu1 }
 0x592   :  { %v2996_v49 = vpop.f32.mrf.mxu0 }
 0x593   :  { %v2997_v50 = vadd.f32 %v2996_v49, %v2233_v45  ;;  %v3037_v51 = vpop.f32.mrf.mxu1  ;;  %v3036_v53 = vadd.f32 %v3035_v48, %v2995_v32 }
 0x594   :  { %v2998_v52 = vpop.f32.mrf.mxu0 }
 0x595   :  { %v3038_v54 = vadd.f32 %v3037_v51, %v2997_v50  ;;  %v3039_v30 = vpop.f32.mrf.mxu1 }
 0x596   :  { %v2999_v33 = vpop.f32.mrf.mxu0 }
 0x597   :  { %v3048_v31 = vcombine.low %v3036_v53, %v3038_v54  ;;  %v3049_v55 = vcombine.high %v3036_v53, %v3038_v54  ;;  %v3040_v8 = vpop.f32.mrf.mxu1 }
 0x599   :  { %v3070_v14 = vrot.slane %v3048_v31, %v10966_v46  ;;  %v3077_v58 = vrot.slane %v3049_v55, %v10966_v46 }
 0x59b   :  { %v3078_v62 = vcombine.low %v3056_v56, %v3070_v14  ;;  %v3079_v6 = vcombine.high %v3056_v56, %v3070_v14  ;;  %v3080_v20 = vcombine.low %v3063_v57, %v3077_v58  ;;  %v3081_v63 = vcombine.high %v3063_v57, %v3077_v58 }
 0x59d   :  { %v11215_v0 = vrot.slane %v3078_v62, %v10966_v46  ;;  %v11218_v10 = vrot.slane %v3079_v6, %v10966_v46  ;;  %v11227_v3 = vrot.slane %v3080_v20, %v10966_v46  ;;  %v11230_v4 = vrot.slane %v3081_v63, %v10966_v46 }
 0x59f   :  { %v3133_v12 = vrot.slane %v11218_v10, %v10937_v17  ;;  %v3137_v13 = vrot.slane %v11218_v10, %v10931_v15  ;;  %v3141_v21 = vrot.slane %v11218_v10, %v10940_v18  ;;  %v3145_v22 = vrot.slane %v11218_v10, %v10934_v16 }
 0x5a0   :  { %v3117_v23 = vrot.slane %v11215_v0, %v10937_v17  ;;  %v3121_v24 = vrot.slane %v11215_v0, %v10931_v15  ;;  %v3125_v26 = vrot.slane %v11215_v0, %v10940_v18  ;;  %v3129_v27 = vrot.slane %v11215_v0, %v10934_v16 }
 0x5a1   :  { %v3278_v28 = vadd.f32 %v3133_v12, %v11188_v61  ;;  %v3279_v29 = vadd.f32 %v3137_v13, %v11186_v59  ;;  %v3280_v34 = vadd.f32 %v3141_v21, %v11196_v9  ;;  %v3281_v35 = vadd.f32 %v3145_v22, %v11194_v11 }
 0x5a2   :  { %v3274_v36 = vadd.f32 %v3117_v23, %v11188_v61  ;;  %v3275_v37 = vadd.f32 %v3121_v24, %v11186_v59  ;;  %v3276_v38 = vadd.f32 %v3125_v26, %v11196_v9  ;;  %v3277_v39 = vadd.f32 %v3129_v27, %v11194_v11 }
 0x5a3   :  { %vm3310_vm10 = vcmp.ge.f32.partialorder %v3278_v28, 0.0  ;;  %vm3311_vm11 = vcmp.ge.f32.partialorder %v3279_v29, 0.0  ;;  %vm3312_vm12 = vcmp.ge.f32.partialorder %v3280_v34, 0.0  ;;  %vm3313_vm13 = vcmp.ge.f32.partialorder %v3281_v35, 0.0 }
 0x5a4   :  { %v3342_v40 = vmul.f32 0.2, %v3278_v28  ;;  %v3343_v41 = vmul.f32 0.2, %v3279_v29  ;;  %v3344_v42 = vmul.f32 0.2, %v3280_v34  ;;  %v3197_v44 = vrot.slane %v11230_v4, %v10937_v17 }
 0x5a5   :  { %v3345_v45 = vmul.f32 0.2, %v3281_v35  ;;  %vm3306_vm14 = vcmp.ge.f32.partialorder %v3274_v36, 0.0  ;;  %vm3307_vm15 = vcmp.ge.f32.partialorder %v3275_v37, 0.0  ;;  %vm3308_vm0 = vcmp.ge.f32.partialorder %v3276_v38, 0.0 }
 0x5a6   :  { %v3374_v47 = vsel %vm3310_vm10, %v3278_v28, %v3342_v40  ;;  %v3375_v32 = vsel %vm3311_vm11, %v3279_v29, %v3343_v41  ;;  %v3376_v48 = vsel %vm3312_vm12, %v3280_v34, %v3344_v42  ;;  %vm3309_vm9 = vcmp.ge.f32.partialorder %v3277_v39, 0.0 }
 0x5a7   :  { %v3377_v49 = vsel %vm3313_vm13, %v3281_v35, %v3345_v45  ;;  %v3428_v50 = vmul.f32 %v11221_v1, %v3374_v47  ;;  %v3429_v51 = vmul.f32 %v11224_v2, %v3375_v32  ;;  %v3430_v52 = vmul.f32 %v11233_v5, %v3376_v48 }
 0x5a8   :  { %v3431_v53 = vmul.f32 %v11236_v19, %v3377_v49  ;;  %v3338_v54 = vmul.f32 0.2, %v3274_v36  ;;  %v3339_v30 = vmul.f32 0.2, %v3275_v37  ;;  %v3340_v33 = vmul.f32 0.2, %v3276_v38 }
 0x5a9   :  { %v3461_v31 = vadd.f32 %v3429_v51, %v3428_v50  ;;  %v3341_v55 = vmul.f32 0.2, %v3277_v39  ;;  %v3201_v8 = vrot.slane %v11230_v4, %v10931_v15  ;;  %v3205_v56 = vrot.slane %v11230_v4, %v10940_v18 }
 0x5aa   :  { %v3370_v57 = vsel %vm3306_vm14, %v3274_v36, %v3338_v54  ;;  %v3371_v14 = vsel %vm3307_vm15, %v3275_v37, %v3339_v30  ;;  %v3372_v58 = vsel %vm3308_vm0, %v3276_v38, %v3340_v33  ;;  %v3209_v60 = vrot.slane %v11230_v4, %v10934_v16 }
 0x5ab   :  { %v3462_v62 = vadd.f32 %v3461_v31, %v3430_v52  ;;  %v3373_v6 = vsel %vm3309_vm9, %v3277_v39, %v3341_v55  ;;  %v3424_v20 = vmul.f32 %v11221_v1, %v3370_v57  ;;  %v3425_v63 = vmul.f32 %v11224_v2, %v3371_v14 }
 0x5ac   :  { %v3426_v12 = vmul.f32 %v11233_v5, %v3372_v58  ;;  %v3427_v13 = vmul.f32 %v11236_v19, %v3373_v6  ;;  %v3294_v21 = vadd.f32 %v3197_v44, %v11188_v61  ;;  %v3295_v22 = vadd.f32 %v3201_v8, %v11186_v59 }
 0x5ad   :  { %v3463_v23 = vadd.f32 %v3462_v62, %v3431_v53  ;;  %v3456_v24 = vadd.f32 %v3425_v63, %v3424_v20  ;;  %v3296_v26 = vadd.f32 %v3205_v56, %v11196_v9  ;;  %v3297_v27 = vadd.f32 %v3209_v60, %v11194_v11 }
 0x5ae   :  { %vm3326_vm10 = vcmp.ge.f32.partialorder %v3294_v21, 0.0  ;;  %vm3327_vm9 = vcmp.ge.f32.partialorder %v3295_v22, 0.0  ;;  %v3358_v28 = vmul.f32 0.2, %v3294_v21  ;;  %v3359_v29 = vmul.f32 0.2, %v3295_v22 }
 0x5af   :  { %3464 = vadd.xlane.f32.xlu1 %v3463_v23  ;;  %v3457_v34 = vadd.f32 %v3456_v24, %v3426_v12  ;;  %vm3328_vm11 = vcmp.ge.f32.partialorder %v3296_v26, 0.0  ;;  %vm3329_vm12 = vcmp.ge.f32.partialorder %v3297_v27, 0.0  ;;  %v3360_v35 = vmul.f32 0.2, %v3296_v26 }
 0x5b0   :  { %v3361_v36 = vmul.f32 0.2, %v3297_v27  ;;  %v3390_v37 = vsel %vm3326_vm10, %v3294_v21, %v3358_v28  ;;  %v3391_v38 = vsel %vm3327_vm9, %v3295_v22, %v3359_v29  ;;  %v3181_v39 = vrot.slane %v11227_v3, %v10937_v17 }
 0x5b1   :  { %v3458_v40 = vadd.f32 %v3457_v34, %v3427_v13  ;;  %v3392_v41 = vsel %vm3328_vm11, %v3296_v26, %v3360_v35  ;;  %v3444_v42 = vmul.f32 %v11221_v1, %v3390_v37  ;;  %v3445_v44 = vmul.f32 %v11224_v2, %v3391_v38 }
 0x5b2   :  { %v3393_v45 = vsel %vm3329_vm12, %v3297_v27, %v3361_v36  ;;  %v3446_v47 = vmul.f32 %v11233_v5, %v3392_v41  ;;  %v3185_v32 = vrot.slane %v11227_v3, %v10931_v15  ;;  %v3189_v48 = vrot.slane %v11227_v3, %v10940_v18 }
 0x5b3   :  { %3459 = vadd.xlane.f32.xlu0 %v3458_v40  ;;  %v3447_v49 = vmul.f32 %v11236_v19, %v3393_v45  ;;  %v3481_v50 = vadd.f32 %v3445_v44, %v3444_v42  ;;  %v3193_v51 = vrot.slane %v11227_v3, %v10934_v16  ;;  %v3290_v52 = vadd.f32 %v3181_v39, %v11188_v61 }
 0x5b4   :  { %v3291_v53 = vadd.f32 %v3185_v32, %v11186_v59  ;;  %v3292_v54 = vadd.f32 %v3189_v48, %v11196_v9  ;;  %v3112_v30 = vcombine.high %v11218_v10, %v11218_v10  ;;  %v3110_v33 = vcombine.high %v11215_v0, %v11215_v0 }
 0x5b5   :  { %v3482_v31 = vadd.f32 %v3481_v50, %v3446_v47  ;;  %v3293_v55 = vadd.f32 %v3193_v51, %v11194_v11  ;;  %vm3322_vm13 = vcmp.ge.f32.partialorder %v3290_v52, 0.0  ;;  %v3354_v8 = vmul.f32 0.2, %v3290_v52 }
 0x5b6   :  { %vm3323_vm14 = vcmp.ge.f32.partialorder %v3291_v53, 0.0  ;;  %vm3324_vm15 = vcmp.ge.f32.partialorder %v3292_v54, 0.0  ;;  %v3355_v56 = vmul.f32 0.2, %v3291_v53  ;;  %v3356_v57 = vmul.f32 0.2, %v3292_v54 }
 0x5b7   :  { %v3483_v14 = vadd.f32 %v3482_v31, %v3447_v49  ;;  %vm3325_vm0 = vcmp.ge.f32.partialorder %v3293_v55, 0.0  ;;  %v3357_v58 = vmul.f32 0.2, %v3293_v55  ;;  %v3386_v60 = vsel %vm3322_vm13, %v3290_v52, %v3354_v8 }
 0x5b8   :  { %v3387_v62 = vsel %vm3323_vm14, %v3291_v53, %v3355_v56  ;;  %v3388_v6 = vsel %vm3324_vm15, %v3292_v54, %v3356_v57  ;;  %v3440_v10 = vmul.f32 %v11221_v1, %v3386_v60  ;;  %v3165_v20 = vrot.slane %v3112_v30, %v10937_v17 }
 0x5b9   :  { %3484 = vadd.xlane.f32.xlu1 %v3483_v14  ;;  %v3389_v0 = vsel %vm3325_vm0, %v3293_v55, %v3357_v58  ;;  %v3441_v63 = vmul.f32 %v11224_v2, %v3387_v62  ;;  %v3442_v12 = vmul.f32 %v11233_v5, %v3388_v6  ;;  %v3169_v13 = vrot.slane %v3112_v30, %v10931_v15 }
 0x5ba   :  { %v3443_v21 = vmul.f32 %v11236_v19, %v3389_v0  ;;  %v3173_v22 = vrot.slane %v3112_v30, %v10940_v18  ;;  %v3177_v23 = vrot.slane %v3112_v30, %v10934_v16  ;;  %v3286_v24 = vadd.f32 %v3165_v20, %v11188_v61 }
 0x5bb   :  { %v3476_v26 = vadd.f32 %v3441_v63, %v3440_v10  ;;  %v3287_v27 = vadd.f32 %v3169_v13, %v11186_v59  ;;  %v3149_v28 = vrot.slane %v3110_v33, %v10937_v17  ;;  %v3153_v29 = vrot.slane %v3110_v33, %v10931_v15 }
 0x5bc   :  { %v3288_v34 = vadd.f32 %v3173_v22, %v11196_v9  ;;  %v3289_v35 = vadd.f32 %v3177_v23, %v11194_v11  ;;  %vm3318_vm10 = vcmp.ge.f32.partialorder %v3286_v24, 0.0  ;;  %v3350_v36 = vmul.f32 0.2, %v3286_v24 }
 0x5bd   :  { %v3477_v37 = vadd.f32 %v3476_v26, %v3442_v12  ;;  %vm3319_vm9 = vcmp.ge.f32.partialorder %v3287_v27, 0.0  ;;  %v3351_v38 = vmul.f32 0.2, %v3287_v27  ;;  %v3157_v39 = vrot.slane %v3110_v33, %v10940_v18 }
 0x5be   :  { %vm3320_vm11 = vcmp.ge.f32.partialorder %v3288_v34, 0.0  ;;  %vm3321_vm12 = vcmp.ge.f32.partialorder %v3289_v35, 0.0  ;;  %v3352_v40 = vmul.f32 0.2, %v3288_v34  ;;  %v3353_v41 = vmul.f32 0.2, %v3289_v35 }
 0x5bf   :  { %v3478_v42 = vadd.f32 %v3477_v37, %v3443_v21  ;;  %v3382_v44 = vsel %vm3318_vm10, %v3286_v24, %v3350_v36  ;;  %v3383_v45 = vsel %vm3319_vm9, %v3287_v27, %v3351_v38  ;;  %v3161_v47 = vrot.slane %v3110_v33, %v10934_v16 }
 0x5c0   :  { %v3384_v32 = vsel %vm3320_vm11, %v3288_v34, %v3352_v40  ;;  %v3385_v48 = vsel %vm3321_vm12, %v3289_v35, %v3353_v41  ;;  %v3436_v49 = vmul.f32 %v11221_v1, %v3382_v44  ;;  %v3437_v50 = vmul.f32 %v11224_v2, %v3383_v45 }
 0x5c1   :  { %3479 = vadd.xlane.f32.xlu0 %v3478_v42  ;;  %v3438_v51 = vmul.f32 %v11233_v5, %v3384_v32  ;;  %v3439_v52 = vmul.f32 %v11236_v19, %v3385_v48  ;;  %v3282_v53 = vadd.f32 %v3149_v28, %v11188_v61  ;;  %v3283_v54 = vadd.f32 %v3153_v29, %v11186_v59 }
 0x5c2   :  { %v3471_v30 = vadd.f32 %v3437_v50, %v3436_v49  ;;  %v3284_v31 = vadd.f32 %v3157_v39, %v11196_v9  ;;  %v3285_v33 = vadd.f32 %v3161_v47, %v11194_v11  ;;  %v3113_v55 = vcombine.high %v11230_v4, %v11230_v4 }
 0x5c3   :  { %vm3314_vm13 = vcmp.ge.f32.partialorder %v3282_v53, 0.0  ;;  %vm3315_vm14 = vcmp.ge.f32.partialorder %v3283_v54, 0.0  ;;  %v3346_v8 = vmul.f32 0.2, %v3282_v53  ;;  %v3347_v56 = vmul.f32 0.2, %v3283_v54 }
 0x5c4   :  { %v3472_v57 = vadd.f32 %v3471_v30, %v3438_v51  ;;  %vm3316_vm15 = vcmp.ge.f32.partialorder %v3284_v31, 0.0  ;;  %vm3317_vm0 = vcmp.ge.f32.partialorder %v3285_v33, 0.0  ;;  %v3348_v14 = vmul.f32 0.2, %v3284_v31 }
 0x5c5   :  { %v3349_v58 = vmul.f32 0.2, %v3285_v33  ;;  %v3378_v60 = vsel %vm3314_vm13, %v3282_v53, %v3346_v8  ;;  %v3379_v62 = vsel %vm3315_vm14, %v3283_v54, %v3347_v56  ;;  %v3229_v6 = vrot.slane %v3113_v55, %v10937_v17 }
 0x5c6   :  { %v3473_v10 = vadd.f32 %v3472_v57, %v3439_v52  ;;  %v3380_v20 = vsel %vm3316_vm15, %v3284_v31, %v3348_v14  ;;  %v3432_v0 = vmul.f32 %v11221_v1, %v3378_v60  ;;  %v3433_v63 = vmul.f32 %v11224_v2, %v3379_v62 }
 0x5c7   :  { %v3381_v4 = vsel %vm3317_vm0, %v3285_v33, %v3349_v58  ;;  %v3233_v12 = vrot.slane %v3113_v55, %v10931_v15  ;;  %v3237_v13 = vrot.slane %v3113_v55, %v10940_v18  ;;  %v3434_v21 = vmul.f32 %v11233_v5, %v3380_v20 }
 0x5c8   :  { %3474 = vadd.xlane.f32.xlu1 %v3473_v10  ;;  %v3466_v22 = vadd.f32 %v3433_v63, %v3432_v0  ;;  %v3241_v23 = vrot.slane %v3113_v55, %v10934_v16  ;;  %v3302_v24 = vadd.f32 %v3229_v6, %v11188_v61  ;;  %v3435_v26 = vmul.f32 %v11236_v19, %v3381_v4 }
 0x5c9   :  { %v3303_v27 = vadd.f32 %v3233_v12, %v11186_v59  ;;  %v3304_v28 = vadd.f32 %v3237_v13, %v11196_v9  ;;  %v3111_v29 = vcombine.high %v11227_v3, %v11227_v3 }
 0x5ca   :  { %v3467_v34 = vadd.f32 %v3466_v22, %v3434_v21  ;;  %v3305_v35 = vadd.f32 %v3241_v23, %v11194_v11  ;;  %vm3334_vm10 = vcmp.ge.f32.partialorder %v3302_v24, 0.0  ;;  %v3366_v36 = vmul.f32 0.2, %v3302_v24 }
 0x5cb   :  { %vm3335_vm9 = vcmp.ge.f32.partialorder %v3303_v27, 0.0  ;;  %vm3336_vm11 = vcmp.ge.f32.partialorder %v3304_v28, 0.0  ;;  %v3367_v37 = vmul.f32 0.2, %v3303_v27  ;;  %v3368_v38 = vmul.f32 0.2, %v3304_v28 }
 0x5cc   :  { %v3468_v39 = vadd.f32 %v3467_v34, %v3435_v26  ;;  %vm3337_vm12 = vcmp.ge.f32.partialorder %v3305_v35, 0.0  ;;  %v3369_v40 = vmul.f32 0.2, %v3305_v35  ;;  %v3398_v41 = vsel %vm3334_vm10, %v3302_v24, %v3366_v36 }
 0x5cd   :  { %v3399_v42 = vsel %vm3335_vm9, %v3303_v27, %v3367_v37  ;;  %v3400_v44 = vsel %vm3336_vm11, %v3304_v28, %v3368_v38  ;;  %v3452_v45 = vmul.f32 %v11221_v1, %v3398_v41  ;;  %v3213_v47 = vrot.slane %v3111_v29, %v10937_v17 }
 0x5ce   :  { %3469 = vadd.xlane.f32.xlu0 %v3468_v39  ;;  %v3453_v3 = vmul.f32 %v11224_v2, %v3399_v42  ;;  %v3217_v32 = vrot.slane %v3111_v29, %v10931_v15  ;;  %v3401_v48 = vsel %vm3337_vm12, %v3305_v35, %v3369_v40  ;;  %v3221_v49 = vrot.slane %v3111_v29, %v10940_v18 }
 0x5cf   :  { %v3225_v50 = vrot.slane %v3111_v29, %v10934_v16  ;;  %v3298_v51 = vadd.f32 %v3213_v47, %v11188_v61  ;;  %v3454_v52 = vmul.f32 %v11233_v5, %v3400_v44  ;;  %v3455_v55 = vmul.f32 %v11236_v19, %v3401_v48 }
 0x5d0   :  { %v3491_v53 = vadd.f32 %v3453_v3, %v3452_v45  ;;  %v3299_v54 = vadd.f32 %v3217_v32, %v11186_v59  ;;  %v3300_v30 = vadd.f32 %v3221_v49, %v11196_v9  ;;  %vm11916_vm10 = vcmask 64512   ;;  %v9773_v49 = vld [vmem:[#allocation7 + $0xe4] ss:$16 sps:$4 sm:$0xff]  }
 0x5d1   :  { %v3301_v31 = vadd.f32 %v3225_v50, %v11194_v11  ;;  %vm3330_vm13 = vcmp.ge.f32.partialorder %v3298_v51, 0.0  ;;  %v3362_v33 = vmul.f32 0.2, %v3298_v51  ;;  %vm11917_vm9 = vmmov %vm11916_vm10  ;;  %v9776_v50 = vld [vmem:[#allocation7 + $0x2e4] ss:$16 sps:$4 sm:$0xff]   ;;  %4521 = vmatprep.subr.bf16.mxu0 %v9773_v49 }
 0x5d2   :  { %v3492_v8 = vadd.f32 %v3491_v53, %v3454_v52  ;;  %vm3331_vm14 = vcmp.ge.f32.partialorder %v3299_v54, 0.0  ;;  %v3363_v56 = vmul.f32 0.2, %v3299_v54  ;;  %vm3332_vm15 = vcmp.ge.f32.partialorder %v3300_v30, 0.0  ;;  %4562 = vmatprep.subr.bf16.mxu1 %v9776_v50  ;;  %v9771_v53 = vld [vmem:[#allocation7 + $0xe0] ss:$16 sps:$4 sm:$0xff]   ;;  %vm11918_vm11 = vmmov %vm11917_vm9 }
 0x5d3   :  { %vm3333_vm0 = vcmp.ge.f32.partialorder %v3301_v31, 0.0  ;;  %v3364_v57 = vmul.f32 0.2, %v3300_v30  ;;  %v3365_v61 = vmul.f32 0.2, %v3301_v31  ;;  %v3394_v58 = vsel %vm3330_vm13, %v3298_v51, %v3362_v33  ;;  %vm11919_vm12 = vmmov %vm11917_vm9 }
 0x5d4   :  { %v3493_v14 = vadd.f32 %v3492_v8, %v3455_v55  ;;  %v3395_v60 = vsel %vm3331_vm14, %v3299_v54, %v3363_v56  ;;  %v3448_v59 = vmul.f32 %v11221_v1, %v3394_v58  ;;  %v9774_v54 = vld [vmem:[#allocation7 + $0x2e0] ss:$16 sps:$4 sm:$0xff]   ;;  %v9782_v33 = vld [vmem:[#allocation7 + $0x2c4] ss:$16 sps:$4 sm:$0xff]  }
 0x5d5   :  { %v3396_v62 = vsel %vm3332_vm15, %v3300_v30, %v3364_v57  ;;  %v3449_v9 = vmul.f32 %v11224_v2, %v3395_v60  ;;  %v3397_v11 = vsel %vm3333_vm0, %v3301_v31, %v3365_v61  ;;  %v9779_v31 = vld [vmem:[#allocation7 + $0xc4] ss:$16 sps:$4 sm:$0xff]   ;;  %v9777_v55 = vld [vmem:[#allocation7 + $0xc0] ss:$16 sps:$4 sm:$0xff]  }
 0x5d6   :  { %3494 = vadd.xlane.f32.xlu1 %v3493_v14  ;;  %v3450_v6 = vmul.f32 %v11233_v5, %v3396_v62  ;;  %v3451_v20 = vmul.f32 %v11236_v19, %v3397_v11  ;;  %v9780_v8 = vld [vmem:[#allocation7 + $0x2c0] ss:$16 sps:$4 sm:$0xff]   ;;  %v9785_v56 = vld [vmem:[#allocation7 + $0xa4] ss:$16 sps:$4 sm:$0xff]  }
 0x5d7   :  { %v3486_v10 = vadd.f32 %v3449_v9, %v3448_v59  ;;  %v9788_v57 = vld [vmem:[#allocation7 + $0x2a4] ss:$16 sps:$4 sm:$0xff]   ;;  %v9783_v61 = vld [vmem:[#allocation7 + $0xa0] ss:$16 sps:$4 sm:$0xff]  }
 0x5d8   :  { %v9786_v14 = vld [vmem:[#allocation7 + $0x2a0] ss:$16 sps:$4 sm:$0xff]   ;;  %v9791_v58 = vld [vmem:[#allocation7 + $0x84] ss:$16 sps:$4 sm:$0xff]  }
 0x5d9   :  { %v3487_v0 = vadd.f32 %v3486_v10, %v3450_v6  ;;  %v9794_v60 = vld [vmem:[#allocation7 + $0x284] ss:$16 sps:$4 sm:$0xff]   ;;  %v9789_v62 = vld [vmem:[#allocation7 + $0x80] ss:$16 sps:$4 sm:$0xff]  }
 0x5da   :  { %v9792_v59 = vld [vmem:[#allocation7 + $0x280] ss:$16 sps:$4 sm:$0xff]   ;;  %v9797_v9 = vld [vmem:[#allocation7 + $0x64] ss:$16 sps:$4 sm:$0xff]  }
 0x5db   :  { %v3488_v63 = vadd.f32 %v3487_v0, %v3451_v20  ;;  %v9800_v11 = vld [vmem:[#allocation7 + $0x264] ss:$16 sps:$4 sm:$0xff]   ;;  %v9795_v6 = vld [vmem:[#allocation7 + $0x60] ss:$16 sps:$4 sm:$0xff]  }
 0x5dc   :  { %v9798_v10 = vld [vmem:[#allocation7 + $0x260] ss:$16 sps:$4 sm:$0xff]   ;;  %v9803_v20 = vld [vmem:[#allocation7 + $0x44] ss:$16 sps:$4 sm:$0xff]  }
 0x5dd   :  { %3489 = vadd.xlane.f32.xlu0 %v3488_v63  ;;  %v9806_v0 = vld [vmem:[#allocation7 + $0x244] ss:$16 sps:$4 sm:$0xff]   ;;  %v9801_v63 = vld [vmem:[#allocation7 + $0x40] ss:$16 sps:$4 sm:$0xff]  }
 0x5de   :  { %v9854_v49 = vld [vmem:[#allocation7 + $0x344] ss:$16 sps:$4 sm:$0xff]   ;;  %v9849_v50 = vld [vmem:[#allocation7 + $0x140] ss:$16 sps:$4 sm:$0xff]  }
 0x638   :  { %v3465_v12 = vpop.xlane.xlu1 %3464 }
 0x639   :  { %v3511_v23 = vrot.slane %v3465_v12, %v11117_v7  ;;  %v9809_v12 = vld [vmem:[#allocation7 + $0x24] ss:$16 sps:$4 sm:$0xff]  }
 0x63c   :  { %v3460_v4 = vpop.xlane.xlu0 %3459 }
 0x63d   :  { %v3507_v1 = vrot.slane %v3460_v4, %v11117_v7  ;;  %v9804_v4 = vld [vmem:[#allocation7 + $0x240] ss:$16 sps:$4 sm:$0xff]  }
 0x63f   :  { %v3536_v5 = vsel %vm931_vm1, %v3511_v23, %v3507_v1  ;;  %v9815_v23 = vld [vmem:[#allocation7 + $0x4] ss:$16 sps:$4 sm:$0xff]  }
 0x640   :  { %v9818_v1 = vld [vmem:[#allocation7 + $0x204] ss:$16 sps:$4 sm:$0xff]  }
 0x642   :  { %v3485_v21 = vpop.xlane.xlu1 %3484 }
 0x643   :  { %v3527_v35 = vrot.slane %v3485_v21, %v11117_v7  ;;  %v9807_v21 = vld [vmem:[#allocation7 + $0x20] ss:$16 sps:$4 sm:$0xff]  }
 0x64a   :  { %v3480_v13 = vpop.xlane.xlu0 %3479 }
 0x64b   :  { %v3523_v28 = vrot.slane %v3480_v13, %v11117_v7  ;;  %v9812_v13 = vld [vmem:[#allocation7 + $0x224] ss:$16 sps:$4 sm:$0xff]  }
 0x651   :  { %v3475_v2 = vpop.xlane.xlu1 %3474 }
 0x652   :  { %v3519_v26 = vrot.slane %v3475_v2, %v11117_v7  ;;  %v9813_v2 = vld [vmem:[#allocation7] ss:$16 sps:$4 sm:$0xff]  }
 0x657   :  { %v3470_v22 = vpop.xlane.xlu0 %3469 }
 0x658   :  { %v3515_v24 = vrot.slane %v3470_v22, %v11117_v7  ;;  %v9810_v22 = vld [vmem:[#allocation7 + $0x220] ss:$16 sps:$4 sm:$0xff]  }
 0x65a   :  { %v3537_v19 = vsel %vm933_vm2, %v3515_v24, %v3536_v5  ;;  %v9816_v24 = vld [vmem:[#allocation7 + $0x200] ss:$16 sps:$4 sm:$0xff]   ;;  %v9821_v5 = vld [vmem:[#allocation7 + $0x1e4] ss:$16 sps:$4 sm:$0xff]  }
 0x65b   :  { %v3538_v27 = vsel %vm935_vm3, %v3519_v26, %v3537_v19  ;;  %v9824_v26 = vld [vmem:[#allocation7 + $0x3e4] ss:$16 sps:$4 sm:$0xff]   ;;  %v9819_v19 = vld [vmem:[#allocation7 + $0x1e0] ss:$16 sps:$4 sm:$0xff]  }
 0x65c   :  { %v3539_v34 = vsel %vm937_vm4, %v3523_v28, %v3538_v27  ;;  %v9822_v27 = vld [vmem:[#allocation7 + $0x3e0] ss:$16 sps:$4 sm:$0xff]   ;;  %v9827_v28 = vld [vmem:[#allocation7 + $0x1c4] ss:$16 sps:$4 sm:$0xff]  }
 0x65d   :  { %v3540_v38 = vsel %vm939_vm5, %v3527_v35, %v3539_v34  ;;  %v9825_v34 = vld [vmem:[#allocation7 + $0x1c0] ss:$16 sps:$4 sm:$0xff]  }
 0x65e   :  { %v9828_v35 = vld [vmem:[#allocation7 + $0x3c0] ss:$16 sps:$4 sm:$0xff]  }
 0x65f   :  { %v3495_v29 = vpop.xlane.xlu1 %3494 }
 0x660   :  { %v3535_v36 = vrot.slane %v3495_v29, %v11117_v7  ;;  %v9830_v29 = vld [vmem:[#allocation7 + $0x3c4] ss:$16 sps:$4 sm:$0xff]  }
 0x666   :  { %v3490_v37 = vpop.xlane.xlu0 %3489 }
 0x667   :  { %v3531_v39 = vrot.slane %v3490_v37, %v11117_v7  ;;  %v9836_v37 = vld [vmem:[#allocation7 + $0x3a4] ss:$16 sps:$4 sm:$0xff]  }
 0x669   :  { %v3541_v40 = vsel %vm941_vm6, %v3531_v39, %v3540_v38  ;;  %v9831_v38 = vld [vmem:[#allocation7 + $0x1a0] ss:$16 sps:$4 sm:$0xff]  }
 0x66a   :  { %v3542_v41 = vsel %vm943_vm7, %v3535_v36, %v3541_v40  ;;  %v9833_v36 = vld [vmem:[#allocation7 + $0x1a4] ss:$16 sps:$4 sm:$0xff]   ;;  %v9834_v39 = vld [vmem:[#allocation7 + $0x3a0] ss:$16 sps:$4 sm:$0xff]  }
 0x66b   :  { %v3544_v42 = vsel %vm888_vm8, %v3542_v41, -1e+30  ;;  %v9839_v40 = vld [vmem:[#allocation7 + $0x184] ss:$16 sps:$4 sm:$0xff]  }
 0x66c   :  { %v3545_v44 = vsel %vm11916_vm10, %v3544_v42, -inf  ;;  %v9842_v41 = vld [vmem:[#allocation7 + $0x384] ss:$16 sps:$4 sm:$0xff]  }
 0x66d   :  { %3546 = vmax.xlane.f32.xlu0 %v3545_v44  ;;  %v9840_v44 = vld [vmem:[#allocation7 + $0x380] ss:$16 sps:$4 sm:$0xff]  }
 0x6f6   :  { %v3547_v45 = vpop.xlane.xlu0 %3546 }
 0x6f7   :  { %v3548_v47 = vsub.f32 %v3544_v42, %v3547_v45  ;;  %v9837_v42 = vld [vmem:[#allocation7 + $0x180] ss:$16 sps:$4 sm:$0xff]   ;;  %v9845_v45 = vld [vmem:[#allocation7 + $0x164] ss:$16 sps:$4 sm:$0xff]  }
 0x6f9   :  { %v3549_v3 = vmul.f32 1.442695, %v3548_v47  ;;  %v9848_v47 = vld [vmem:[#allocation7 + $0x364] ss:$16 sps:$4 sm:$0xff]  }
 0x6fb   :  { %10551 = vpow2.f32 %v3549_v3  ;;  %v9843_v3 = vld [vmem:[#allocation7 + $0x160] ss:$16 sps:$4 sm:$0xff]  }
 0x708   :  { %v10552_v32 = vpop.eup %10551 }
 0x709   :  { %v3551_v48 = vsel %vm11917_vm9, %v10552_v32, 0.0 }
 0x70a   :  { %3552 = vadd.xlane.f32.xlu1 %v3551_v48  ;;  %v9851_v48 = vld [vmem:[#allocation7 + $0x144] ss:$16 sps:$4 sm:$0xff]  }
 0x793   :  { %v3553_v51 = vpop.xlane.xlu1 %3552 }
 0x794   :  { %10553 = vrcp.f32 %v3553_v51  ;;  %v9852_v51 = vld [vmem:[#allocation7 + $0x340] ss:$16 sps:$4 sm:$0xff]  }
 0x7a1   :  { %v10554_v52 = vpop.eup %10553 }
 0x7a2   :  { %v3555_v30 = vmul.f32 %v10554_v52, %v10552_v32  ;;  %v9846_v32 = vld [vmem:[#allocation7 + $0x360] ss:$16 sps:$4 sm:$0xff]   ;;  %v9857_v52 = vld [vmem:[#allocation7 + $0x124] ss:$16 sps:$4 sm:$0xff]  }
 0x7a4   :  { %8777 = vmatmul.mubr.msk.f32.vlgmr.msra.gmra.mxu0 %vm11918_vm11, %v3555_v30  ;;  %8778 = vmatmul.mubr.msk.f32.vlgmr.msra.gmra.mxu1 %vm11919_vm12, %v3555_v30  ;;  %v9860_v30 = vld [vmem:[#allocation7 + $0x324] ss:$16 sps:$4 sm:$0xff]  }
 0x7a5   :  { %4522 = vmatpush1.bf16.msra.mxu0 %v9771_v53  ;;  %4563 = vmatpush1.bf16.msra.mxu1 %v9774_v54  ;;  %v9855_v53 = vld [vmem:[#allocation7 + $0x120] ss:$16 sps:$4 sm:$0xff]  }
 0x7a6   :  { %4523 = vmatprep.subr.bf16.mxu0 %v9779_v31  ;;  %4564 = vmatprep.subr.bf16.mxu1 %v9782_v33  ;;  %v9858_v54 = vld [vmem:[#allocation7 + $0x320] ss:$16 sps:$4 sm:$0xff]   ;;  %v9863_v31 = vld [vmem:[#allocation7 + $0x104] ss:$16 sps:$4 sm:$0xff]  }
 0x7a7   :  { %v9866_v33 = vld [vmem:[#allocation7 + $0x304] ss:$16 sps:$4 sm:$0xff]  }
 0x7a9   :  { %4524 = vmatpush1.bf16.msra.mxu0 %v9777_v55  ;;  %4565 = vmatpush1.bf16.msra.mxu1 %v9780_v8  ;;  %v9861_v55 = vld [vmem:[#allocation7 + $0x100] ss:$16 sps:$4 sm:$0xff]  }
 0x7aa   :  { %4525 = vmatprep.subr.bf16.mxu0 %v9785_v56  ;;  %4566 = vmatprep.subr.bf16.mxu1 %v9788_v57  ;;  %v9864_v8 = vld [vmem:[#allocation7 + $0x300] ss:$16 sps:$4 sm:$0xff]   ;;  %v9869_v56 = vld [vmem:[#allocation7 + $0xec] ss:$16 sps:$4 sm:$0xff]  }
 0x7ab   :  { %v9872_v57 = vld [vmem:[#allocation7 + $0x2ec] ss:$16 sps:$4 sm:$0xff]  }
 0x7ad   :  { %4526 = vmatpush1.bf16.msra.mxu0 %v9783_v61  ;;  %4567 = vmatpush1.bf16.msra.mxu1 %v9786_v14  ;;  %v3556_v61 = vld [vmem:[%s11876_s14] sm:$0xf]  ;;  %s11924_s14 = sld [smem:[#allocation19_spill]] }
 0x7ae   :  { %4527 = vmatprep.subr.bf16.mxu0 %v9791_v58  ;;  %4568 = vmatprep.subr.bf16.mxu1 %v9794_v60  ;;  %v3561_v14 = vrot.slane %v3556_v61, %v10937_v17  ;;  %v3569_v58 = vrot.slane %v3556_v61, %v10940_v18  ;;  %v3565_v60 = vrot.slane %v3556_v61, %v10931_v15 }
 0x7b1   :  { %4528 = vmatpush1.bf16.msra.mxu0 %v9789_v62  ;;  %4569 = vmatpush1.bf16.msra.mxu1 %v9792_v59  ;;  %v3573_v62 = vrot.slane %v3556_v61, %v10934_v16  ;;  %v9926_v61 = vld [vmem:[#allocation7 + $0x3cc] ss:$16 sps:$4 sm:$0xff]  }
 0x7b2   :  { %4529 = vmatprep.subr.bf16.mxu0 %v9797_v9  ;;  %4570 = vmatprep.subr.bf16.mxu1 %v9800_v11 }
 0x7b5   :  { %4530 = vmatpush1.bf16.msra.mxu0 %v9795_v6  ;;  %4571 = vmatpush1.bf16.msra.mxu1 %v9798_v10 }
 0x7b6   :  { %4531 = vmatprep.subr.bf16.mxu0 %v9803_v20  ;;  %4572 = vmatprep.subr.bf16.mxu1 %v9806_v0 }
 0x7b9   :  { %4532 = vmatpush1.bf16.msra.mxu0 %v9801_v63  ;;  %4573 = vmatpush1.bf16.msra.mxu1 %v9804_v4 }
 0x7ba   :  { %4533 = vmatprep.subr.bf16.mxu0 %v9809_v12  ;;  %4574 = vmatprep.subr.bf16.mxu1 %v9812_v13 }
 0x7bd   :  { %4534 = vmatpush1.bf16.msra.mxu0 %v9807_v21  ;;  %4575 = vmatpush1.bf16.msra.mxu1 %v9810_v22 }
 0x7be   :  { %4535 = vmatprep.subr.bf16.mxu0 %v9815_v23  ;;  %4576 = vmatprep.subr.bf16.mxu1 %v9818_v1  ;;  %v9867_v23 = vld [vmem:[#allocation7 + $0xe8] ss:$16 sps:$4 sm:$0xff]  }
 0x7c1   :  { %4536 = vmatpush1.bf16.msra.mxu0 %v9813_v2  ;;  %4577 = vmatpush1.bf16.msra.mxu1 %v9816_v24  ;;  %v9870_v24 = vld [vmem:[#allocation7 + $0x2e8] ss:$16 sps:$4 sm:$0xff]  }
 0x7c2   :  { %4537 = vmatprep.subr.bf16.mxu0 %v9821_v5  ;;  %4578 = vmatprep.subr.bf16.mxu1 %v9824_v26  ;;  %v9875_v26 = vld [vmem:[#allocation7 + $0xcc] ss:$16 sps:$4 sm:$0xff]  }
 0x7c5   :  { %4538 = vmatpush2.bf16.msra.mxu0 %v9819_v19  ;;  %4579 = vmatpush2.bf16.msra.mxu1 %v9822_v27  ;;  %v9878_v19 = vld [vmem:[#allocation7 + $0x2cc] ss:$16 sps:$4 sm:$0xff]   ;;  %v9873_v27 = vld [vmem:[#allocation7 + $0xc8] ss:$16 sps:$4 sm:$0xff]  }
 0x7c6   :  { %4539 = vmatprep.subr.bf16.mxu0 %v9827_v28  ;;  %4580 = vmatprep.subr.bf16.mxu1 %v9830_v29  ;;  %v9876_v28 = vld [vmem:[#allocation7 + $0x2c8] ss:$16 sps:$4 sm:$0xff]   ;;  %v9881_v29 = vld [vmem:[#allocation7 + $0xac] ss:$16 sps:$4 sm:$0xff]  }
 0x7c9   :  { %4540 = vmatpush2.bf16.msra.mxu0 %v9825_v34  ;;  %4581 = vmatpush2.bf16.msra.mxu1 %v9828_v35  ;;  %v9884_v34 = vld [vmem:[#allocation7 + $0x2ac] ss:$16 sps:$4 sm:$0xff]   ;;  %v9879_v35 = vld [vmem:[#allocation7 + $0xa8] ss:$16 sps:$4 sm:$0xff]  }
 0x7ca   :  { %4541 = vmatprep.subr.bf16.mxu0 %v9833_v36  ;;  %4582 = vmatprep.subr.bf16.mxu1 %v9836_v37  ;;  %v9882_v36 = vld [vmem:[#allocation7 + $0x2a8] ss:$16 sps:$4 sm:$0xff]   ;;  %v9887_v37 = vld [vmem:[#allocation7 + $0x8c] ss:$16 sps:$4 sm:$0xff]  }
 0x7cd   :  { %4542 = vmatpush2.bf16.msra.mxu0 %v9831_v38  ;;  %4583 = vmatpush2.bf16.msra.mxu1 %v9834_v39  ;;  %v9890_v38 = vld [vmem:[#allocation7 + $0x28c] ss:$16 sps:$4 sm:$0xff]   ;;  %v9885_v39 = vld [vmem:[#allocation7 + $0x88] ss:$16 sps:$4 sm:$0xff]  }
 0x7ce   :  { %4543 = vmatprep.subr.bf16.mxu0 %v9839_v40  ;;  %4584 = vmatprep.subr.bf16.mxu1 %v9842_v41  ;;  %v9888_v40 = vld [vmem:[#allocation7 + $0x288] ss:$16 sps:$4 sm:$0xff]   ;;  %v9893_v41 = vld [vmem:[#allocation7 + $0x6c] ss:$16 sps:$4 sm:$0xff]  }
 0x7d1   :  { %4544 = vmatpush2.bf16.msra.mxu0 %v9837_v42  ;;  %4585 = vmatpush2.bf16.msra.mxu1 %v9840_v44  ;;  %v9896_v42 = vld [vmem:[#allocation7 + $0x26c] ss:$16 sps:$4 sm:$0xff]   ;;  %v9891_v44 = vld [vmem:[#allocation7 + $0x68] ss:$16 sps:$4 sm:$0xff]  }
 0x7d2   :  { %4545 = vmatprep.subr.bf16.mxu0 %v9845_v45  ;;  %4586 = vmatprep.subr.bf16.mxu1 %v9848_v47  ;;  %v9894_v45 = vld [vmem:[#allocation7 + $0x268] ss:$16 sps:$4 sm:$0xff]   ;;  %v9899_v47 = vld [vmem:[#allocation7 + $0x4c] ss:$16 sps:$4 sm:$0xff]  }
 0x7d5   :  { %4546 = vmatpush2.bf16.msra.mxu0 %v9843_v3  ;;  %4587 = vmatpush2.bf16.msra.mxu1 %v9846_v32  ;;  %v9902_v3 = vld [vmem:[#allocation7 + $0x24c] ss:$16 sps:$4 sm:$0xff]   ;;  %v9897_v32 = vld [vmem:[#allocation7 + $0x48] ss:$16 sps:$4 sm:$0xff]  }
 0x7d6   :  { %4547 = vmatprep.subr.bf16.mxu0 %v9851_v48  ;;  %4588 = vmatprep.subr.bf16.mxu1 %v9854_v49  ;;  %v9900_v48 = vld [vmem:[#allocation7 + $0x248] ss:$16 sps:$4 sm:$0xff]   ;;  %v9905_v49 = vld [vmem:[#allocation7 + $0x2c] ss:$16 sps:$4 sm:$0xff]  }
 0x7d9   :  { %4548 = vmatpush2.bf16.msra.mxu0 %v9849_v50  ;;  %4589 = vmatpush2.bf16.msra.mxu1 %v9852_v51  ;;  %v9908_v50 = vld [vmem:[#allocation7 + $0x22c] ss:$16 sps:$4 sm:$0xff]   ;;  %v9903_v51 = vld [vmem:[#allocation7 + $0x28] ss:$16 sps:$4 sm:$0xff]  }
 0x7da   :  { %4549 = vmatprep.subr.bf16.mxu0 %v9857_v52  ;;  %4590 = vmatprep.subr.bf16.mxu1 %v9860_v30  ;;  %v9906_v52 = vld [vmem:[#allocation7 + $0x228] ss:$16 sps:$4 sm:$0xff]  }
 0x7db   :  { %v9909_v30 = vld [vmem:[#allocation7 + $0x8] ss:$16 sps:$4 sm:$0xff]  }
 0x7dd   :  { %4550 = vmatpush2.bf16.msra.mxu0 %v9855_v53  ;;  %4591 = vmatpush2.bf16.msra.mxu1 %v9858_v54  ;;  %v9911_v53 = vld [vmem:[#allocation7 + $0xc] ss:$16 sps:$4 sm:$0xff]  }
 0x7de   :  { %4551 = vmatprep.subr.bf16.mxu0 %v9863_v31  ;;  %4592 = vmatprep.subr.bf16.mxu1 %v9866_v33  ;;  %v9914_v54 = vld [vmem:[#allocation7 + $0x20c] ss:$16 sps:$4 sm:$0xff]   ;;  %v9912_v31 = vld [vmem:[#allocation7 + $0x208] ss:$16 sps:$4 sm:$0xff]  }
 0x7df   :  { %v9917_v33 = vld [vmem:[#allocation7 + $0x1ec] ss:$16 sps:$4 sm:$0xff]  }
 0x7e1   :  { %4552 = vmatpush2.bf16.msra.mxu0 %v9861_v55  ;;  %4593 = vmatpush2.bf16.msra.mxu1 %v9864_v8  ;;  %v9920_v55 = vld [vmem:[#allocation7 + $0x3ec] ss:$16 sps:$4 sm:$0xff]   ;;  %v9915_v8 = vld [vmem:[#allocation7 + $0x1e8] ss:$16 sps:$4 sm:$0xff]  }
 0x7e2   :  { %4603 = vmatprep.subr.bf16.mxu0 %v9869_v56  ;;  %4644 = vmatprep.subr.bf16.mxu1 %v9872_v57  ;;  %v9918_v56 = vld [vmem:[#allocation7 + $0x3e8] ss:$16 sps:$4 sm:$0xff]   ;;  %v9923_v57 = vld [vmem:[#allocation7 + $0x1cc] ss:$16 sps:$4 sm:$0xff]  }
 0x864   :  { %v3647_v59 = vpop.f32.mrf.mxu0  ;;  %v3718_v9 = vpop.f32.mrf.mxu1 }
 0x865   :  { %v3648_v11 = vadd.f32 %v3647_v59, %v3561_v14  ;;  %v3719_v6 = vadd.f32 %v3718_v9, %v3569_v58  ;;  %v9921_v14 = vld [vmem:[#allocation7 + $0x1c8] ss:$16 sps:$4 sm:$0xff]  }
 0x866   :  { %v3649_v10 = vpop.f32.mrf.mxu0  ;;  %v3720_v20 = vpop.f32.mrf.mxu1  ;;  %v9924_v58 = vld [vmem:[#allocation7 + $0x3c8] ss:$16 sps:$4 sm:$0xff]  }
 0x867   :  { %10555 = vtanh.f32 %v3648_v11  ;;  %v3650_v0 = vadd.f32 %v3649_v10, %v3565_v60  ;;  %v3721_v63 = vadd.f32 %v3720_v20, %v3573_v62  ;;  %v9929_v60 = vld [vmem:[#allocation7 + $0x1ac] ss:$16 sps:$4 sm:$0xff]   ;;  %v9927_v59 = vld [vmem:[#allocation7 + $0x1a8] ss:$16 sps:$4 sm:$0xff]  }
 0x868   :  { %10557 = vtanh.f32 %v3719_v6  ;;  %v9932_v62 = vld [vmem:[#allocation7 + $0x3ac] ss:$16 sps:$4 sm:$0xff]   ;;  %v9930_v9 = vld [vmem:[#allocation7 + $0x3a8] ss:$16 sps:$4 sm:$0xff]  }
 0x869   :  { %10559 = vtanh.f32 %v3650_v0  ;;  %v9935_v11 = vld [vmem:[#allocation7 + $0x18c] ss:$16 sps:$4 sm:$0xff]   ;;  %v9933_v10 = vld [vmem:[#allocation7 + $0x188] ss:$16 sps:$4 sm:$0xff]  }
 0x86a   :  { %10561 = vtanh.f32 %v3721_v63  ;;  %v9938_v6 = vld [vmem:[#allocation7 + $0x38c] ss:$16 sps:$4 sm:$0xff]   ;;  %v9936_v20 = vld [vmem:[#allocation7 + $0x388] ss:$16 sps:$4 sm:$0xff]  }
 0x86b   :  { %v9941_v0 = vld [vmem:[#allocation7 + $0x16c] ss:$16 sps:$4 sm:$0xff]  }
 0x86c   :  { %v9944_v63 = vld [vmem:[#allocation7 + $0x36c] ss:$16 sps:$4 sm:$0xff]  }
 0x874   :  { %v10556_v4 = vpop.eup %10555 }
 0x875   :  { %v10558_v12 = vpop.eup %10557  ;;  %v11392_v1 = vpack.c.bf16 %v10556_v4, %v10556_v4  ;;  %v9939_v4 = vld [vmem:[#allocation7 + $0x168] ss:$16 sps:$4 sm:$0xff]  }
 0x876   :  { %v10560_v13 = vpop.eup %10559  ;;  %v11396_v5 = vpack.c.bf16 %v10558_v12, %v10558_v12  ;;  %v9942_v12 = vld [vmem:[#allocation7 + $0x368] ss:$16 sps:$4 sm:$0xff]  }
 0x877   :  { %v10562_v21 = vpop.eup %10561  ;;  %v11390_v22 = vpack.c.bf16 %v10560_v13, %v10560_v13  ;;  %v9947_v13 = vld [vmem:[#allocation7 + $0x14c] ss:$16 sps:$4 sm:$0xff]  }
 0x878   :  { %v11394_v2 = vpack.c.bf16 %v10562_v21, %v10562_v21  ;;  %v9950_v21 = vld [vmem:[#allocation7 + $0x34c] ss:$16 sps:$4 sm:$0xff]  }
 0x879   :  { %4553 = vmatprep.mubr.bf16.mxu0 %v11390_v22 }
 0x87a   :  { %4594 = vmatprep.mubr.bf16.mxu1 %v11394_v2  ;;  %4554 = vmatmul.mubr.bf16.vlgmr.msra.gmra.mxu0 %v11392_v1 }
 0x87b   :  { %4595 = vmatmul.mubr.bf16.vlgmr.msra.gmra.mxu1 %v11396_v5  ;;  %4604 = vmatpush1.bf16.msra.mxu0 %v9867_v23  ;;  %v9945_v23 = vld [vmem:[#allocation7 + $0x148] ss:$16 sps:$4 sm:$0xff]  }
 0x87c   :  { %4645 = vmatpush1.bf16.msra.mxu1 %v9870_v24  ;;  %4635 = vmatprep.mubr.bf16.mxu0 %v11390_v22  ;;  %v9948_v24 = vld [vmem:[#allocation7 + $0x348] ss:$16 sps:$4 sm:$0xff]  }
 0x87d   :  { %4676 = vmatprep.mubr.bf16.mxu1 %v11394_v2  ;;  %4605 = vmatprep.subr.bf16.mxu0 %v9875_v26  ;;  %v9953_v26 = vld [vmem:[#allocation7 + $0x12c] ss:$16 sps:$4 sm:$0xff]  }
 0x87e   :  { %4646 = vmatprep.subr.bf16.mxu1 %v9878_v19  ;;  %v9956_v19 = vld [vmem:[#allocation7 + $0x32c] ss:$16 sps:$4 sm:$0xff]  }
 0x87f   :  { %4606 = vmatpush1.bf16.msra.mxu0 %v9873_v27  ;;  %v9951_v27 = vld [vmem:[#allocation7 + $0x128] ss:$16 sps:$4 sm:$0xff]  }
 0x880   :  { %4647 = vmatpush1.bf16.msra.mxu1 %v9876_v28  ;;  %4607 = vmatprep.subr.bf16.mxu0 %v9881_v29  ;;  %v9954_v28 = vld [vmem:[#allocation7 + $0x328] ss:$16 sps:$4 sm:$0xff]   ;;  %v9959_v29 = vld [vmem:[#allocation7 + $0x10c] ss:$16 sps:$4 sm:$0xff]  }
 0x881   :  { %4648 = vmatprep.subr.bf16.mxu1 %v9884_v34  ;;  %v9962_v34 = vld [vmem:[#allocation7 + $0x30c] ss:$16 sps:$4 sm:$0xff]  }
 0x883   :  { %4608 = vmatpush1.bf16.msra.mxu0 %v9879_v35  ;;  %v9957_v35 = vld [vmem:[#allocation7 + $0x108] ss:$16 sps:$4 sm:$0xff]  }
 0x884   :  { %4649 = vmatpush1.bf16.msra.mxu1 %v9882_v36  ;;  %4609 = vmatprep.subr.bf16.mxu0 %v9887_v37  ;;  %v9960_v36 = vld [vmem:[#allocation7 + $0x308] ss:$16 sps:$4 sm:$0xff]   ;;  %v9965_v37 = vld [vmem:[#allocation8 + $0xe4] ss:$16 sps:$4 sm:$0xff]  }
 0x885   :  { %4650 = vmatprep.subr.bf16.mxu1 %v9890_v38  ;;  %v9968_v38 = vld [vmem:[#allocation8 + $0x2e4] ss:$16 sps:$4 sm:$0xff]  }
 0x887   :  { %4610 = vmatpush1.bf16.msra.mxu0 %v9885_v39  ;;  %v9963_v39 = vld [vmem:[#allocation8 + $0xe0] ss:$16 sps:$4 sm:$0xff]  }
 0x888   :  { %4651 = vmatpush1.bf16.msra.mxu1 %v9888_v40  ;;  %4611 = vmatprep.subr.bf16.mxu0 %v9893_v41  ;;  %v9966_v40 = vld [vmem:[#allocation8 + $0x2e0] ss:$16 sps:$4 sm:$0xff]   ;;  %v9971_v41 = vld [vmem:[#allocation8 + $0xc4] ss:$16 sps:$4 sm:$0xff]  }
 0x889   :  { %4652 = vmatprep.subr.bf16.mxu1 %v9896_v42  ;;  %v9974_v42 = vld [vmem:[#allocation8 + $0x2c4] ss:$16 sps:$4 sm:$0xff]  }
 0x88b   :  { %4612 = vmatpush1.bf16.msra.mxu0 %v9891_v44  ;;  %v9969_v44 = vld [vmem:[#allocation8 + $0xc0] ss:$16 sps:$4 sm:$0xff]  }
 0x88c   :  { %4653 = vmatpush1.bf16.msra.mxu1 %v9894_v45  ;;  %4613 = vmatprep.subr.bf16.mxu0 %v9899_v47  ;;  %v9972_v45 = vld [vmem:[#allocation8 + $0x2c0] ss:$16 sps:$4 sm:$0xff]   ;;  %v9977_v47 = vld [vmem:[#allocation8 + $0xa4] ss:$16 sps:$4 sm:$0xff]  }
 0x88d   :  { %4654 = vmatprep.subr.bf16.mxu1 %v9902_v3  ;;  %v9980_v3 = vld [vmem:[#allocation8 + $0x2a4] ss:$16 sps:$4 sm:$0xff]  }
 0x88f   :  { %4614 = vmatpush1.bf16.msra.mxu0 %v9897_v32  ;;  %v9975_v32 = vld [vmem:[#allocation8 + $0xa0] ss:$16 sps:$4 sm:$0xff]  }
 0x890   :  { %4655 = vmatpush1.bf16.msra.mxu1 %v9900_v48  ;;  %4615 = vmatprep.subr.bf16.mxu0 %v9905_v49  ;;  %v9978_v48 = vld [vmem:[#allocation8 + $0x2a0] ss:$16 sps:$4 sm:$0xff]   ;;  %v9983_v49 = vld [vmem:[#allocation8 + $0x84] ss:$16 sps:$4 sm:$0xff]  }
 0x891   :  { %4656 = vmatprep.subr.bf16.mxu1 %v9908_v50  ;;  %v9986_v50 = vld [vmem:[#allocation8 + $0x284] ss:$16 sps:$4 sm:$0xff]  }
 0x893   :  { %4616 = vmatpush1.bf16.msra.mxu0 %v9903_v51  ;;  %v9981_v51 = vld [vmem:[#allocation8 + $0x80] ss:$16 sps:$4 sm:$0xff]  }
 0x894   :  { %4657 = vmatpush1.bf16.msra.mxu1 %v9906_v52  ;;  %4617 = vmatprep.subr.bf16.mxu0 %v9911_v53  ;;  %v9984_v52 = vld [vmem:[#allocation8 + $0x280] ss:$16 sps:$4 sm:$0xff]   ;;  %v9989_v53 = vld [vmem:[#allocation8 + $0x64] ss:$16 sps:$4 sm:$0xff]  }
 0x895   :  { %4658 = vmatprep.subr.bf16.mxu1 %v9914_v54  ;;  %v9992_v54 = vld [vmem:[#allocation8 + $0x264] ss:$16 sps:$4 sm:$0xff]  }
 0x897   :  { %4618 = vmatpush1.bf16.msra.mxu0 %v9909_v30  ;;  %v9987_v30 = vld [vmem:[#allocation8 + $0x60] ss:$16 sps:$4 sm:$0xff]  }
 0x898   :  { %4659 = vmatpush1.bf16.msra.mxu1 %v9912_v31  ;;  %4619 = vmatprep.subr.bf16.mxu0 %v9917_v33  ;;  %v9990_v31 = vld [vmem:[#allocation8 + $0x260] ss:$16 sps:$4 sm:$0xff]   ;;  %v9995_v33 = vld [vmem:[#allocation8 + $0x44] ss:$16 sps:$4 sm:$0xff]  }
 0x899   :  { %4660 = vmatprep.subr.bf16.mxu1 %v9920_v55  ;;  %v9998_v55 = vld [vmem:[#allocation8 + $0x244] ss:$16 sps:$4 sm:$0xff]  }
 0x89b   :  { %4620 = vmatpush2.bf16.msra.mxu0 %v9915_v8  ;;  %v9993_v8 = vld [vmem:[#allocation8 + $0x40] ss:$16 sps:$4 sm:$0xff]  }
 0x89c   :  { %4661 = vmatpush2.bf16.msra.mxu1 %v9918_v56  ;;  %4621 = vmatprep.subr.bf16.mxu0 %v9923_v57  ;;  %v9996_v56 = vld [vmem:[#allocation8 + $0x240] ss:$16 sps:$4 sm:$0xff]   ;;  %v10001_v57 = vld [vmem:[#allocation8 + $0x24] ss:$16 sps:$4 sm:$0xff]  }
 0x89d   :  { %4662 = vmatprep.subr.bf16.mxu1 %v9926_v61  ;;  %v10004_v61 = vld [vmem:[#allocation8 + $0x224] ss:$16 sps:$4 sm:$0xff]  }
 0x89f   :  { %4622 = vmatpush2.bf16.msra.mxu0 %v9921_v14  ;;  %v9999_v14 = vld [vmem:[#allocation8 + $0x20] ss:$16 sps:$4 sm:$0xff]  }
 0x8a0   :  { %4663 = vmatpush2.bf16.msra.mxu1 %v9924_v58  ;;  %4623 = vmatprep.subr.bf16.mxu0 %v9929_v60  ;;  %v10002_v58 = vld [vmem:[#allocation8 + $0x220] ss:$16 sps:$4 sm:$0xff]   ;;  %v10007_v60 = vld [vmem:[#allocation8 + $0x4] ss:$16 sps:$4 sm:$0xff]  }
 0x8a1   :  { %4664 = vmatprep.subr.bf16.mxu1 %v9932_v62  ;;  %v10010_v62 = vld [vmem:[#allocation8 + $0x204] ss:$16 sps:$4 sm:$0xff]  }
 0x8a3   :  { %4624 = vmatpush2.bf16.msra.mxu0 %v9927_v59  ;;  %v10005_v59 = vld [vmem:[#allocation8] ss:$16 sps:$4 sm:$0xff]  }
 0x8a4   :  { %4665 = vmatpush2.bf16.msra.mxu1 %v9930_v9  ;;  %4625 = vmatprep.subr.bf16.mxu0 %v9935_v11  ;;  %v10008_v9 = vld [vmem:[#allocation8 + $0x200] ss:$16 sps:$4 sm:$0xff]   ;;  %v10013_v11 = vld [vmem:[#allocation8 + $0x1e4] ss:$16 sps:$4 sm:$0xff]  }
 0x8a5   :  { %4666 = vmatprep.subr.bf16.mxu1 %v9938_v6  ;;  %v10016_v6 = vld [vmem:[#allocation8 + $0x3e4] ss:$16 sps:$4 sm:$0xff]  }
 0x8a7   :  { %4626 = vmatpush2.bf16.msra.mxu0 %v9933_v10  ;;  %v10011_v10 = vld [vmem:[#allocation8 + $0x1e0] ss:$16 sps:$4 sm:$0xff]  }
 0x8a8   :  { %4667 = vmatpush2.bf16.msra.mxu1 %v9936_v20  ;;  %4627 = vmatprep.subr.bf16.mxu0 %v9941_v0  ;;  %v10014_v20 = vld [vmem:[#allocation8 + $0x3e0] ss:$16 sps:$4 sm:$0xff]   ;;  %v10019_v0 = vld [vmem:[#allocation8 + $0x1c4] ss:$16 sps:$4 sm:$0xff]  }
 0x8a9   :  { %4668 = vmatprep.subr.bf16.mxu1 %v9944_v63  ;;  %v10022_v63 = vld [vmem:[#allocation8 + $0x3c4] ss:$16 sps:$4 sm:$0xff]  }
 0x8ab   :  { %4628 = vmatpush2.bf16.msra.mxu0 %v9939_v4  ;;  %v10017_v4 = vld [vmem:[#allocation8 + $0x1c0] ss:$16 sps:$4 sm:$0xff]  }
 0x8ac   :  { %4669 = vmatpush2.bf16.msra.mxu1 %v9942_v12  ;;  %4629 = vmatprep.subr.bf16.mxu0 %v9947_v13  ;;  %v10020_v12 = vld [vmem:[#allocation8 + $0x3c0] ss:$16 sps:$4 sm:$0xff]   ;;  %v10025_v13 = vld [vmem:[#allocation8 + $0x1a4] ss:$16 sps:$4 sm:$0xff]  }
 0x8ad   :  { %4670 = vmatprep.subr.bf16.mxu1 %v9950_v21  ;;  %v10028_v21 = vld [vmem:[#allocation8 + $0x3a4] ss:$16 sps:$4 sm:$0xff]  }
 0x8af   :  { %4630 = vmatpush2.bf16.msra.mxu0 %v9945_v23  ;;  %v10023_v23 = vld [vmem:[#allocation8 + $0x1a0] ss:$16 sps:$4 sm:$0xff]  }
 0x8b0   :  { %4671 = vmatpush2.bf16.msra.mxu1 %v9948_v24  ;;  %4631 = vmatprep.subr.bf16.mxu0 %v9953_v26  ;;  %v10026_v24 = vld [vmem:[#allocation8 + $0x3a0] ss:$16 sps:$4 sm:$0xff]   ;;  %v10031_v26 = vld [vmem:[#allocation8 + $0x184] ss:$16 sps:$4 sm:$0xff]  }
 0x8b1   :  { %4672 = vmatprep.subr.bf16.mxu1 %v9956_v19  ;;  %v10034_v19 = vld [vmem:[#allocation8 + $0x384] ss:$16 sps:$4 sm:$0xff]  }
 0x8b3   :  { %4632 = vmatpush2.bf16.msra.mxu0 %v9951_v27  ;;  %v10029_v27 = vld [vmem:[#allocation8 + $0x180] ss:$16 sps:$4 sm:$0xff]  }
 0x8b4   :  { %4673 = vmatpush2.bf16.msra.mxu1 %v9954_v28  ;;  %4633 = vmatprep.subr.bf16.mxu0 %v9959_v29  ;;  %v10032_v28 = vld [vmem:[#allocation8 + $0x380] ss:$16 sps:$4 sm:$0xff]   ;;  %v10037_v29 = vld [vmem:[#allocation8 + $0x164] ss:$16 sps:$4 sm:$0xff]  }
 0x8b5   :  { %4674 = vmatprep.subr.bf16.mxu1 %v9962_v34  ;;  %v10040_v34 = vld [vmem:[#allocation8 + $0x364] ss:$16 sps:$4 sm:$0xff]  }
 0x8b7   :  { %4634 = vmatpush2.bf16.msra.mxu0 %v9957_v35  ;;  %v10035_v35 = vld [vmem:[#allocation8 + $0x160] ss:$16 sps:$4 sm:$0xff]  }
 0x8b8   :  { %4675 = vmatpush2.bf16.msra.mxu1 %v9960_v36  ;;  %5475 = vmatprep.subr.bf16.mxu0 %v9965_v37  ;;  %v10038_v36 = vld [vmem:[#allocation8 + $0x360] ss:$16 sps:$4 sm:$0xff]   ;;  %v10043_v37 = vld [vmem:[#allocation8 + $0x144] ss:$16 sps:$4 sm:$0xff]  }
 0x8b9   :  { %5516 = vmatprep.subr.bf16.mxu1 %v9968_v38  ;;  %v10046_v38 = vld [vmem:[#allocation8 + $0x344] ss:$16 sps:$4 sm:$0xff]  }
 0x8ba   :  { %4636 = vmatmul.mubr.bf16.vlgmr.msra.gmra.mxu0 %v11392_v1 }
 0x8bb   :  { %4677 = vmatmul.mubr.bf16.vlgmr.msra.gmra.mxu1 %v11396_v5  ;;  %5476 = vmatpush1.bf16.msra.mxu0 %v9963_v39  ;;  %v10041_v39 = vld [vmem:[#allocation8 + $0x140] ss:$16 sps:$4 sm:$0xff]  }
 0x8bc   :  { %5507 = vmatprep.mubr.bf16.mxu0 %v11390_v22  ;;  %5517 = vmatpush1.bf16.msra.mxu1 %v9966_v40  ;;  %v10044_v40 = vld [vmem:[#allocation8 + $0x340] ss:$16 sps:$4 sm:$0xff]  }
 0x8bd   :  { %5548 = vmatprep.mubr.bf16.mxu1 %v11394_v2  ;;  %5477 = vmatprep.subr.bf16.mxu0 %v9971_v41  ;;  %v10049_v41 = vld [vmem:[#allocation8 + $0x124] ss:$16 sps:$4 sm:$0xff]  }
 0x8be   :  { %5518 = vmatprep.subr.bf16.mxu1 %v9974_v42  ;;  %v10052_v42 = vld [vmem:[#allocation8 + $0x324] ss:$16 sps:$4 sm:$0xff]  }
 0x8bf   :  { %5478 = vmatpush1.bf16.msra.mxu0 %v9969_v44  ;;  %v10047_v44 = vld [vmem:[#allocation8 + $0x120] ss:$16 sps:$4 sm:$0xff]  }
 0x8c0   :  { %5519 = vmatpush1.bf16.msra.mxu1 %v9972_v45  ;;  %5479 = vmatprep.subr.bf16.mxu0 %v9977_v47  ;;  %v10050_v45 = vld [vmem:[#allocation8 + $0x320] ss:$16 sps:$4 sm:$0xff]   ;;  %v10055_v47 = vld [vmem:[#allocation8 + $0x104] ss:$16 sps:$4 sm:$0xff]  }
 0x8c1   :  { %5520 = vmatprep.subr.bf16.mxu1 %v9980_v3  ;;  %v10058_v3 = vld [vmem:[#allocation8 + $0x304] ss:$16 sps:$4 sm:$0xff]  }
 0x8c3   :  { %5480 = vmatpush1.bf16.msra.mxu0 %v9975_v32  ;;  %v10053_v32 = vld [vmem:[#allocation8 + $0x100] ss:$16 sps:$4 sm:$0xff]  }
 0x8c4   :  { %5521 = vmatpush1.bf16.msra.mxu1 %v9978_v48  ;;  %5481 = vmatprep.subr.bf16.mxu0 %v9983_v49  ;;  %v10056_v48 = vld [vmem:[#allocation8 + $0x300] ss:$16 sps:$4 sm:$0xff]   ;;  %v10061_v49 = vld [vmem:[#allocation8 + $0xec] ss:$16 sps:$4 sm:$0xff]  }
 0x8c5   :  { %5522 = vmatprep.subr.bf16.mxu1 %v9986_v50  ;;  %v10064_v50 = vld [vmem:[#allocation8 + $0x2ec] ss:$16 sps:$4 sm:$0xff]  }
 0x8c7   :  { %5482 = vmatpush1.bf16.msra.mxu0 %v9981_v51  ;;  %v10059_v51 = vld [vmem:[#allocation8 + $0xe8] ss:$16 sps:$4 sm:$0xff]  }
 0x8c8   :  { %5523 = vmatpush1.bf16.msra.mxu1 %v9984_v52  ;;  %5483 = vmatprep.subr.bf16.mxu0 %v9989_v53  ;;  %v10062_v52 = vld [vmem:[#allocation8 + $0x2e8] ss:$16 sps:$4 sm:$0xff]   ;;  %v10067_v53 = vld [vmem:[#allocation8 + $0xcc] ss:$16 sps:$4 sm:$0xff]  }
 0x8c9   :  { %5524 = vmatprep.subr.bf16.mxu1 %v9992_v54  ;;  %v10070_v54 = vld [vmem:[#allocation8 + $0x2cc] ss:$16 sps:$4 sm:$0xff]  }
 0x8cb   :  { %5484 = vmatpush1.bf16.msra.mxu0 %v9987_v30  ;;  %v10065_v30 = vld [vmem:[#allocation8 + $0xc8] ss:$16 sps:$4 sm:$0xff]  }
 0x8cc   :  { %5525 = vmatpush1.bf16.msra.mxu1 %v9990_v31  ;;  %5485 = vmatprep.subr.bf16.mxu0 %v9995_v33  ;;  %v10068_v31 = vld [vmem:[#allocation8 + $0x2c8] ss:$16 sps:$4 sm:$0xff]   ;;  %v10073_v33 = vld [vmem:[#allocation8 + $0xac] ss:$16 sps:$4 sm:$0xff]  }
 0x8cd   :  { %5526 = vmatprep.subr.bf16.mxu1 %v9998_v55  ;;  %v10076_v55 = vld [vmem:[#allocation8 + $0x2ac] ss:$16 sps:$4 sm:$0xff]  }
 0x8cf   :  { %5486 = vmatpush1.bf16.msra.mxu0 %v9993_v8  ;;  %v10071_v8 = vld [vmem:[#allocation8 + $0xa8] ss:$16 sps:$4 sm:$0xff]  }
 0x8d0   :  { %5527 = vmatpush1.bf16.msra.mxu1 %v9996_v56  ;;  %5487 = vmatprep.subr.bf16.mxu0 %v10001_v57  ;;  %v10074_v56 = vld [vmem:[#allocation8 + $0x2a8] ss:$16 sps:$4 sm:$0xff]   ;;  %v10079_v57 = vld [vmem:[#allocation8 + $0x8c] ss:$16 sps:$4 sm:$0xff]  }
 0x8d1   :  { %5528 = vmatprep.subr.bf16.mxu1 %v10004_v61  ;;  %v10082_v61 = vld [vmem:[#allocation8 + $0x28c] ss:$16 sps:$4 sm:$0xff]  }
 0x8d3   :  { %5488 = vmatpush1.bf16.msra.mxu0 %v9999_v14  ;;  %v10077_v14 = vld [vmem:[#allocation8 + $0x88] ss:$16 sps:$4 sm:$0xff]  }
 0x8d4   :  { %5529 = vmatpush1.bf16.msra.mxu1 %v10002_v58  ;;  %5489 = vmatprep.subr.bf16.mxu0 %v10007_v60  ;;  %v10085_v58 = vld [vmem:[#allocation8 + $0x6c] ss:$16 sps:$4 sm:$0xff]  }
 0x8d5   :  { %5530 = vmatprep.subr.bf16.mxu1 %v10010_v62  ;;  %v10088_v60 = vld [vmem:[#allocation8 + $0x26c] ss:$16 sps:$4 sm:$0xff]   ;;  %v10086_v62 = vld [vmem:[#allocation8 + $0x268] ss:$16 sps:$4 sm:$0xff]  }
 0x8d7   :  { %5490 = vmatpush1.bf16.msra.mxu0 %v10005_v59  ;;  %v10091_v59 = vld [vmem:[#allocation8 + $0x4c] ss:$16 sps:$4 sm:$0xff]  }
 0x8d8   :  { %5531 = vmatpush1.bf16.msra.mxu1 %v10008_v9  ;;  %5491 = vmatprep.subr.bf16.mxu0 %v10013_v11  ;;  %v10094_v9 = vld [vmem:[#allocation8 + $0x24c] ss:$16 sps:$4 sm:$0xff]   ;;  %v10089_v11 = vld [vmem:[#allocation8 + $0x48] ss:$16 sps:$4 sm:$0xff]  }
 0x8d9   :  { %5532 = vmatprep.subr.bf16.mxu1 %v10016_v6  ;;  %v10092_v6 = vld [vmem:[#allocation8 + $0x248] ss:$16 sps:$4 sm:$0xff]  }
 0x8db   :  { %5492 = vmatpush2.bf16.msra.mxu0 %v10011_v10  ;;  %v10097_v10 = vld [vmem:[#allocation8 + $0x2c] ss:$16 sps:$4 sm:$0xff]  }
 0x8dc   :  { %5533 = vmatpush2.bf16.msra.mxu1 %v10014_v20  ;;  %5493 = vmatprep.subr.bf16.mxu0 %v10019_v0  ;;  %v10100_v20 = vld [vmem:[#allocation8 + $0x22c] ss:$16 sps:$4 sm:$0xff]   ;;  %v10095_v0 = vld [vmem:[#allocation8 + $0x28] ss:$16 sps:$4 sm:$0xff]  }
 0x8dd   :  { %5534 = vmatprep.subr.bf16.mxu1 %v10022_v63  ;;  %v10098_v63 = vld [vmem:[#allocation8 + $0x228] ss:$16 sps:$4 sm:$0xff]  }
 0x8df   :  { %5494 = vmatpush2.bf16.msra.mxu0 %v10017_v4  ;;  %v10103_v4 = vld [vmem:[#allocation8 + $0xc] ss:$16 sps:$4 sm:$0xff]  }
 0x8e0   :  { %5535 = vmatpush2.bf16.msra.mxu1 %v10020_v12  ;;  %5495 = vmatprep.subr.bf16.mxu0 %v10025_v13  ;;  %v10106_v12 = vld [vmem:[#allocation8 + $0x20c] ss:$16 sps:$4 sm:$0xff]   ;;  %v10101_v13 = vld [vmem:[#allocation8 + $0x8] ss:$16 sps:$4 sm:$0xff]  }
 0x8e1   :  { %5536 = vmatprep.subr.bf16.mxu1 %v10028_v21  ;;  %v10104_v21 = vld [vmem:[#allocation8 + $0x208] ss:$16 sps:$4 sm:$0xff]  }
 0x8e3   :  { %5496 = vmatpush2.bf16.msra.mxu0 %v10023_v23  ;;  %v10109_v23 = vld [vmem:[#allocation8 + $0x1ec] ss:$16 sps:$4 sm:$0xff]  }
 0x8e4   :  { %5537 = vmatpush2.bf16.msra.mxu1 %v10026_v24  ;;  %5497 = vmatprep.subr.bf16.mxu0 %v10031_v26  ;;  %v10112_v24 = vld [vmem:[#allocation8 + $0x3ec] ss:$16 sps:$4 sm:$0xff]   ;;  %v10107_v26 = vld [vmem:[#allocation8 + $0x1e8] ss:$16 sps:$4 sm:$0xff]  }
 0x8e5   :  { %5538 = vmatprep.subr.bf16.mxu1 %v10034_v19  ;;  %v10110_v19 = vld [vmem:[#allocation8 + $0x3e8] ss:$16 sps:$4 sm:$0xff]  }
 0x8e7   :  { %5498 = vmatpush2.bf16.msra.mxu0 %v10029_v27  ;;  %v10115_v27 = vld [vmem:[#allocation8 + $0x1cc] ss:$16 sps:$4 sm:$0xff]  }
 0x8e8   :  { %5539 = vmatpush2.bf16.msra.mxu1 %v10032_v28  ;;  %5499 = vmatprep.subr.bf16.mxu0 %v10037_v29  ;;  %v10118_v28 = vld [vmem:[#allocation8 + $0x3cc] ss:$16 sps:$4 sm:$0xff]   ;;  %v10113_v29 = vld [vmem:[#allocation8 + $0x1c8] ss:$16 sps:$4 sm:$0xff]  }
 0x8e9   :  { %5540 = vmatprep.subr.bf16.mxu1 %v10040_v34  ;;  %v10116_v34 = vld [vmem:[#allocation8 + $0x3c8] ss:$16 sps:$4 sm:$0xff]  }
 0x8eb   :  { %5500 = vmatpush2.bf16.msra.mxu0 %v10035_v35  ;;  %v10121_v35 = vld [vmem:[#allocation8 + $0x1ac] ss:$16 sps:$4 sm:$0xff]  }
 0x8ec   :  { %5541 = vmatpush2.bf16.msra.mxu1 %v10038_v36  ;;  %5501 = vmatprep.subr.bf16.mxu0 %v10043_v37  ;;  %v10124_v36 = vld [vmem:[#allocation8 + $0x3ac] ss:$16 sps:$4 sm:$0xff]   ;;  %v10119_v37 = vld [vmem:[#allocation8 + $0x1a8] ss:$16 sps:$4 sm:$0xff]  }
 0x8ed   :  { %5542 = vmatprep.subr.bf16.mxu1 %v10046_v38  ;;  %v10122_v38 = vld [vmem:[#allocation8 + $0x3a8] ss:$16 sps:$4 sm:$0xff]  }
 0x8ef   :  { %5502 = vmatpush2.bf16.msra.mxu0 %v10041_v39  ;;  %v10127_v39 = vld [vmem:[#allocation8 + $0x18c] ss:$16 sps:$4 sm:$0xff]  }
 0x8f0   :  { %5543 = vmatpush2.bf16.msra.mxu1 %v10044_v40  ;;  %5503 = vmatprep.subr.bf16.mxu0 %v10049_v41  ;;  %v10130_v40 = vld [vmem:[#allocation8 + $0x38c] ss:$16 sps:$4 sm:$0xff]   ;;  %v10125_v41 = vld [vmem:[#allocation8 + $0x188] ss:$16 sps:$4 sm:$0xff]  }
 0x8f1   :  { %5544 = vmatprep.subr.bf16.mxu1 %v10052_v42  ;;  %v10128_v42 = vld [vmem:[#allocation8 + $0x388] ss:$16 sps:$4 sm:$0xff]  }
 0x8f3   :  { %5504 = vmatpush2.bf16.msra.mxu0 %v10047_v44  ;;  %v10133_v44 = vld [vmem:[#allocation8 + $0x16c] ss:$16 sps:$4 sm:$0xff]  }
 0x8f4   :  { %5545 = vmatpush2.bf16.msra.mxu1 %v10050_v45  ;;  %5505 = vmatprep.subr.bf16.mxu0 %v10055_v47  ;;  %v10136_v45 = vld [vmem:[#allocation8 + $0x36c] ss:$16 sps:$4 sm:$0xff]   ;;  %v10131_v47 = vld [vmem:[#allocation8 + $0x168] ss:$16 sps:$4 sm:$0xff]  }
 0x8f5   :  { %5546 = vmatprep.subr.bf16.mxu1 %v10058_v3  ;;  %v10134_v3 = vld [vmem:[#allocation8 + $0x368] ss:$16 sps:$4 sm:$0xff]  }
 0x8f7   :  { %5506 = vmatpush2.bf16.msra.mxu0 %v10053_v32  ;;  %v10139_v32 = vld [vmem:[#allocation8 + $0x14c] ss:$16 sps:$4 sm:$0xff]  }
 0x8f8   :  { %5547 = vmatpush2.bf16.msra.mxu1 %v10056_v48  ;;  %5557 = vmatprep.subr.bf16.mxu0 %v10061_v49  ;;  %v10142_v48 = vld [vmem:[#allocation8 + $0x34c] ss:$16 sps:$4 sm:$0xff]   ;;  %v10137_v49 = vld [vmem:[#allocation8 + $0x148] ss:$16 sps:$4 sm:$0xff]  }
 0x8f9   :  { %5598 = vmatprep.subr.bf16.mxu1 %v10064_v50  ;;  %v10140_v50 = vld [vmem:[#allocation8 + $0x348] ss:$16 sps:$4 sm:$0xff]  }
 0x8fa   :  { %5508 = vmatmul.mubr.bf16.vlgmr.msra.gmra.mxu0 %v11392_v1 }
 0x8fb   :  { %5549 = vmatmul.mubr.bf16.vlgmr.msra.gmra.mxu1 %v11396_v5  ;;  %5558 = vmatpush1.bf16.msra.mxu0 %v10059_v51  ;;  %v10145_v51 = vld [vmem:[#allocation8 + $0x12c] ss:$16 sps:$4 sm:$0xff]  }
 0x8fc   :  { %5589 = vmatprep.mubr.bf16.mxu0 %v11390_v22  ;;  %5599 = vmatpush1.bf16.msra.mxu1 %v10062_v52  ;;  %v10080_v22 = vld [vmem:[#allocation8 + $0x288] ss:$16 sps:$4 sm:$0xff]   ;;  %v10148_v52 = vld [vmem:[#allocation8 + $0x32c] ss:$16 sps:$4 sm:$0xff]  }
 0x8fd   :  { %5630 = vmatprep.mubr.bf16.mxu1 %v11394_v2  ;;  %5559 = vmatprep.subr.bf16.mxu0 %v10067_v53  ;;  %v10083_v2 = vld [vmem:[#allocation8 + $0x68] ss:$16 sps:$4 sm:$0xff]  }
 0x8fe   :  { %5600 = vmatprep.subr.bf16.mxu1 %v10070_v54  ;;  %v10143_v53 = vld [vmem:[#allocation8 + $0x128] ss:$16 sps:$4 sm:$0xff]  }
 0x8ff   :  { %5560 = vmatpush1.bf16.msra.mxu0 %v10065_v30  ;;  %v10146_v54 = vld [vmem:[#allocation8 + $0x328] ss:$16 sps:$4 sm:$0xff]   ;;  %v10151_v30 = vld [vmem:[#allocation8 + $0x10c] ss:$16 sps:$4 sm:$0xff]  }
 0x900   :  { %5601 = vmatpush1.bf16.msra.mxu1 %v10068_v31  ;;  %5561 = vmatprep.subr.bf16.mxu0 %v10073_v33  ;;  %v10154_v31 = vld [vmem:[#allocation8 + $0x30c] ss:$16 sps:$4 sm:$0xff]   ;;  %v10149_v33 = vld [vmem:[#allocation8 + $0x108] ss:$16 sps:$4 sm:$0xff]  }
 0x901   :  { %5602 = vmatprep.subr.bf16.mxu1 %v10076_v55  ;;  %v10152_v55 = vld [vmem:[#allocation8 + $0x308] ss:$16 sps:$4 sm:$0xff]  }
 0x903   :  { %5562 = vmatpush1.bf16.msra.mxu0 %v10071_v8  ;;  %v3859_v8 = vld [vmem:[%s11878_s16] sm:$0xf] }
 0x904   :  { %5603 = vmatpush1.bf16.msra.mxu1 %v10074_v56  ;;  %5563 = vmatprep.subr.bf16.mxu0 %v10079_v57  ;;  %v3864_v56 = vrot.slane %v3859_v8, %v10937_v17  ;;  %v3868_v57 = vrot.slane %v3859_v8, %v10931_v15 }
 0x905   :  { %5604 = vmatprep.subr.bf16.mxu1 %v10082_v61 }
 0x907   :  { %5564 = vmatpush1.bf16.msra.mxu0 %v10077_v14 }
 0x908   :  { %5605 = vmatpush1.bf16.msra.mxu1 %v10080_v22  ;;  %5565 = vmatprep.subr.bf16.mxu0 %v10085_v58 }
 0x909   :  { %5606 = vmatprep.subr.bf16.mxu1 %v10088_v60 }
 0x90b   :  { %5566 = vmatpush1.bf16.msra.mxu0 %v10083_v2 }
 0x90c   :  { %5607 = vmatpush1.bf16.msra.mxu1 %v10086_v62  ;;  %5567 = vmatprep.subr.bf16.mxu0 %v10091_v59 }
 0x90d   :  { %5608 = vmatprep.subr.bf16.mxu1 %v10094_v9 }
 0x90f   :  { %5568 = vmatpush1.bf16.msra.mxu0 %v10089_v11 }
 0x910   :  { %5609 = vmatpush1.bf16.msra.mxu1 %v10092_v6  ;;  %5569 = vmatprep.subr.bf16.mxu0 %v10097_v10  ;;  %v3876_v10 = vrot.slane %v3859_v8, %v10934_v16 }
 0x911   :  { %5610 = vmatprep.subr.bf16.mxu1 %v10100_v20 }
 0x913   :  { %5570 = vmatpush1.bf16.msra.mxu0 %v10095_v0 }
 0x914   :  { %5611 = vmatpush1.bf16.msra.mxu1 %v10098_v63  ;;  %5571 = vmatprep.subr.bf16.mxu0 %v10103_v4 }
 0x915   :  { %5612 = vmatprep.subr.bf16.mxu1 %v10106_v12 }
 0x917   :  { %5572 = vmatpush1.bf16.msra.mxu0 %v10101_v13 }
 0x918   :  { %5613 = vmatpush1.bf16.msra.mxu1 %v10104_v21  ;;  %5573 = vmatprep.subr.bf16.mxu0 %v10109_v23 }
 0x919   :  { %5614 = vmatprep.subr.bf16.mxu1 %v10112_v24 }
 0x91b   :  { %5574 = vmatpush2.bf16.msra.mxu0 %v10107_v26 }
 0x91c   :  { %5615 = vmatpush2.bf16.msra.mxu1 %v10110_v19  ;;  %5575 = vmatprep.subr.bf16.mxu0 %v10115_v27  ;;  %v4813_v27 = vld [vmem:[%s11880_s18] sm:$0xf] }
 0x91d   :  { %5616 = vmatprep.subr.bf16.mxu1 %v10118_v28  ;;  %v4818_v28 = vrot.slane %v4813_v27, %v10937_v17 }
 0x91f   :  { %5576 = vmatpush2.bf16.msra.mxu0 %v10113_v29  ;;  %v4822_v29 = vrot.slane %v4813_v27, %v10931_v15 }
 0x920   :  { %5617 = vmatpush2.bf16.msra.mxu1 %v10116_v34  ;;  %5577 = vmatprep.subr.bf16.mxu0 %v10121_v35 }
 0x921   :  { %5618 = vmatprep.subr.bf16.mxu1 %v10124_v36 }
 0x923   :  { %5578 = vmatpush2.bf16.msra.mxu0 %v10119_v37 }
 0x924   :  { %5619 = vmatpush2.bf16.msra.mxu1 %v10122_v38  ;;  %5579 = vmatprep.subr.bf16.mxu0 %v10127_v39 }
 0x925   :  { %5620 = vmatprep.subr.bf16.mxu1 %v10130_v40 }
 0x927   :  { %5580 = vmatpush2.bf16.msra.mxu0 %v10125_v41 }
 0x928   :  { %5621 = vmatpush2.bf16.msra.mxu1 %v10128_v42  ;;  %5581 = vmatprep.subr.bf16.mxu0 %v10133_v44 }
 0x929   :  { %5622 = vmatprep.subr.bf16.mxu1 %v10136_v45 }
 0x92b   :  { %5582 = vmatpush2.bf16.msra.mxu0 %v10131_v47 }
 0x92c   :  { %5623 = vmatpush2.bf16.msra.mxu1 %v10134_v3  ;;  %5583 = vmatprep.subr.bf16.mxu0 %v10139_v32 }
 0x92d   :  { %5624 = vmatprep.subr.bf16.mxu1 %v10142_v48  ;;  %v4826_v48 = vrot.slane %v4813_v27, %v10940_v18 }
 0x92f   :  { %5584 = vmatpush2.bf16.msra.mxu0 %v10137_v49  ;;  %v4830_v49 = vrot.slane %v4813_v27, %v10934_v16 }
 0x930   :  { %5625 = vmatpush2.bf16.msra.mxu1 %v10140_v50  ;;  %5585 = vmatprep.subr.bf16.mxu0 %v10145_v51 }
 0x931   :  { %5626 = vmatprep.subr.bf16.mxu1 %v10148_v52 }
 0x933   :  { %5586 = vmatpush2.bf16.msra.mxu0 %v10143_v53 }
 0x934   :  { %5627 = vmatpush2.bf16.msra.mxu1 %v10146_v54  ;;  %5587 = vmatprep.subr.bf16.mxu0 %v10151_v30 }
 0x935   :  { %5628 = vmatprep.subr.bf16.mxu1 %v10154_v31 }
 0x937   :  { %5588 = vmatpush2.bf16.msra.mxu0 %v10149_v33 }
 0x938   :  { %5629 = vmatpush2.bf16.msra.mxu1 %v10152_v55 }
 0x93a   :  { %5590 = vmatmul.mubr.bf16.vlgmr.msra.gmra.mxu0 %v11392_v1  ;;  %v4555_v61 = vpop.f32.mrf.mxu0 }
 0x93b   :  { %5631 = vmatmul.mubr.bf16.vlgmr.msra.gmra.mxu1 %v11396_v5  ;;  %v4596_v14 = vpop.f32.mrf.mxu1  ;;  %6242 = vmatprep.mubr.f32.mxu0 %v10717_v43  ;;  %v4556_v22 = vadd.f32 %v4555_v61, %v3864_v56  ;;  %v3872_v5 = vrot.slane %v3859_v8, %v10940_v18 }
 0x93c   :  { %v4557_v58 = vpop.f32.mrf.mxu0  ;;  %6313 = vmatprep.mubr.f32.mxu1 %v10717_v43 }
 0x93d   :  { %v4558_v60 = vadd.f32 %v4557_v58, %v3868_v57  ;;  %v4598_v2 = vpop.f32.mrf.mxu1  ;;  %v11423_v11 = vadd.f32 %v4596_v14, %v4556_v22 }
 0x93e   :  { %v4559_v62 = vpop.f32.mrf.mxu0 }
 0x93f   :  { %v11421_v59 = vadd.f32 %v4598_v2, %v4558_v60  ;;  %v4600_v9 = vpop.f32.mrf.mxu1  ;;  %v5999_v62 = vld [vmem:[%s11881_s19] sm:$0xf] }
 0x940   :  { %v4560_v6 = vpop.f32.mrf.mxu0 }
 0x941   :  { %v4601_v1 = vpop.f32.mrf.mxu1  ;;  %6208 = vmatprep.subr.mxu0 %v11421_v59 }
 0x942   :  { %6209 = vmatpush1.msra.mxu0 %v11423_v11 }
 0x97a   :  { %v4637_v20 = vpop.f32.mrf.mxu0 }
 0x97b   :  { %v4678_v43 = vpop.f32.mrf.mxu1  ;;  %v4638_v0 = vadd.f32 %v4637_v20, %v3872_v5 }
 0x97c   :  { %v4639_v63 = vpop.f32.mrf.mxu0 }
 0x97d   :  { %v4640_v4 = vadd.f32 %v4639_v63, %v3876_v10  ;;  %v4680_v12 = vpop.f32.mrf.mxu1  ;;  %v11431_v24 = vadd.f32 %v4678_v43, %v4638_v0  ;;  %v11456_v43 = vrot.slane %v5999_v62, %v10937_v17  ;;  %v11459_v0 = vrot.slane %v5999_v62, %v10931_v15 }
 0x97e   :  { %v4641_v13 = vpop.f32.mrf.mxu0 }
 0x97f   :  { %v11429_v21 = vadd.f32 %v4680_v12, %v4640_v4  ;;  %v4682_v23 = vpop.f32.mrf.mxu1  ;;  %v11468_v12 = vrot.slane %v5999_v62, %v10940_v18  ;;  %v11471_v13 = vrot.slane %v5999_v62, %v10934_v16 }
 0x980   :  { %v4642_v26 = vpop.f32.mrf.mxu0 }
 0x981   :  { %v4683_v19 = vpop.f32.mrf.mxu1  ;;  %6279 = vmatprep.subr.mxu1 %v11429_v21 }
 0x982   :  { %6280 = vmatpush1.msra.mxu1 %v11431_v24 }
 0x9ba   :  { %v5509_v34 = vpop.f32.mrf.mxu0 }
 0x9bb   :  { %v5510_v35 = vadd.f32 %v5509_v34, %v4818_v28  ;;  %v5550_v36 = vpop.f32.mrf.mxu1 }
 0x9bc   :  { %v5511_v37 = vpop.f32.mrf.mxu0 }
 0x9bd   :  { %v5551_v38 = vadd.f32 %v5550_v36, %v5510_v35  ;;  %v5512_v39 = vadd.f32 %v5511_v37, %v4822_v29  ;;  %v5552_v40 = vpop.f32.mrf.mxu1 }
 0x9be   :  { %v5513_v41 = vpop.f32.mrf.mxu0 }
 0x9bf   :  { %v5553_v42 = vadd.f32 %v5552_v40, %v5512_v39  ;;  %v5554_v44 = vpop.f32.mrf.mxu1 }
 0x9c0   :  { %v5514_v45 = vpop.f32.mrf.mxu0 }
 0x9c1   :  { %v5643_v47 = vcombine.low %v5551_v38, %v5553_v42  ;;  %v5644_v3 = vcombine.high %v5551_v38, %v5553_v42  ;;  %v5555_v32 = vpop.f32.mrf.mxu1 }
 0x9c3   :  { %v5653_v22 = vrot.slane %v5643_v47, %v10966_v46  ;;  %v5660_v58 = vrot.slane %v5644_v3, %v10966_v46 }
 0x9fa   :  { %v5591_v50 = vpop.f32.mrf.mxu0 }
 0x9fb   :  { %v5592_v51 = vadd.f32 %v5591_v50, %v4826_v48  ;;  %v5632_v52 = vpop.f32.mrf.mxu1 }
 0x9fc   :  { %v5593_v53 = vpop.f32.mrf.mxu0 }
 0x9fd   :  { %v5594_v54 = vadd.f32 %v5593_v53, %v4830_v49  ;;  %v5634_v30 = vpop.f32.mrf.mxu1  ;;  %v5633_v33 = vadd.f32 %v5632_v52, %v5592_v51 }
 0x9fe   :  { %v5595_v31 = vpop.f32.mrf.mxu0 }
 0x9ff   :  { %v5635_v55 = vadd.f32 %v5634_v30, %v5594_v54  ;;  %v5636_v8 = vpop.f32.mrf.mxu1 }
 0xa00   :  { %v5596_v56 = vpop.f32.mrf.mxu0 }
 0xa01   :  { %v5645_v57 = vcombine.low %v5633_v33, %v5635_v55  ;;  %v5646_v61 = vcombine.high %v5633_v33, %v5635_v55  ;;  %v5637_v14 = vpop.f32.mrf.mxu1 }
 0xa03   :  { %v5667_v60 = vrot.slane %v5645_v57, %v10966_v46  ;;  %v5674_v2 = vrot.slane %v5646_v61, %v10966_v46 }
 0xa05   :  { %v5675_v9 = vcombine.low %v5653_v22, %v5667_v60  ;;  %v5676_v6 = vcombine.high %v5653_v22, %v5667_v60  ;;  %v5677_v1 = vcombine.low %v5660_v58, %v5674_v2  ;;  %v5678_v5 = vcombine.high %v5660_v58, %v5674_v2 }
 0xa07   :  { %v11450_v10 = vrot.slane %v5675_v9, %v10966_v46  ;;  %v11453_v20 = vrot.slane %v5676_v6, %v10966_v46  ;;  %v11462_v63 = vrot.slane %v5677_v1, %v10966_v46  ;;  %v11465_v4 = vrot.slane %v5678_v5, %v10966_v46 }
 0xa09   :  { %v5730_v23 = vrot.slane %v11453_v20, %v10937_v17  ;;  %v5734_v26 = vrot.slane %v11453_v20, %v10931_v15  ;;  %v5738_v19 = vrot.slane %v11453_v20, %v10940_v18  ;;  %v5742_v27 = vrot.slane %v11453_v20, %v10934_v16 }
 0xa0a   :  { %v5714_v46 = vrot.slane %v11450_v10, %v10937_v17  ;;  %v5718_v28 = vrot.slane %v11450_v10, %v10931_v15  ;;  %v5722_v29 = vrot.slane %v11450_v10, %v10940_v18  ;;  %v5726_v34 = vrot.slane %v11450_v10, %v10934_v16 }
 0xa0b   :  { %v5875_v35 = vadd.f32 %v5730_v23, %v11423_v11  ;;  %v5876_v36 = vadd.f32 %v5734_v26, %v11421_v59  ;;  %v5877_v37 = vadd.f32 %v5738_v19, %v11431_v24  ;;  %v5878_v38 = vadd.f32 %v5742_v27, %v11429_v21 }
 0xa0c   :  { %v5871_v39 = vadd.f32 %v5714_v46, %v11423_v11  ;;  %v5872_v40 = vadd.f32 %v5718_v28, %v11421_v59  ;;  %v5873_v41 = vadd.f32 %v5722_v29, %v11431_v24  ;;  %v5874_v42 = vadd.f32 %v5726_v34, %v11429_v21 }
 0xa0d   :  { %vm5907_vm13 = vcmp.ge.f32.partialorder %v5875_v35, 0.0  ;;  %vm5908_vm14 = vcmp.ge.f32.partialorder %v5876_v36, 0.0  ;;  %vm5909_vm15 = vcmp.ge.f32.partialorder %v5877_v37, 0.0  ;;  %vm5910_vm0 = vcmp.ge.f32.partialorder %v5878_v38, 0.0 }
 0xa0e   :  { %v5939_v44 = vmul.f32 0.2, %v5875_v35  ;;  %v5940_v45 = vmul.f32 0.2, %v5876_v36  ;;  %v5941_v47 = vmul.f32 0.2, %v5877_v37  ;;  %v5794_v3 = vrot.slane %v11465_v4, %v10937_v17 }
 0xa0f   :  { %v5942_v32 = vmul.f32 0.2, %v5878_v38  ;;  %vm5903_vm10 = vcmp.ge.f32.partialorder %v5871_v39, 0.0  ;;  %vm5904_vm9 = vcmp.ge.f32.partialorder %v5872_v40, 0.0  ;;  %vm5905_vm11 = vcmp.ge.f32.partialorder %v5873_v41, 0.0 }
 0xa10   :  { %v5971_v48 = vsel %vm5907_vm13, %v5875_v35, %v5939_v44  ;;  %v5972_v49 = vsel %vm5908_vm14, %v5876_v36, %v5940_v45  ;;  %v5973_v50 = vsel %vm5909_vm15, %v5877_v37, %v5941_v47  ;;  %vm5906_vm12 = vcmp.ge.f32.partialorder %v5874_v42, 0.0 }
 0xa11   :  { %v5974_v51 = vsel %vm5910_vm0, %v5878_v38, %v5942_v32  ;;  %v6025_v52 = vmul.f32 %v11456_v43, %v5971_v48  ;;  %v6026_v53 = vmul.f32 %v11459_v0, %v5972_v49  ;;  %v6027_v54 = vmul.f32 %v11468_v12, %v5973_v50 }
 0xa12   :  { %v6028_v30 = vmul.f32 %v11471_v13, %v5974_v51  ;;  %v5935_v31 = vmul.f32 0.2, %v5871_v39  ;;  %v5936_v33 = vmul.f32 0.2, %v5872_v40  ;;  %v5937_v55 = vmul.f32 0.2, %v5873_v41 }
 0xa13   :  { %v6058_v8 = vadd.f32 %v6026_v53, %v6025_v52  ;;  %v5938_v56 = vmul.f32 0.2, %v5874_v42  ;;  %v5798_v57 = vrot.slane %v11465_v4, %v10931_v15  ;;  %v5802_v61 = vrot.slane %v11465_v4, %v10940_v18 }
 0xa14   :  { %v5967_v14 = vsel %vm5903_vm10, %v5871_v39, %v5935_v31  ;;  %v5968_v22 = vsel %vm5904_vm9, %v5872_v40, %v5936_v33  ;;  %v5969_v58 = vsel %vm5905_vm11, %v5873_v41, %v5937_v55  ;;  %v5806_v60 = vrot.slane %v11465_v4, %v10934_v16 }
 0xa15   :  { %v6059_v2 = vadd.f32 %v6058_v8, %v6027_v54  ;;  %v5970_v62 = vsel %vm5906_vm12, %v5874_v42, %v5938_v56  ;;  %v6021_v9 = vmul.f32 %v11456_v43, %v5967_v14  ;;  %v6022_v6 = vmul.f32 %v11459_v0, %v5968_v22 }
 0xa16   :  { %v6023_v1 = vmul.f32 %v11468_v12, %v5969_v58  ;;  %v6024_v5 = vmul.f32 %v11471_v13, %v5970_v62  ;;  %v5891_v23 = vadd.f32 %v5794_v3, %v11423_v11  ;;  %v5892_v26 = vadd.f32 %v5798_v57, %v11421_v59 }
 0xa17   :  { %v6060_v19 = vadd.f32 %v6059_v2, %v6028_v30  ;;  %v6053_v27 = vadd.f32 %v6022_v6, %v6021_v9  ;;  %v5893_v46 = vadd.f32 %v5802_v61, %v11431_v24  ;;  %v5894_v28 = vadd.f32 %v5806_v60, %v11429_v21 }
 0xa18   :  { %vm5923_vm13 = vcmp.ge.f32.partialorder %v5891_v23, 0.0  ;;  %vm5924_vm14 = vcmp.ge.f32.partialorder %v5892_v26, 0.0  ;;  %v5955_v29 = vmul.f32 0.2, %v5891_v23  ;;  %v5956_v34 = vmul.f32 0.2, %v5892_v26 }
 0xa19   :  { %6061 = vadd.xlane.f32.xlu1 %v6060_v19  ;;  %v6054_v35 = vadd.f32 %v6053_v27, %v6023_v1  ;;  %vm5925_vm15 = vcmp.ge.f32.partialorder %v5893_v46, 0.0  ;;  %vm5926_vm0 = vcmp.ge.f32.partialorder %v5894_v28, 0.0  ;;  %v5957_v36 = vmul.f32 0.2, %v5893_v46 }
 0xa1a   :  { %v5958_v37 = vmul.f32 0.2, %v5894_v28  ;;  %v5987_v38 = vsel %vm5923_vm13, %v5891_v23, %v5955_v29  ;;  %v5988_v39 = vsel %vm5924_vm14, %v5892_v26, %v5956_v34  ;;  %v5778_v40 = vrot.slane %v11462_v63, %v10937_v17 }
 0xa1b   :  { %v6055_v41 = vadd.f32 %v6054_v35, %v6024_v5  ;;  %v5989_v42 = vsel %vm5925_vm15, %v5893_v46, %v5957_v36  ;;  %v6041_v44 = vmul.f32 %v11456_v43, %v5987_v38  ;;  %v6042_v45 = vmul.f32 %v11459_v0, %v5988_v39 }
 0xa1c   :  { %v5990_v47 = vsel %vm5926_vm0, %v5894_v28, %v5958_v37  ;;  %v6043_v3 = vmul.f32 %v11468_v12, %v5989_v42  ;;  %v5782_v32 = vrot.slane %v11462_v63, %v10931_v15  ;;  %v5786_v48 = vrot.slane %v11462_v63, %v10940_v18 }
 0xa1d   :  { %6056 = vadd.xlane.f32.xlu0 %v6055_v41  ;;  %v6044_v49 = vmul.f32 %v11471_v13, %v5990_v47  ;;  %v6078_v50 = vadd.f32 %v6042_v45, %v6041_v44  ;;  %v5790_v51 = vrot.slane %v11462_v63, %v10934_v16  ;;  %v5887_v52 = vadd.f32 %v5778_v40, %v11423_v11 }
 0xa1e   :  { %v5888_v53 = vadd.f32 %v5782_v32, %v11421_v59  ;;  %v5889_v54 = vadd.f32 %v5786_v48, %v11431_v24  ;;  %v5709_v30 = vcombine.high %v11453_v20, %v11453_v20  ;;  %v5707_v31 = vcombine.high %v11450_v10, %v11450_v10 }
 0xa1f   :  { %v6079_v33 = vadd.f32 %v6078_v50, %v6043_v3  ;;  %v5890_v55 = vadd.f32 %v5790_v51, %v11429_v21  ;;  %vm5919_vm10 = vcmp.ge.f32.partialorder %v5887_v52, 0.0  ;;  %v5951_v8 = vmul.f32 0.2, %v5887_v52 }
 0xa20   :  { %vm5920_vm9 = vcmp.ge.f32.partialorder %v5888_v53, 0.0  ;;  %vm5921_vm11 = vcmp.ge.f32.partialorder %v5889_v54, 0.0  ;;  %v5952_v56 = vmul.f32 0.2, %v5888_v53  ;;  %v5953_v57 = vmul.f32 0.2, %v5889_v54 }
 0xa21   :  { %v6080_v61 = vadd.f32 %v6079_v33, %v6044_v49  ;;  %vm5922_vm12 = vcmp.ge.f32.partialorder %v5890_v55, 0.0  ;;  %v5954_v14 = vmul.f32 0.2, %v5890_v55  ;;  %v5983_v22 = vsel %vm5919_vm10, %v5887_v52, %v5951_v8 }
 0xa22   :  { %v5984_v58 = vsel %vm5920_vm9, %v5888_v53, %v5952_v56  ;;  %v5985_v60 = vsel %vm5921_vm11, %v5889_v54, %v5953_v57  ;;  %v6037_v20 = vmul.f32 %v11456_v43, %v5983_v22  ;;  %v5762_v2 = vrot.slane %v5709_v30, %v10937_v17 }
 0xa23   :  { %6081 = vadd.xlane.f32.xlu1 %v6080_v61  ;;  %v5986_v10 = vsel %vm5922_vm12, %v5890_v55, %v5954_v14  ;;  %v6038_v62 = vmul.f32 %v11459_v0, %v5984_v58  ;;  %v6039_v9 = vmul.f32 %v11468_v12, %v5985_v60  ;;  %v5766_v6 = vrot.slane %v5709_v30, %v10931_v15 }
 0xa24   :  { %v6040_v1 = vmul.f32 %v11471_v13, %v5986_v10  ;;  %v5770_v5 = vrot.slane %v5709_v30, %v10940_v18  ;;  %v5774_v23 = vrot.slane %v5709_v30, %v10934_v16  ;;  %v5883_v26 = vadd.f32 %v5762_v2, %v11423_v11 }
 0xa25   :  { %v6073_v19 = vadd.f32 %v6038_v62, %v6037_v20  ;;  %v5884_v27 = vadd.f32 %v5766_v6, %v11421_v59  ;;  %v5746_v46 = vrot.slane %v5707_v31, %v10937_v17  ;;  %v5750_v28 = vrot.slane %v5707_v31, %v10931_v15 }
 0xa26   :  { %v5885_v29 = vadd.f32 %v5770_v5, %v11431_v24  ;;  %v5886_v34 = vadd.f32 %v5774_v23, %v11429_v21  ;;  %vm5915_vm13 = vcmp.ge.f32.partialorder %v5883_v26, 0.0  ;;  %v5947_v35 = vmul.f32 0.2, %v5883_v26 }
 0xa27   :  { %v6074_v36 = vadd.f32 %v6073_v19, %v6039_v9  ;;  %vm5916_vm14 = vcmp.ge.f32.partialorder %v5884_v27, 0.0  ;;  %v5948_v37 = vmul.f32 0.2, %v5884_v27  ;;  %v5754_v38 = vrot.slane %v5707_v31, %v10940_v18 }
 0xa28   :  { %vm5917_vm15 = vcmp.ge.f32.partialorder %v5885_v29, 0.0  ;;  %vm5918_vm0 = vcmp.ge.f32.partialorder %v5886_v34, 0.0  ;;  %v5949_v39 = vmul.f32 0.2, %v5885_v29  ;;  %v5950_v40 = vmul.f32 0.2, %v5886_v34 }
 0xa29   :  { %v6075_v41 = vadd.f32 %v6074_v36, %v6040_v1  ;;  %v5979_v42 = vsel %vm5915_vm13, %v5883_v26, %v5947_v35  ;;  %v5980_v44 = vsel %vm5916_vm14, %v5884_v27, %v5948_v37  ;;  %v5758_v45 = vrot.slane %v5707_v31, %v10934_v16 }
 0xa2a   :  { %v5981_v47 = vsel %vm5917_vm15, %v5885_v29, %v5949_v39  ;;  %v5982_v3 = vsel %vm5918_vm0, %v5886_v34, %v5950_v40  ;;  %v6033_v32 = vmul.f32 %v11456_v43, %v5979_v42  ;;  %v6034_v48 = vmul.f32 %v11459_v0, %v5980_v44 }
 0xa2b   :  { %6076 = vadd.xlane.f32.xlu0 %v6075_v41  ;;  %v6035_v49 = vmul.f32 %v11468_v12, %v5981_v47  ;;  %v6036_v50 = vmul.f32 %v11471_v13, %v5982_v3  ;;  %v5879_v51 = vadd.f32 %v5746_v46, %v11423_v11  ;;  %v5880_v52 = vadd.f32 %v5750_v28, %v11421_v59 }
 0xa2c   :  { %v6068_v53 = vadd.f32 %v6034_v48, %v6033_v32  ;;  %v5881_v54 = vadd.f32 %v5754_v38, %v11431_v24  ;;  %v5882_v30 = vadd.f32 %v5758_v45, %v11429_v21  ;;  %v5710_v31 = vcombine.high %v11465_v4, %v11465_v4 }
 0xa2d   :  { %vm5911_vm10 = vcmp.ge.f32.partialorder %v5879_v51, 0.0  ;;  %vm5912_vm9 = vcmp.ge.f32.partialorder %v5880_v52, 0.0  ;;  %v5943_v33 = vmul.f32 0.2, %v5879_v51  ;;  %v5944_v55 = vmul.f32 0.2, %v5880_v52 }
 0xa2e   :  { %v6069_v8 = vadd.f32 %v6068_v53, %v6035_v49  ;;  %vm5913_vm11 = vcmp.ge.f32.partialorder %v5881_v54, 0.0  ;;  %vm5914_vm12 = vcmp.ge.f32.partialorder %v5882_v30, 0.0  ;;  %v5945_v56 = vmul.f32 0.2, %v5881_v54 }
 0xa2f   :  { %v5946_v57 = vmul.f32 0.2, %v5882_v30  ;;  %v5975_v61 = vsel %vm5911_vm10, %v5879_v51, %v5943_v33  ;;  %v5976_v14 = vsel %vm5912_vm9, %v5880_v52, %v5944_v55  ;;  %v5826_v22 = vrot.slane %v5710_v31, %v10937_v17 }
 0xa30   :  { %v6070_v58 = vadd.f32 %v6069_v8, %v6036_v50  ;;  %v5977_v60 = vsel %vm5913_vm11, %v5881_v54, %v5945_v56  ;;  %v6029_v20 = vmul.f32 %v11456_v43, %v5975_v61  ;;  %v6030_v2 = vmul.f32 %v11459_v0, %v5976_v14 }
 0xa31   :  { %v5978_v4 = vsel %vm5914_vm12, %v5882_v30, %v5946_v57  ;;  %v5830_v10 = vrot.slane %v5710_v31, %v10931_v15  ;;  %v5834_v62 = vrot.slane %v5710_v31, %v10940_v18  ;;  %v6031_v9 = vmul.f32 %v11468_v12, %v5977_v60 }
 0xa32   :  { %6071 = vadd.xlane.f32.xlu1 %v6070_v58  ;;  %v6063_v6 = vadd.f32 %v6030_v2, %v6029_v20  ;;  %v5838_v1 = vrot.slane %v5710_v31, %v10934_v16  ;;  %v5899_v5 = vadd.f32 %v5826_v22, %v11423_v11  ;;  %v6032_v23 = vmul.f32 %v11471_v13, %v5978_v4 }
 0xa33   :  { %v5900_v26 = vadd.f32 %v5830_v10, %v11421_v59  ;;  %v5901_v19 = vadd.f32 %v5834_v62, %v11431_v24  ;;  %v5708_v27 = vcombine.high %v11462_v63, %v11462_v63 }
 0xa34   :  { %v6064_v46 = vadd.f32 %v6063_v6, %v6031_v9  ;;  %v5902_v28 = vadd.f32 %v5838_v1, %v11429_v21  ;;  %vm5931_vm13 = vcmp.ge.f32.partialorder %v5899_v5, 0.0  ;;  %v5963_v29 = vmul.f32 0.2, %v5899_v5 }
 0xa35   :  { %vm5932_vm14 = vcmp.ge.f32.partialorder %v5900_v26, 0.0  ;;  %vm5933_vm15 = vcmp.ge.f32.partialorder %v5901_v19, 0.0  ;;  %v5964_v34 = vmul.f32 0.2, %v5900_v26  ;;  %v5965_v35 = vmul.f32 0.2, %v5901_v19 }
 0xa36   :  { %v6065_v36 = vadd.f32 %v6064_v46, %v6032_v23  ;;  %vm5934_vm0 = vcmp.ge.f32.partialorder %v5902_v28, 0.0  ;;  %v5966_v37 = vmul.f32 0.2, %v5902_v28  ;;  %v5995_v38 = vsel %vm5931_vm13, %v5899_v5, %v5963_v29 }
 0xa37   :  { %v5996_v39 = vsel %vm5932_vm14, %v5900_v26, %v5964_v34  ;;  %v5997_v40 = vsel %vm5933_vm15, %v5901_v19, %v5965_v35  ;;  %v6049_v41 = vmul.f32 %v11456_v43, %v5995_v38  ;;  %v5810_v42 = vrot.slane %v5708_v27, %v10937_v17 }
 0xa38   :  { %6066 = vadd.xlane.f32.xlu0 %v6065_v36  ;;  %v6050_v63 = vmul.f32 %v11459_v0, %v5996_v39  ;;  %v5814_v44 = vrot.slane %v5708_v27, %v10931_v15  ;;  %v5998_v45 = vsel %vm5934_vm0, %v5902_v28, %v5966_v37  ;;  %v5818_v47 = vrot.slane %v5708_v27, %v10940_v18 }
 0xa39   :  { %v5822_v3 = vrot.slane %v5708_v27, %v10934_v16  ;;  %v5895_v32 = vadd.f32 %v5810_v42, %v11423_v11  ;;  %v6051_v48 = vmul.f32 %v11468_v12, %v5997_v40  ;;  %v6052_v54 = vmul.f32 %v11471_v13, %v5998_v45 }
 0xa3a   :  { %v6088_v49 = vadd.f32 %v6050_v63, %v6049_v41  ;;  %v5896_v50 = vadd.f32 %v5814_v44, %v11421_v59  ;;  %v5897_v51 = vadd.f32 %v5818_v47, %v11431_v24  ;;  %v10157_v44 = vld [vmem:[#allocation10 + $0xe4] ss:$16 sps:$4 sm:$0xff]  }
 0xa3b   :  { %v5898_v52 = vadd.f32 %v5822_v3, %v11429_v21  ;;  %vm5927_vm10 = vcmp.ge.f32.partialorder %v5895_v32, 0.0  ;;  %v5959_v53 = vmul.f32 0.2, %v5895_v32  ;;  %7118 = vmatprep.subr.bf16.mxu0 %v10157_v44  ;;  %v10158_v3 = vld [vmem:[#allocation10 + $0x2e0] ss:$16 sps:$4 sm:$0xff]  }
 0xa3c   :  { %v6089_v30 = vadd.f32 %v6088_v49, %v6051_v48  ;;  %vm5928_vm9 = vcmp.ge.f32.partialorder %v5896_v50, 0.0  ;;  %v5960_v31 = vmul.f32 0.2, %v5896_v50  ;;  %vm5929_vm11 = vcmp.ge.f32.partialorder %v5897_v51, 0.0  ;;  %v10163_v48 = vld [vmem:[#allocation10 + $0xc4] ss:$16 sps:$4 sm:$0xff]  }
 0xa3d   :  { %vm5930_vm12 = vcmp.ge.f32.partialorder %v5898_v52, 0.0  ;;  %v5961_v33 = vmul.f32 0.2, %v5897_v51  ;;  %v5962_v11 = vmul.f32 0.2, %v5898_v52  ;;  %v5991_v8 = vsel %vm5927_vm10, %v5895_v32, %v5959_v53 }
 0xa3e   :  { %v6090_v55 = vadd.f32 %v6089_v30, %v6052_v54  ;;  %v5992_v56 = vsel %vm5928_vm9, %v5896_v50, %v5960_v31  ;;  %v6045_v59 = vmul.f32 %v11456_v43, %v5991_v8  ;;  %v10166_v49 = vld [vmem:[#allocation10 + $0x2c4] ss:$16 sps:$4 sm:$0xff]   ;;  %v10161_v50 = vld [vmem:[#allocation10 + $0xc0] ss:$16 sps:$4 sm:$0xff]   ;;  %vm8478_vm9 = vcmask 7168  }
 0xa3f   :  { %v5993_v57 = vsel %vm5929_vm11, %v5897_v51, %v5961_v33  ;;  %v6046_v24 = vmul.f32 %v11459_v0, %v5992_v56  ;;  %v5994_v21 = vsel %vm5930_vm12, %v5898_v52, %v5962_v11  ;;  %v10164_v51 = vld [vmem:[#allocation10 + $0x2c0] ss:$16 sps:$4 sm:$0xff]   ;;  %v10169_v52 = vld [vmem:[#allocation10 + $0xa4] ss:$16 sps:$4 sm:$0xff]  }
 0xa40   :  { %6091 = vadd.xlane.f32.xlu1 %v6090_v55  ;;  %v6047_v61 = vmul.f32 %v11468_v12, %v5993_v57  ;;  %v6048_v22 = vmul.f32 %v11471_v13, %v5994_v21  ;;  %v10172_v53 = vld [vmem:[#allocation10 + $0x2a4] ss:$16 sps:$4 sm:$0xff]   ;;  %v10167_v54 = vld [vmem:[#allocation10 + $0xa0] ss:$16 sps:$4 sm:$0xff]  }
 0xa41   :  { %v6083_v14 = vadd.f32 %v6046_v24, %v6045_v59  ;;  %v10170_v30 = vld [vmem:[#allocation10 + $0x2a0] ss:$16 sps:$4 sm:$0xff]   ;;  %v10175_v31 = vld [vmem:[#allocation10 + $0x84] ss:$16 sps:$4 sm:$0xff]  }
 0xa42   :  { %v10178_v33 = vld [vmem:[#allocation10 + $0x284] ss:$16 sps:$4 sm:$0xff]   ;;  %v10173_v11 = vld [vmem:[#allocation10 + $0x80] ss:$16 sps:$4 sm:$0xff]  }
 0xa43   :  { %v6084_v58 = vadd.f32 %v6083_v14, %v6047_v61  ;;  %v10176_v55 = vld [vmem:[#allocation10 + $0x280] ss:$16 sps:$4 sm:$0xff]   ;;  %v10181_v8 = vld [vmem:[#allocation10 + $0x64] ss:$16 sps:$4 sm:$0xff]  }
 0xa44   :  { %v10184_v56 = vld [vmem:[#allocation10 + $0x264] ss:$16 sps:$4 sm:$0xff]   ;;  %v10179_v57 = vld [vmem:[#allocation10 + $0x60] ss:$16 sps:$4 sm:$0xff]  }
 0xa45   :  { %v6085_v60 = vadd.f32 %v6084_v58, %v6048_v22  ;;  %v10182_v59 = vld [vmem:[#allocation10 + $0x260] ss:$16 sps:$4 sm:$0xff]   ;;  %v10187_v24 = vld [vmem:[#allocation10 + $0x44] ss:$16 sps:$4 sm:$0xff]  }
 0xa46   :  { %v10190_v21 = vld [vmem:[#allocation10 + $0x244] ss:$16 sps:$4 sm:$0xff]   ;;  %v10185_v61 = vld [vmem:[#allocation10 + $0x40] ss:$16 sps:$4 sm:$0xff]  }
 0xa47   :  { %6086 = vadd.xlane.f32.xlu0 %v6085_v60  ;;  %v10188_v14 = vld [vmem:[#allocation10 + $0x240] ss:$16 sps:$4 sm:$0xff]   ;;  %v10193_v22 = vld [vmem:[#allocation10 + $0x24] ss:$16 sps:$4 sm:$0xff]  }
 0xa48   :  { %v10196_v58 = vld [vmem:[#allocation10 + $0x224] ss:$16 sps:$4 sm:$0xff]   ;;  %v10191_v60 = vld [vmem:[#allocation10 + $0x20] ss:$16 sps:$4 sm:$0xff]  }
 0xa49   :  { %v10244_v44 = vld [vmem:[#allocation10 + $0x324] ss:$16 sps:$4 sm:$0xff]  }
 0xaa2   :  { %v6062_v2 = vpop.xlane.xlu1 %6061 }
 0xaa3   :  { %v6108_v9 = vrot.slane %v6062_v2, %v11117_v7  ;;  %v10199_v2 = vld [vmem:[#allocation10 + $0x4] ss:$16 sps:$4 sm:$0xff]  }
 0xaa6   :  { %v6057_v20 = vpop.xlane.xlu0 %6056 }
 0xaa7   :  { %v6104_v43 = vrot.slane %v6057_v20, %v11117_v7  ;;  %v10194_v20 = vld [vmem:[#allocation10 + $0x220] ss:$16 sps:$4 sm:$0xff]  }
 0xaa9   :  { %v6133_v12 = vsel %vm931_vm1, %v6108_v9, %v6104_v43  ;;  %vm11920_vm1 = vcmask 64512   ;;  %v10205_v9 = vld [vmem:[#allocation10 + $0x1e4] ss:$16 sps:$4 sm:$0xff]  }
 0xaaa   :  { %v10208_v43 = vld [vmem:[#allocation10 + $0x3e4] ss:$16 sps:$4 sm:$0xff]  }
 0xaac   :  { %v6082_v10 = vpop.xlane.xlu1 %6081 }
 0xaad   :  { %v6124_v27 = vrot.slane %v6082_v10, %v11117_v7  ;;  %v10197_v10 = vld [vmem:[#allocation10] ss:$16 sps:$4 sm:$0xff]  }
 0xab4   :  { %v6077_v4 = vpop.xlane.xlu0 %6076 }
 0xab5   :  { %v6120_v23 = vrot.slane %v6077_v4, %v11117_v7  ;;  %v10202_v4 = vld [vmem:[#allocation10 + $0x204] ss:$16 sps:$4 sm:$0xff]  }
 0xabb   :  { %v6072_v0 = vpop.xlane.xlu1 %6071 }
 0xabc   :  { %v6116_v1 = vrot.slane %v6072_v0, %v11117_v7  ;;  %v10203_v0 = vld [vmem:[#allocation10 + $0x1e0] ss:$16 sps:$4 sm:$0xff]  }
 0xac1   :  { %v6067_v62 = vpop.xlane.xlu0 %6066 }
 0xac2   :  { %v6112_v6 = vrot.slane %v6067_v62, %v11117_v7  ;;  %v10200_v62 = vld [vmem:[#allocation10 + $0x200] ss:$16 sps:$4 sm:$0xff]  }
 0xac4   :  { %v6134_v13 = vsel %vm933_vm2, %v6112_v6, %v6133_v12  ;;  %vm11921_vm2 = vmmov %vm11920_vm1  ;;  %v10206_v6 = vld [vmem:[#allocation10 + $0x3e0] ss:$16 sps:$4 sm:$0xff]   ;;  %v10211_v12 = vld [vmem:[#allocation10 + $0x1c4] ss:$16 sps:$4 sm:$0xff]  }
 0xac5   :  { %v6135_v5 = vsel %vm935_vm3, %v6116_v1, %v6134_v13  ;;  %vm11922_vm3 = vmmov %vm11920_vm1  ;;  %v10214_v1 = vld [vmem:[#allocation10 + $0x3c4] ss:$16 sps:$4 sm:$0xff]   ;;  %v10209_v13 = vld [vmem:[#allocation10 + $0x1c0] ss:$16 sps:$4 sm:$0xff]  }
 0xac6   :  { %v6136_v19 = vsel %vm937_vm4, %v6120_v23, %v6135_v5  ;;  %vm11923_vm4 = vmmov %vm11920_vm1  ;;  %v10212_v5 = vld [vmem:[#allocation10 + $0x3c0] ss:$16 sps:$4 sm:$0xff]   ;;  %v10217_v23 = vld [vmem:[#allocation10 + $0x1a4] ss:$16 sps:$4 sm:$0xff]  }
 0xac7   :  { %v6137_v29 = vsel %vm939_vm5, %v6124_v27, %v6136_v19  ;;  %v10215_v19 = vld [vmem:[#allocation10 + $0x1a0] ss:$16 sps:$4 sm:$0xff]  }
 0xac8   :  { %v10218_v27 = vld [vmem:[#allocation10 + $0x3a0] ss:$16 sps:$4 sm:$0xff]  }
 0xac9   :  { %v6092_v26 = vpop.xlane.xlu1 %6091 }
 0xaca   :  { %v6132_v46 = vrot.slane %v6092_v26, %v11117_v7  ;;  %v10220_v26 = vld [vmem:[#allocation10 + $0x3a4] ss:$16 sps:$4 sm:$0xff]  }
 0xad0   :  { %v6087_v28 = vpop.xlane.xlu0 %6086 }
 0xad1   :  { %v6128_v34 = vrot.slane %v6087_v28, %v11117_v7  ;;  %v10160_v7 = vld [vmem:[#allocation10 + $0x2e4] ss:$16 sps:$4 sm:$0xff]  }
 0xad2   :  { %7159 = vmatprep.subr.bf16.mxu1 %v10160_v7  ;;  %v10226_v28 = vld [vmem:[#allocation10 + $0x384] ss:$16 sps:$4 sm:$0xff]   ;;  %v10239_v7 = vld [vmem:[#allocation10 + $0x120] ss:$16 sps:$4 sm:$0xff]  }
 0xad3   :  { %v6138_v35 = vsel %vm941_vm6, %v6128_v34, %v6137_v29  ;;  %v10221_v29 = vld [vmem:[#allocation10 + $0x180] ss:$16 sps:$4 sm:$0xff]  }
 0xad4   :  { %v6139_v36 = vsel %vm943_vm7, %v6132_v46, %v6138_v35  ;;  %v10223_v46 = vld [vmem:[#allocation10 + $0x184] ss:$16 sps:$4 sm:$0xff]   ;;  %v10224_v34 = vld [vmem:[#allocation10 + $0x380] ss:$16 sps:$4 sm:$0xff]  }
 0xad5   :  { %v6141_v37 = vsel %vm888_vm8, %v6139_v36, -1e+30  ;;  %v10229_v35 = vld [vmem:[#allocation10 + $0x164] ss:$16 sps:$4 sm:$0xff]  }
 0xad6   :  { %v6142_v38 = vsel %vm11920_vm1, %v6141_v37, -inf  ;;  %v10232_v36 = vld [vmem:[#allocation10 + $0x364] ss:$16 sps:$4 sm:$0xff]  }
 0xad7   :  { %6143 = vmax.xlane.f32.xlu0 %v6142_v38  ;;  %v10230_v38 = vld [vmem:[#allocation10 + $0x360] ss:$16 sps:$4 sm:$0xff]  }
 0xb60   :  { %v6144_v39 = vpop.xlane.xlu0 %6143 }
 0xb61   :  { %v6145_v40 = vsub.f32 %v6141_v37, %v6144_v39  ;;  %v10227_v37 = vld [vmem:[#allocation10 + $0x160] ss:$16 sps:$4 sm:$0xff]  }
 0xb62   :  { %v10233_v39 = vld [vmem:[#allocation10 + $0x140] ss:$16 sps:$4 sm:$0xff]  }
 0xb63   :  { %v6146_v41 = vmul.f32 1.442695, %v6145_v40  ;;  %v10235_v40 = vld [vmem:[#allocation10 + $0x144] ss:$16 sps:$4 sm:$0xff]  }
 0xb65   :  { %10563 = vpow2.f32 %v6146_v41  ;;  %v10236_v41 = vld [vmem:[#allocation10 + $0x340] ss:$16 sps:$4 sm:$0xff]  }
 0xb72   :  { %v10564_v42 = vpop.eup %10563 }
 0xb73   :  { %v6148_v63 = vsel %vm11921_vm2, %v10564_v42, 0.0 }
 0xb74   :  { %6149 = vadd.xlane.f32.xlu1 %v6148_v63  ;;  %v10241_v63 = vld [vmem:[#allocation10 + $0x124] ss:$16 sps:$4 sm:$0xff]  }
 0xbfd   :  { %v6150_v45 = vpop.xlane.xlu1 %6149 }
 0xbfe   :  { %10565 = vrcp.f32 %v6150_v45  ;;  %v10242_v45 = vld [vmem:[#allocation10 + $0x320] ss:$16 sps:$4 sm:$0xff]  }
 0xc0b   :  { %v10566_v47 = vpop.eup %10565 }
 0xc0c   :  { %v6152_v32 = vmul.f32 %v10566_v47, %v10564_v42  ;;  %v10238_v42 = vld [vmem:[#allocation10 + $0x344] ss:$16 sps:$4 sm:$0xff]  }
 0xc0d   :  { %v10247_v47 = vld [vmem:[#allocation10 + $0x104] ss:$16 sps:$4 sm:$0xff]  }
 0xc0e   :  { %9035 = vmatmul.mubr.msk.f32.vlgmr.msra.gmra.mxu0 %vm11922_vm3, %v6152_v32  ;;  %9036 = vmatmul.mubr.msk.f32.vlgmr.msra.gmra.mxu1 %vm11923_vm4, %v6152_v32  ;;  %v10248_v32 = vld [vmem:[#allocation10 + $0x300] ss:$16 sps:$4 sm:$0xff]  }
 0xc0f   :  { %7119 = vmatpush1.bf16.msra.mxu0 %v10155_v25  ;;  %7160 = vmatpush1.bf16.msra.mxu1 %v10158_v3  ;;  %v10250_v25 = vld [vmem:[#allocation10 + $0x304] ss:$16 sps:$4 sm:$0xff]   ;;  %v10245_v3 = vld [vmem:[#allocation10 + $0x100] ss:$16 sps:$4 sm:$0xff]  }
 0xc10   :  { %7120 = vmatprep.subr.bf16.mxu0 %v10163_v48  ;;  %7161 = vmatprep.subr.bf16.mxu1 %v10166_v49  ;;  %v10253_v48 = vld [vmem:[#allocation10 + $0xec] ss:$16 sps:$4 sm:$0xff]  }
 0xc11   :  { %v10256_v49 = vld [vmem:[#allocation10 + $0x2ec] ss:$16 sps:$4 sm:$0xff]  }
 0xc13   :  { %7121 = vmatpush1.bf16.msra.mxu0 %v10161_v50  ;;  %7162 = vmatpush1.bf16.msra.mxu1 %v10164_v51  ;;  %v6153_v50 = vld [vmem:[%s11882_s20] sm:$0xf] }
 0xc14   :  { %7122 = vmatprep.subr.bf16.mxu0 %v10169_v52  ;;  %7163 = vmatprep.subr.bf16.mxu1 %v10172_v53  ;;  %v6158_v51 = vrot.slane %v6153_v50, %v10937_v17  ;;  %v6166_v52 = vrot.slane %v6153_v50, %v10940_v18  ;;  %v6162_v53 = vrot.slane %v6153_v50, %v10931_v15 }
 0xc17   :  { %7123 = vmatpush1.bf16.msra.mxu0 %v10167_v54  ;;  %7164 = vmatpush1.bf16.msra.mxu1 %v10170_v30  ;;  %v6170_v54 = vrot.slane %v6153_v50, %v10934_v16  ;;  %v10316_v50 = vld [vmem:[#allocation10 + $0x3ac] ss:$16 sps:$4 sm:$0xff]  }
 0xc18   :  { %7124 = vmatprep.subr.bf16.mxu0 %v10175_v31  ;;  %7165 = vmatprep.subr.bf16.mxu1 %v10178_v33 }
 0xc1b   :  { %7125 = vmatpush1.bf16.msra.mxu0 %v10173_v11  ;;  %7166 = vmatpush1.bf16.msra.mxu1 %v10176_v55 }
 0xc1c   :  { %7126 = vmatprep.subr.bf16.mxu0 %v10181_v8  ;;  %7167 = vmatprep.subr.bf16.mxu1 %v10184_v56 }
 0xc1f   :  { %7127 = vmatpush1.bf16.msra.mxu0 %v10179_v57  ;;  %7168 = vmatpush1.bf16.msra.mxu1 %v10182_v59 }
 0xc20   :  { %7128 = vmatprep.subr.bf16.mxu0 %v10187_v24  ;;  %7169 = vmatprep.subr.bf16.mxu1 %v10190_v21 }
 0xc23   :  { %7129 = vmatpush1.bf16.msra.mxu0 %v10185_v61  ;;  %7170 = vmatpush1.bf16.msra.mxu1 %v10188_v14 }
 0xc24   :  { %7130 = vmatprep.subr.bf16.mxu0 %v10193_v22  ;;  %7171 = vmatprep.subr.bf16.mxu1 %v10196_v58  ;;  %v10251_v22 = vld [vmem:[#allocation10 + $0xe8] ss:$16 sps:$4 sm:$0xff]  }
 0xc27   :  { %7131 = vmatpush1.bf16.msra.mxu0 %v10191_v60  ;;  %7172 = vmatpush1.bf16.msra.mxu1 %v10194_v20  ;;  %v10254_v20 = vld [vmem:[#allocation10 + $0x2e8] ss:$16 sps:$4 sm:$0xff]  }
 0xc28   :  { %7132 = vmatprep.subr.bf16.mxu0 %v10199_v2  ;;  %7173 = vmatprep.subr.bf16.mxu1 %v10202_v4  ;;  %v10259_v4 = vld [vmem:[#allocation10 + $0xcc] ss:$16 sps:$4 sm:$0xff]  }
 0xc2b   :  { %7133 = vmatpush1.bf16.msra.mxu0 %v10197_v10  ;;  %7174 = vmatpush1.bf16.msra.mxu1 %v10200_v62  ;;  %v10262_v10 = vld [vmem:[#allocation10 + $0x2cc] ss:$16 sps:$4 sm:$0xff]   ;;  %v10257_v62 = vld [vmem:[#allocation10 + $0xc8] ss:$16 sps:$4 sm:$0xff]  }
 0xc2c   :  { %7134 = vmatprep.subr.bf16.mxu0 %v10205_v9  ;;  %7175 = vmatprep.subr.bf16.mxu1 %v10208_v43  ;;  %v10260_v9 = vld [vmem:[#allocation10 + $0x2c8] ss:$16 sps:$4 sm:$0xff]   ;;  %v10265_v43 = vld [vmem:[#allocation10 + $0xac] ss:$16 sps:$4 sm:$0xff]  }
 0xc2f   :  { %7135 = vmatpush2.bf16.msra.mxu0 %v10203_v0  ;;  %7176 = vmatpush2.bf16.msra.mxu1 %v10206_v6  ;;  %v10268_v0 = vld [vmem:[#allocation10 + $0x2ac] ss:$16 sps:$4 sm:$0xff]   ;;  %v10263_v6 = vld [vmem:[#allocation10 + $0xa8] ss:$16 sps:$4 sm:$0xff]  }
 0xc30   :  { %7136 = vmatprep.subr.bf16.mxu0 %v10211_v12  ;;  %7177 = vmatprep.subr.bf16.mxu1 %v10214_v1  ;;  %v10266_v12 = vld [vmem:[#allocation10 + $0x2a8] ss:$16 sps:$4 sm:$0xff]   ;;  %v10271_v1 = vld [vmem:[#allocation10 + $0x8c] ss:$16 sps:$4 sm:$0xff]  }
 0xc33   :  { %7137 = vmatpush2.bf16.msra.mxu0 %v10209_v13  ;;  %7178 = vmatpush2.bf16.msra.mxu1 %v10212_v5  ;;  %v10274_v13 = vld [vmem:[#allocation10 + $0x28c] ss:$16 sps:$4 sm:$0xff]   ;;  %v10269_v5 = vld [vmem:[#allocation10 + $0x88] ss:$16 sps:$4 sm:$0xff]  }
 0xc34   :  { %7138 = vmatprep.subr.bf16.mxu0 %v10217_v23  ;;  %7179 = vmatprep.subr.bf16.mxu1 %v10220_v26  ;;  %v10272_v23 = vld [vmem:[#allocation10 + $0x288] ss:$16 sps:$4 sm:$0xff]   ;;  %v10277_v26 = vld [vmem:[#allocation10 + $0x6c] ss:$16 sps:$4 sm:$0xff]  }
 0xc37   :  { %7139 = vmatpush2.bf16.msra.mxu0 %v10215_v19  ;;  %7180 = vmatpush2.bf16.msra.mxu1 %v10218_v27  ;;  %v10280_v19 = vld [vmem:[#allocation10 + $0x26c] ss:$16 sps:$4 sm:$0xff]   ;;  %v10275_v27 = vld [vmem:[#allocation10 + $0x68] ss:$16 sps:$4 sm:$0xff]  }
 0xc38   :  { %7140 = vmatprep.subr.bf16.mxu0 %v10223_v46  ;;  %7181 = vmatprep.subr.bf16.mxu1 %v10226_v28  ;;  %v10278_v46 = vld [vmem:[#allocation10 + $0x268] ss:$16 sps:$4 sm:$0xff]   ;;  %v10283_v28 = vld [vmem:[#allocation10 + $0x4c] ss:$16 sps:$4 sm:$0xff]  }
 0xc3b   :  { %7141 = vmatpush2.bf16.msra.mxu0 %v10221_v29  ;;  %7182 = vmatpush2.bf16.msra.mxu1 %v10224_v34  ;;  %v10286_v29 = vld [vmem:[#allocation10 + $0x24c] ss:$16 sps:$4 sm:$0xff]   ;;  %v10281_v34 = vld [vmem:[#allocation10 + $0x48] ss:$16 sps:$4 sm:$0xff]  }
 0xc3c   :  { %7142 = vmatprep.subr.bf16.mxu0 %v10229_v35  ;;  %7183 = vmatprep.subr.bf16.mxu1 %v10232_v36  ;;  %v10284_v35 = vld [vmem:[#allocation10 + $0x248] ss:$16 sps:$4 sm:$0xff]   ;;  %v10289_v36 = vld [vmem:[#allocation10 + $0x2c] ss:$16 sps:$4 sm:$0xff]  }
 0xc3f   :  { %7143 = vmatpush2.bf16.msra.mxu0 %v10227_v37  ;;  %7184 = vmatpush2.bf16.msra.mxu1 %v10230_v38  ;;  %v10292_v37 = vld [vmem:[#allocation10 + $0x22c] ss:$16 sps:$4 sm:$0xff]   ;;  %v10287_v38 = vld [vmem:[#allocation10 + $0x28] ss:$16 sps:$4 sm:$0xff]  }
 0xc40   :  { %7144 = vmatprep.subr.bf16.mxu0 %v10235_v40  ;;  %7185 = vmatprep.subr.bf16.mxu1 %v10238_v42  ;;  %v10295_v40 = vld [vmem:[#allocation10 + $0xc] ss:$16 sps:$4 sm:$0xff]   ;;  %v10293_v42 = vld [vmem:[#allocation10 + $0x8] ss:$16 sps:$4 sm:$0xff]  }
 0xc43   :  { %7145 = vmatpush2.bf16.msra.mxu0 %v10233_v39  ;;  %7186 = vmatpush2.bf16.msra.mxu1 %v10236_v41  ;;  %v10290_v39 = vld [vmem:[#allocation10 + $0x228] ss:$16 sps:$4 sm:$0xff]   ;;  %v10298_v41 = vld [vmem:[#allocation10 + $0x20c] ss:$16 sps:$4 sm:$0xff]  }
 0xc44   :  { %7146 = vmatprep.subr.bf16.mxu0 %v10241_v63  ;;  %7187 = vmatprep.subr.bf16.mxu1 %v10244_v44  ;;  %v10296_v63 = vld [vmem:[#allocation10 + $0x208] ss:$16 sps:$4 sm:$0xff]   ;;  %v10301_v44 = vld [vmem:[#allocation10 + $0x1ec] ss:$16 sps:$4 sm:$0xff]  }
 0xc47   :  { %7147 = vmatpush2.bf16.msra.mxu0 %v10239_v7  ;;  %7188 = vmatpush2.bf16.msra.mxu1 %v10242_v45  ;;  %v10304_v7 = vld [vmem:[#allocation10 + $0x3ec] ss:$16 sps:$4 sm:$0xff]   ;;  %v10299_v45 = vld [vmem:[#allocation10 + $0x1e8] ss:$16 sps:$4 sm:$0xff]  }
 0xc48   :  { %7148 = vmatprep.subr.bf16.mxu0 %v10247_v47  ;;  %7189 = vmatprep.subr.bf16.mxu1 %v10250_v25  ;;  %v10302_v47 = vld [vmem:[#allocation10 + $0x3e8] ss:$16 sps:$4 sm:$0xff]   ;;  %v10307_v25 = vld [vmem:[#allocation10 + $0x1cc] ss:$16 sps:$4 sm:$0xff]  }
 0xc4b   :  { %7149 = vmatpush2.bf16.msra.mxu0 %v10245_v3  ;;  %7190 = vmatpush2.bf16.msra.mxu1 %v10248_v32  ;;  %v10310_v3 = vld [vmem:[#allocation10 + $0x3cc] ss:$16 sps:$4 sm:$0xff]   ;;  %v10305_v32 = vld [vmem:[#allocation10 + $0x1c8] ss:$16 sps:$4 sm:$0xff]  }
 0xc4c   :  { %7200 = vmatprep.subr.bf16.mxu0 %v10253_v48  ;;  %7241 = vmatprep.subr.bf16.mxu1 %v10256_v49  ;;  %v10308_v48 = vld [vmem:[#allocation10 + $0x3c8] ss:$16 sps:$4 sm:$0xff]   ;;  %v10313_v49 = vld [vmem:[#allocation10 + $0x1ac] ss:$16 sps:$4 sm:$0xff]  }
 0xcce   :  { %v6244_v30 = vpop.f32.mrf.mxu0  ;;  %v6315_v31 = vpop.f32.mrf.mxu1 }
 0xccf   :  { %v6245_v33 = vadd.f32 %v6244_v30, %v6158_v51  ;;  %v6316_v11 = vadd.f32 %v6315_v31, %v6166_v52  ;;  %v10311_v51 = vld [vmem:[#allocation10 + $0x1a8] ss:$16 sps:$4 sm:$0xff]  }
 0xcd0   :  { %v6246_v55 = vpop.f32.mrf.mxu0  ;;  %v6317_v8 = vpop.f32.mrf.mxu1  ;;  %v10314_v52 = vld [vmem:[#allocation10 + $0x3a8] ss:$16 sps:$4 sm:$0xff]  }
 0xcd1   :  { %10567 = vtanh.f32 %v6245_v33  ;;  %v6247_v56 = vadd.f32 %v6246_v55, %v6162_v53  ;;  %v6318_v57 = vadd.f32 %v6317_v8, %v6170_v54  ;;  %v10319_v53 = vld [vmem:[#allocation10 + $0x18c] ss:$16 sps:$4 sm:$0xff]   ;;  %v10317_v30 = vld [vmem:[#allocation10 + $0x188] ss:$16 sps:$4 sm:$0xff]  }
 0xcd2   :  { %10569 = vtanh.f32 %v6316_v11  ;;  %v10322_v54 = vld [vmem:[#allocation10 + $0x38c] ss:$16 sps:$4 sm:$0xff]   ;;  %v10320_v31 = vld [vmem:[#allocation10 + $0x388] ss:$16 sps:$4 sm:$0xff]  }
 0xcd3   :  { %10571 = vtanh.f32 %v6247_v56  ;;  %v10325_v33 = vld [vmem:[#allocation10 + $0x16c] ss:$16 sps:$4 sm:$0xff]   ;;  %v10323_v55 = vld [vmem:[#allocation10 + $0x168] ss:$16 sps:$4 sm:$0xff]  }
 0xcd4   :  { %10573 = vtanh.f32 %v6318_v57  ;;  %v10328_v11 = vld [vmem:[#allocation10 + $0x36c] ss:$16 sps:$4 sm:$0xff]   ;;  %v10326_v8 = vld [vmem:[#allocation10 + $0x368] ss:$16 sps:$4 sm:$0xff]  }
 0xcd5   :  { %v10331_v56 = vld [vmem:[#allocation10 + $0x14c] ss:$16 sps:$4 sm:$0xff]  }
 0xcd6   :  { %v10334_v57 = vld [vmem:[#allocation10 + $0x34c] ss:$16 sps:$4 sm:$0xff]  }
 0xcde   :  { %v10568_v59 = vpop.eup %10567 }
 0xcdf   :  { %v10570_v24 = vpop.eup %10569  ;;  %v11625_v58 = vpack.c.bf16 %v10568_v59, %v10568_v59  ;;  %v10329_v59 = vld [vmem:[#allocation10 + $0x148] ss:$16 sps:$4 sm:$0xff]  }
 0xce0   :  { %v10572_v21 = vpop.eup %10571  ;;  %v11627_v2 = vpack.c.bf16 %v10570_v24, %v10570_v24  ;;  %v10332_v24 = vld [vmem:[#allocation10 + $0x348] ss:$16 sps:$4 sm:$0xff]  }
 0xce1   :  { %v10574_v61 = vpop.eup %10573  ;;  %v6325_v14 = vpack.c.bf16 %v10572_v21, %v10572_v21  ;;  %v10337_v21 = vld [vmem:[#allocation10 + $0x12c] ss:$16 sps:$4 sm:$0xff]  }
 0xce2   :  { %v6327_v60 = vpack.c.bf16 %v10574_v61, %v10574_v61  ;;  %v10340_v61 = vld [vmem:[#allocation10 + $0x32c] ss:$16 sps:$4 sm:$0xff]  }
 0xce3   :  { %7150 = vmatprep.mubr.bf16.mxu0 %v6325_v14 }
 0xce4   :  { %7191 = vmatprep.mubr.bf16.mxu1 %v6327_v60  ;;  %7151 = vmatmul.mubr.bf16.vlgmr.msra.gmra.mxu0 %v11625_v58 }
 0xce5   :  { %7192 = vmatmul.mubr.bf16.vlgmr.msra.gmra.mxu1 %v11627_v2  ;;  %7201 = vmatpush1.bf16.msra.mxu0 %v10251_v22  ;;  %v10338_v22 = vld [vmem:[#allocation10 + $0x328] ss:$16 sps:$4 sm:$0xff]  }
 0xce6   :  { %7242 = vmatpush1.bf16.msra.mxu1 %v10254_v20  ;;  %7232 = vmatprep.mubr.bf16.mxu0 %v6325_v14  ;;  %v10335_v14 = vld [vmem:[#allocation10 + $0x128] ss:$16 sps:$4 sm:$0xff]   ;;  %v10346_v20 = vld [vmem:[#allocation10 + $0x30c] ss:$16 sps:$4 sm:$0xff]  }
 0xce7   :  { %7273 = vmatprep.mubr.bf16.mxu1 %v6327_v60  ;;  %7202 = vmatprep.subr.bf16.mxu0 %v10259_v4  ;;  %v10343_v60 = vld [vmem:[#allocation10 + $0x10c] ss:$16 sps:$4 sm:$0xff]   ;;  %v10341_v4 = vld [vmem:[#allocation10 + $0x108] ss:$16 sps:$4 sm:$0xff]  }
 0xce8   :  { %7243 = vmatprep.subr.bf16.mxu1 %v10262_v10  ;;  %v10344_v10 = vld [vmem:[#allocation10 + $0x308] ss:$16 sps:$4 sm:$0xff]  }
 0xce9   :  { %7203 = vmatpush1.bf16.msra.mxu0 %v10257_v62  ;;  %v10349_v62 = vld [vmem:[#allocation11 + $0xe4] ss:$16 sps:$4 sm:$0xff]  }
 0xcea   :  { %7244 = vmatpush1.bf16.msra.mxu1 %v10260_v9  ;;  %7204 = vmatprep.subr.bf16.mxu0 %v10265_v43  ;;  %v10347_v9 = vld [vmem:[#allocation11 + $0xe0] ss:$16 sps:$4 sm:$0xff]   ;;  %v10352_v43 = vld [vmem:[#allocation11 + $0xc4] ss:$16 sps:$4 sm:$0xff]  }
 0xceb   :  { %7245 = vmatprep.subr.bf16.mxu1 %v10268_v0  ;;  %v10350_v0 = vld [vmem:[#allocation11 + $0xc0] ss:$16 sps:$4 sm:$0xff]  }
 0xced   :  { %7205 = vmatpush1.bf16.msra.mxu0 %v10263_v6  ;;  %v10355_v6 = vld [vmem:[#allocation11 + $0xa4] ss:$16 sps:$4 sm:$0xff]  }
 0xcee   :  { %7246 = vmatpush1.bf16.msra.mxu1 %v10266_v12  ;;  %7206 = vmatprep.subr.bf16.mxu0 %v10271_v1  ;;  %v10353_v12 = vld [vmem:[#allocation11 + $0xa0] ss:$16 sps:$4 sm:$0xff]   ;;  %v10358_v1 = vld [vmem:[#allocation11 + $0x84] ss:$16 sps:$4 sm:$0xff]  }
 0xcef   :  { %7247 = vmatprep.subr.bf16.mxu1 %v10274_v13  ;;  %v10356_v13 = vld [vmem:[#allocation11 + $0x80] ss:$16 sps:$4 sm:$0xff]  }
 0xcf1   :  { %7207 = vmatpush1.bf16.msra.mxu0 %v10269_v5  ;;  %v10361_v5 = vld [vmem:[#allocation11 + $0x64] ss:$16 sps:$4 sm:$0xff]  }
 0xcf2   :  { %7248 = vmatpush1.bf16.msra.mxu1 %v10272_v23  ;;  %7208 = vmatprep.subr.bf16.mxu0 %v10277_v26  ;;  %v10395_v23 = vld [vmem:[#allocation11 + $0x2e0] ss:$16 sps:$4 sm:$0xff]   ;;  %v10397_v26 = vld [vmem:[#allocation11 + $0x2e4] ss:$16 sps:$4 sm:$0xff]  }
 0xcf3   :  { %7249 = vmatprep.subr.bf16.mxu1 %v10280_v19  ;;  %v10359_v19 = vld [vmem:[#allocation11 + $0x60] ss:$16 sps:$4 sm:$0xff]  }
 0xcf5   :  { %7209 = vmatpush1.bf16.msra.mxu0 %v10275_v27  ;;  %v10403_v27 = vld [vmem:[#allocation11 + $0x2c4] ss:$16 sps:$4 sm:$0xff]  }
 0xcf6   :  { %7250 = vmatpush1.bf16.msra.mxu1 %v10278_v46  ;;  %7210 = vmatprep.subr.bf16.mxu0 %v10283_v28  ;;  %v10362_v46 = vld [vmem:[#allocation11 + $0x40] ss:$16 sps:$4 sm:$0xff]   ;;  %v10367_v28 = vld [vmem:[#allocation11 + $0x24] ss:$16 sps:$4 sm:$0xff]  }
 0xcf7   :  { %7251 = vmatprep.subr.bf16.mxu1 %v10286_v29  ;;  %v10407_v29 = vld [vmem:[#allocation11 + $0x2a0] ss:$16 sps:$4 sm:$0xff]  }
 0xcf9   :  { %7211 = vmatpush1.bf16.msra.mxu0 %v10281_v34  ;;  %v10409_v34 = vld [vmem:[#allocation11 + $0x2a4] ss:$16 sps:$4 sm:$0xff]  }
 0xcfa   :  { %7252 = vmatpush1.bf16.msra.mxu1 %v10284_v35  ;;  %7212 = vmatprep.subr.bf16.mxu0 %v10289_v36  ;;  %v10365_v35 = vld [vmem:[#allocation11 + $0x20] ss:$16 sps:$4 sm:$0xff]   ;;  %v10370_v36 = vld [vmem:[#allocation11 + $0x4] ss:$16 sps:$4 sm:$0xff]  }
 0xcfb   :  { %7253 = vmatprep.subr.bf16.mxu1 %v10292_v37  ;;  %v10413_v37 = vld [vmem:[#allocation11 + $0x280] ss:$16 sps:$4 sm:$0xff]  }
 0xcfd   :  { %7213 = vmatpush1.bf16.msra.mxu0 %v10287_v38  ;;  %v10415_v38 = vld [vmem:[#allocation11 + $0x284] ss:$16 sps:$4 sm:$0xff]  }
 0xcfe   :  { %7254 = vmatpush1.bf16.msra.mxu1 %v10290_v39  ;;  %7214 = vmatprep.subr.bf16.mxu0 %v10295_v40  ;;  %v10368_v39 = vld [vmem:[#allocation11] ss:$16 sps:$4 sm:$0xff]   ;;  %v10373_v40 = vld [vmem:[#allocation11 + $0x1e4] ss:$16 sps:$4 sm:$0xff]  }
 0xcff   :  { %7255 = vmatprep.subr.bf16.mxu1 %v10298_v41  ;;  %v10419_v41 = vld [vmem:[#allocation11 + $0x260] ss:$16 sps:$4 sm:$0xff]  }
 0xd01   :  { %7215 = vmatpush1.bf16.msra.mxu0 %v10293_v42  ;;  %v10421_v42 = vld [vmem:[#allocation11 + $0x264] ss:$16 sps:$4 sm:$0xff]  }
 0xd02   :  { %7256 = vmatpush1.bf16.msra.mxu1 %v10296_v63  ;;  %7216 = vmatprep.subr.bf16.mxu0 %v10301_v44  ;;  %v10371_v63 = vld [vmem:[#allocation11 + $0x1e0] ss:$16 sps:$4 sm:$0xff]   ;;  %v10376_v44 = vld [vmem:[#allocation11 + $0x1c4] ss:$16 sps:$4 sm:$0xff]  }
 0xd03   :  { %7257 = vmatprep.subr.bf16.mxu1 %v10304_v7  ;;  %v10425_v7 = vld [vmem:[#allocation11 + $0x240] ss:$16 sps:$4 sm:$0xff]  }
 0xd05   :  { %7217 = vmatpush2.bf16.msra.mxu0 %v10299_v45  ;;  %v10427_v45 = vld [vmem:[#allocation11 + $0x244] ss:$16 sps:$4 sm:$0xff]  }
 0xd06   :  { %7258 = vmatpush2.bf16.msra.mxu1 %v10302_v47  ;;  %7218 = vmatprep.subr.bf16.mxu0 %v10307_v25  ;;  %v10374_v47 = vld [vmem:[#allocation11 + $0x1c0] ss:$16 sps:$4 sm:$0xff]   ;;  %v10379_v25 = vld [vmem:[#allocation11 + $0x1a4] ss:$16 sps:$4 sm:$0xff]  }
 0xd07   :  { %7259 = vmatprep.subr.bf16.mxu1 %v10310_v3  ;;  %v10431_v3 = vld [vmem:[#allocation11 + $0x220] ss:$16 sps:$4 sm:$0xff]  }
 0xd09   :  { %7219 = vmatpush2.bf16.msra.mxu0 %v10305_v32  ;;  %v10433_v32 = vld [vmem:[#allocation11 + $0x224] ss:$16 sps:$4 sm:$0xff]  }
 0xd0a   :  { %7260 = vmatpush2.bf16.msra.mxu1 %v10308_v48  ;;  %7220 = vmatprep.subr.bf16.mxu0 %v10313_v49  ;;  %v10377_v48 = vld [vmem:[#allocation11 + $0x1a0] ss:$16 sps:$4 sm:$0xff]   ;;  %v10382_v49 = vld [vmem:[#allocation11 + $0x184] ss:$16 sps:$4 sm:$0xff]  }
 0xd0b   :  { %7261 = vmatprep.subr.bf16.mxu1 %v10316_v50  ;;  %v10437_v50 = vld [vmem:[#allocation11 + $0x200] ss:$16 sps:$4 sm:$0xff]  }
 0xd0d   :  { %7221 = vmatpush2.bf16.msra.mxu0 %v10311_v51  ;;  %v10439_v51 = vld [vmem:[#allocation11 + $0x204] ss:$16 sps:$4 sm:$0xff]  }
 0xd0e   :  { %7262 = vmatpush2.bf16.msra.mxu1 %v10314_v52  ;;  %7222 = vmatprep.subr.bf16.mxu0 %v10319_v53  ;;  %v10380_v52 = vld [vmem:[#allocation11 + $0x180] ss:$16 sps:$4 sm:$0xff]   ;;  %v10385_v53 = vld [vmem:[#allocation11 + $0x164] ss:$16 sps:$4 sm:$0xff]  }
 0xd0f   :  { %7263 = vmatprep.subr.bf16.mxu1 %v10322_v54  ;;  %v10443_v54 = vld [vmem:[#allocation11 + $0x3e0] ss:$16 sps:$4 sm:$0xff]  }
 0xd11   :  { %7223 = vmatpush2.bf16.msra.mxu0 %v10317_v30  ;;  %v10445_v30 = vld [vmem:[#allocation11 + $0x3e4] ss:$16 sps:$4 sm:$0xff]  }
 0xd12   :  { %7264 = vmatpush2.bf16.msra.mxu1 %v10320_v31  ;;  %7224 = vmatprep.subr.bf16.mxu0 %v10325_v33  ;;  %v10383_v31 = vld [vmem:[#allocation11 + $0x160] ss:$16 sps:$4 sm:$0xff]   ;;  %v10388_v33 = vld [vmem:[#allocation11 + $0x144] ss:$16 sps:$4 sm:$0xff]  }
 0xd13   :  { %7265 = vmatprep.subr.bf16.mxu1 %v10328_v11  ;;  %v10449_v11 = vld [vmem:[#allocation11 + $0x3c0] ss:$16 sps:$4 sm:$0xff]  }
 0xd15   :  { %7225 = vmatpush2.bf16.msra.mxu0 %v10323_v55  ;;  %v10451_v55 = vld [vmem:[#allocation11 + $0x3c4] ss:$16 sps:$4 sm:$0xff]  }
 0xd16   :  { %7266 = vmatpush2.bf16.msra.mxu1 %v10326_v8  ;;  %7226 = vmatprep.subr.bf16.mxu0 %v10331_v56  ;;  %v10386_v8 = vld [vmem:[#allocation11 + $0x140] ss:$16 sps:$4 sm:$0xff]   ;;  %v10391_v56 = vld [vmem:[#allocation11 + $0x124] ss:$16 sps:$4 sm:$0xff]  }
 0xd17   :  { %7267 = vmatprep.subr.bf16.mxu1 %v10334_v57  ;;  %v10455_v57 = vld [vmem:[#allocation11 + $0x3a0] ss:$16 sps:$4 sm:$0xff]  }
 0xd19   :  { %7227 = vmatpush2.bf16.msra.mxu0 %v10329_v59  ;;  %v10457_v59 = vld [vmem:[#allocation11 + $0x3a4] ss:$16 sps:$4 sm:$0xff]  }
 0xd1a   :  { %7268 = vmatpush2.bf16.msra.mxu1 %v10332_v24  ;;  %7228 = vmatprep.subr.bf16.mxu0 %v10337_v21  ;;  %v10389_v24 = vld [vmem:[#allocation11 + $0x120] ss:$16 sps:$4 sm:$0xff]   ;;  %v10394_v21 = vld [vmem:[#allocation11 + $0x104] ss:$16 sps:$4 sm:$0xff]  }
 0xd1b   :  { %7269 = vmatprep.subr.bf16.mxu1 %v10340_v61  ;;  %v10461_v61 = vld [vmem:[#allocation11 + $0x380] ss:$16 sps:$4 sm:$0xff]  }
 0xd1d   :  { %7229 = vmatpush2.bf16.msra.mxu0 %v10335_v14  ;;  %v10463_v14 = vld [vmem:[#allocation11 + $0x384] ss:$16 sps:$4 sm:$0xff]  }
 0xd1e   :  { %7270 = vmatpush2.bf16.msra.mxu1 %v10338_v22  ;;  %7230 = vmatprep.subr.bf16.mxu0 %v10343_v60  ;;  %v10392_v22 = vld [vmem:[#allocation11 + $0x100] ss:$16 sps:$4 sm:$0xff]   ;;  %v10400_v60 = vld [vmem:[#allocation11 + $0xec] ss:$16 sps:$4 sm:$0xff]  }
 0xd1f   :  { %7271 = vmatprep.subr.bf16.mxu1 %v10346_v20  ;;  %v10467_v20 = vld [vmem:[#allocation11 + $0x360] ss:$16 sps:$4 sm:$0xff]  }
 0xd21   :  { %7231 = vmatpush2.bf16.msra.mxu0 %v10341_v4  ;;  %v10469_v4 = vld [vmem:[#allocation11 + $0x364] ss:$16 sps:$4 sm:$0xff]  }
 0xd22   :  { %7272 = vmatpush2.bf16.msra.mxu1 %v10344_v10  ;;  %8088 = vmatprep.subr.bf16.mxu0 %v10349_v62  ;;  %v10473_v10 = vld [vmem:[#allocation11 + $0x340] ss:$16 sps:$4 sm:$0xff]   ;;  %v10475_v62 = vld [vmem:[#allocation11 + $0x344] ss:$16 sps:$4 sm:$0xff]  }
 0xd23   :  { %8129 = vmatprep.subr.bf16.mxu1 %v10397_v26 }
 0xd24   :  { %7233 = vmatmul.mubr.bf16.vlgmr.msra.gmra.mxu0 %v11625_v58  ;;  %v10364_v58 = vld [vmem:[#allocation11 + $0x44] ss:$16 sps:$4 sm:$0xff]  }
 0xd25   :  { %7274 = vmatmul.mubr.bf16.vlgmr.msra.gmra.mxu1 %v11627_v2  ;;  %8089 = vmatpush1.bf16.msra.mxu0 %v10347_v9  ;;  %v10401_v2 = vld [vmem:[#allocation11 + $0x2c0] ss:$16 sps:$4 sm:$0xff]   ;;  %v10481_v9 = vld [vmem:[#allocation11 + $0x324] ss:$16 sps:$4 sm:$0xff]  }
 0xd26   :  { %8090 = vmatprep.subr.bf16.mxu0 %v10352_v43  ;;  %8130 = vmatpush1.bf16.msra.mxu1 %v10395_v23  ;;  %v10479_v43 = vld [vmem:[#allocation11 + $0x320] ss:$16 sps:$4 sm:$0xff]  }
 0xd27   :  { %8131 = vmatprep.subr.bf16.mxu1 %v10403_v27 }
 0xd29   :  { %8091 = vmatpush1.bf16.msra.mxu0 %v10350_v0  ;;  %v10487_v0 = vld [vmem:[#allocation11 + $0x304] ss:$16 sps:$4 sm:$0xff]  }
 0xd2a   :  { %8092 = vmatprep.subr.bf16.mxu0 %v10355_v6  ;;  %8132 = vmatpush1.bf16.msra.mxu1 %v10401_v2  ;;  %v10485_v6 = vld [vmem:[#allocation11 + $0x300] ss:$16 sps:$4 sm:$0xff]  }
 0xd2b   :  { %8133 = vmatprep.subr.bf16.mxu1 %v10409_v34 }
 0xd2d   :  { %8093 = vmatpush1.bf16.msra.mxu0 %v10353_v12  ;;  %v10493_v12 = vld [vmem:[#allocation11 + $0x2ec] ss:$16 sps:$4 sm:$0xff]  }
 0xd2e   :  { %8094 = vmatprep.subr.bf16.mxu0 %v10358_v1  ;;  %8134 = vmatpush1.bf16.msra.mxu1 %v10407_v29  ;;  %v11636_v1 = vld [vmem:[%s11884_s22] sm:$0xf] }
 0xd2f   :  { %8135 = vmatprep.subr.bf16.mxu1 %v10415_v38 }
 0xd31   :  { %8095 = vmatpush1.bf16.msra.mxu0 %v10356_v13  ;;  %v6461_v13 = vrot.slane %v11636_v1, %v10937_v17 }
 0xd32   :  { %8096 = vmatprep.subr.bf16.mxu0 %v10361_v5  ;;  %8136 = vmatpush1.bf16.msra.mxu1 %v10413_v37  ;;  %v6465_v5 = vrot.slane %v11636_v1, %v10931_v15 }
 0xd33   :  { %8137 = vmatprep.subr.bf16.mxu1 %v10421_v42  ;;  %v10398_v42 = vld [vmem:[#allocation11 + $0xe8] ss:$16 sps:$4 sm:$0xff]  }
 0xd35   :  { %8097 = vmatpush1.bf16.msra.mxu0 %v10359_v19 }
 0xd36   :  { %8098 = vmatprep.subr.bf16.mxu0 %v10364_v58  ;;  %8138 = vmatpush1.bf16.msra.mxu1 %v10419_v41 }
 0xd37   :  { %8139 = vmatprep.subr.bf16.mxu1 %v10427_v45  ;;  %v10412_v45 = vld [vmem:[#allocation11 + $0xac] ss:$16 sps:$4 sm:$0xff]  }
 0xd39   :  { %8099 = vmatpush1.bf16.msra.mxu0 %v10362_v46 }
 0xd3a   :  { %8100 = vmatprep.subr.bf16.mxu0 %v10367_v28  ;;  %8140 = vmatpush1.bf16.msra.mxu1 %v10425_v7  ;;  %v10404_v7 = vld [vmem:[#allocation11 + $0xc8] ss:$16 sps:$4 sm:$0xff]  }
 0xd3b   :  { %8141 = vmatprep.subr.bf16.mxu1 %v10433_v32  ;;  %v10424_v32 = vld [vmem:[#allocation11 + $0x6c] ss:$16 sps:$4 sm:$0xff]  }
 0xd3d   :  { %8101 = vmatpush1.bf16.msra.mxu0 %v10365_v35 }
 0xd3e   :  { %8102 = vmatprep.subr.bf16.mxu0 %v10370_v36  ;;  %8142 = vmatpush1.bf16.msra.mxu1 %v10431_v3  ;;  %v10416_v3 = vld [vmem:[#allocation11 + $0x88] ss:$16 sps:$4 sm:$0xff]  }
 0xd3f   :  { %8143 = vmatprep.subr.bf16.mxu1 %v10439_v51  ;;  %v10436_v51 = vld [vmem:[#allocation11 + $0x2c] ss:$16 sps:$4 sm:$0xff]  }
 0xd41   :  { %8103 = vmatpush1.bf16.msra.mxu0 %v10368_v39 }
 0xd42   :  { %8104 = vmatprep.subr.bf16.mxu0 %v10373_v40  ;;  %8144 = vmatpush1.bf16.msra.mxu1 %v10437_v50  ;;  %v10428_v50 = vld [vmem:[#allocation11 + $0x48] ss:$16 sps:$4 sm:$0xff]  }
 0xd43   :  { %8145 = vmatprep.subr.bf16.mxu1 %v10445_v30  ;;  %v10448_v30 = vld [vmem:[#allocation11 + $0x1ec] ss:$16 sps:$4 sm:$0xff]  }
 0xd45   :  { %8105 = vmatpush2.bf16.msra.mxu0 %v10371_v63 }
 0xd46   :  { %8106 = vmatprep.subr.bf16.mxu0 %v10376_v44  ;;  %8146 = vmatpush2.bf16.msra.mxu1 %v10443_v54  ;;  %v10406_v44 = vld [vmem:[#allocation11 + $0xcc] ss:$16 sps:$4 sm:$0xff]   ;;  %v10440_v54 = vld [vmem:[#allocation11 + $0x8] ss:$16 sps:$4 sm:$0xff]  }
 0xd47   :  { %8147 = vmatprep.subr.bf16.mxu1 %v10451_v55  ;;  %v10460_v55 = vld [vmem:[#allocation11 + $0x1ac] ss:$16 sps:$4 sm:$0xff]  }
 0xd49   :  { %8107 = vmatpush2.bf16.msra.mxu0 %v10374_v47  ;;  %v10410_v47 = vld [vmem:[#allocation11 + $0xa8] ss:$16 sps:$4 sm:$0xff]  }
 0xd4a   :  { %8108 = vmatprep.subr.bf16.mxu0 %v10379_v25  ;;  %8148 = vmatpush2.bf16.msra.mxu1 %v10449_v11  ;;  %v10418_v25 = vld [vmem:[#allocation11 + $0x8c] ss:$16 sps:$4 sm:$0xff]   ;;  %v10452_v11 = vld [vmem:[#allocation11 + $0x1c8] ss:$16 sps:$4 sm:$0xff]  }
 0xd4b   :  { %8149 = vmatprep.subr.bf16.mxu1 %v10457_v59  ;;  %v10472_v59 = vld [vmem:[#allocation11 + $0x16c] ss:$16 sps:$4 sm:$0xff]  }
 0xd4d   :  { %8109 = vmatpush2.bf16.msra.mxu0 %v10377_v48  ;;  %v10422_v48 = vld [vmem:[#allocation11 + $0x68] ss:$16 sps:$4 sm:$0xff]  }
 0xd4e   :  { %8110 = vmatprep.subr.bf16.mxu0 %v10382_v49  ;;  %8150 = vmatpush2.bf16.msra.mxu1 %v10455_v57  ;;  %v10430_v49 = vld [vmem:[#allocation11 + $0x4c] ss:$16 sps:$4 sm:$0xff]   ;;  %v10464_v57 = vld [vmem:[#allocation11 + $0x188] ss:$16 sps:$4 sm:$0xff]  }
 0xd4f   :  { %8151 = vmatprep.subr.bf16.mxu1 %v10463_v14  ;;  %v10476_v14 = vld [vmem:[#allocation11 + $0x148] ss:$16 sps:$4 sm:$0xff]  }
 0xd51   :  { %8111 = vmatpush2.bf16.msra.mxu0 %v10380_v52  ;;  %v10434_v52 = vld [vmem:[#allocation11 + $0x28] ss:$16 sps:$4 sm:$0xff]  }
 0xd52   :  { %8112 = vmatprep.subr.bf16.mxu0 %v10385_v53  ;;  %8152 = vmatpush2.bf16.msra.mxu1 %v10461_v61  ;;  %v10442_v53 = vld [vmem:[#allocation11 + $0xc] ss:$16 sps:$4 sm:$0xff]   ;;  %v6469_v61 = vrot.slane %v11636_v1, %v10940_v18 }
 0xd53   :  { %8153 = vmatprep.subr.bf16.mxu1 %v10469_v4 }
 0xd55   :  { %8113 = vmatpush2.bf16.msra.mxu0 %v10383_v31  ;;  %v10446_v31 = vld [vmem:[#allocation11 + $0x1e8] ss:$16 sps:$4 sm:$0xff]  }
 0xd56   :  { %8114 = vmatprep.subr.bf16.mxu0 %v10388_v33  ;;  %8154 = vmatpush2.bf16.msra.mxu1 %v10467_v20  ;;  %v10454_v33 = vld [vmem:[#allocation11 + $0x1cc] ss:$16 sps:$4 sm:$0xff]  }
 0xd57   :  { %8155 = vmatprep.subr.bf16.mxu1 %v10475_v62 }
 0xd59   :  { %8115 = vmatpush2.bf16.msra.mxu0 %v10386_v8  ;;  %v10458_v8 = vld [vmem:[#allocation11 + $0x1a8] ss:$16 sps:$4 sm:$0xff]  }
 0xd5a   :  { %8116 = vmatprep.subr.bf16.mxu0 %v10391_v56  ;;  %8156 = vmatpush2.bf16.msra.mxu1 %v10473_v10  ;;  %v10466_v56 = vld [vmem:[#allocation11 + $0x18c] ss:$16 sps:$4 sm:$0xff]  }
 0xd5b   :  { %8157 = vmatprep.subr.bf16.mxu1 %v10481_v9  ;;  %v10482_v9 = vld [vmem:[#allocation11 + $0x128] ss:$16 sps:$4 sm:$0xff]  }
 0xd5d   :  { %8117 = vmatpush2.bf16.msra.mxu0 %v10389_v24  ;;  %v10470_v24 = vld [vmem:[#allocation11 + $0x168] ss:$16 sps:$4 sm:$0xff]  }
 0xd5e   :  { %8118 = vmatprep.subr.bf16.mxu0 %v10394_v21  ;;  %8158 = vmatpush2.bf16.msra.mxu1 %v10479_v43  ;;  %v10478_v21 = vld [vmem:[#allocation11 + $0x14c] ss:$16 sps:$4 sm:$0xff]  }
 0xd5f   :  { %8159 = vmatprep.subr.bf16.mxu1 %v10487_v0 }
 0xd61   :  { %8119 = vmatpush2.bf16.msra.mxu0 %v10392_v22  ;;  %v6473_v22 = vrot.slane %v11636_v1, %v10934_v16  ;;  %v10488_v1 = vld [vmem:[#allocation11 + $0x108] ss:$16 sps:$4 sm:$0xff]  }
 0xd62   :  { %8170 = vmatprep.subr.bf16.mxu0 %v10400_v60  ;;  %8160 = vmatpush2.bf16.msra.mxu1 %v10485_v6  ;;  %v10484_v60 = vld [vmem:[#allocation11 + $0x12c] ss:$16 sps:$4 sm:$0xff]  }
 0xd63   :  { %8211 = vmatprep.subr.bf16.mxu1 %v10493_v12  ;;  %v10490_v12 = vld [vmem:[#allocation11 + $0x10c] ss:$16 sps:$4 sm:$0xff]  }
 0xda4   :  { %v7152_v23 = vpop.f32.mrf.mxu0 }
 0xda5   :  { %v7153_v26 = vadd.f32 %v7152_v23, %v6461_v13  ;;  %v7193_v19 = vpop.f32.mrf.mxu1 }
 0xda6   :  { %v7154_v58 = vpop.f32.mrf.mxu0 }
 0xda7   :  { %v7194_v2 = vadd.f32 %v7193_v19, %v7153_v26  ;;  %v7155_v27 = vadd.f32 %v7154_v58, %v6465_v5  ;;  %v7195_v46 = vpop.f32.mrf.mxu1 }
 0xda8   :  { %v7156_v28 = vpop.f32.mrf.mxu0 }
 0xda9   :  { %vm7282_vm5 = vcmp.ge.f32.partialorder %v7194_v2, 0.0  ;;  %v7286_v29 = vmul.f32 0.01, %v7194_v2  ;;  %v7196_v34 = vadd.f32 %v7195_v46, %v7155_v27  ;;  %v7197_v35 = vpop.f32.mrf.mxu1 }
 0xdaa   :  { %v7157_v36 = vpop.f32.mrf.mxu0  ;;  %v10496_v35 = vld [vmem:[#allocation11 + $0x2cc] ss:$16 sps:$4 sm:$0xff]  }
 0xdab   :  { %vm7283_vm6 = vcmp.ge.f32.partialorder %v7196_v34, 0.0  ;;  %v7287_v37 = vmul.f32 0.01, %v7196_v34  ;;  %v7198_v38 = vpop.f32.mrf.mxu1  ;;  %v7290_v39 = vsel %vm7282_vm5, %v7194_v2, %v7286_v29  ;;  %v10491_v29 = vld [vmem:[#allocation11 + $0x2e8] ss:$16 sps:$4 sm:$0xff]  }
 0xdac   :  { %v11642_v63 = vpack.c.bf16 %v7290_v39, %v7290_v39  ;;  %v10494_v36 = vld [vmem:[#allocation11 + $0x2c8] ss:$16 sps:$4 sm:$0xff]   ;;  %v10502_v39 = vld [vmem:[#allocation11 + $0x28c] ss:$16 sps:$4 sm:$0xff]  }
 0xdad   :  { %v7291_v40 = vsel %vm7283_vm6, %v7196_v34, %v7287_v37  ;;  %v10499_v37 = vld [vmem:[#allocation11 + $0x2ac] ss:$16 sps:$4 sm:$0xff]   ;;  %v10497_v38 = vld [vmem:[#allocation11 + $0x2a8] ss:$16 sps:$4 sm:$0xff]  }
 0xdae   :  { %v7295_v41 = vpack.c.bf16 %v7291_v40, %v7291_v40  ;;  %v8295_v40 = vld [vmem:[%s11887_s25 + $0xf8] sm:$0xff] }
 0xdb0   :  { %8120 = vmatprep.mubr.bf16.mxu0 %v7295_v41 }
 0xdb1   :  { %8121 = vmatmul.mubr.bf16.vlgmr.msra.gmra.mxu0 %v11642_v63 }
 0xdb2   :  { %8171 = vmatpush1.bf16.msra.mxu0 %v10398_v42  ;;  %8202 = vmatprep.mubr.bf16.mxu0 %v7295_v41  ;;  %v8279_v41 = vld [vmem:[%s11887_s25 + $0x78] sm:$0xff]  ;;  %v8294_v42 = vld [vmem:[%s11887_s25 + $0xf0] sm:$0xff] }
 0xdb3   :  { %8172 = vmatprep.subr.bf16.mxu0 %v10406_v44  ;;  %v8293_v44 = vld [vmem:[%s11887_s25 + $0xe8] sm:$0xff] }
 0xdb6   :  { %8173 = vmatpush1.bf16.msra.mxu0 %v10404_v7  ;;  %v10500_v7 = vld [vmem:[#allocation11 + $0x288] ss:$16 sps:$4 sm:$0xff]  }
 0xdb7   :  { %8174 = vmatprep.subr.bf16.mxu0 %v10412_v45  ;;  %v8277_v45 = vld [vmem:[%s11887_s25 + $0x68] sm:$0xff] }
 0xdba   :  { %8175 = vmatpush1.bf16.msra.mxu0 %v10410_v47  ;;  %v10505_v47 = vld [vmem:[#allocation11 + $0x26c] ss:$16 sps:$4 sm:$0xff]  }
 0xdbb   :  { %8176 = vmatprep.subr.bf16.mxu0 %v10418_v25  ;;  %v8292_v25 = vld [vmem:[%s11887_s25 + $0xe0] sm:$0xff] }
 0xdbe   :  { %8177 = vmatpush1.bf16.msra.mxu0 %v10416_v3  ;;  %v8276_v3 = vld [vmem:[%s11887_s25 + $0x60] sm:$0xff] }
 0xdbf   :  { %8178 = vmatprep.subr.bf16.mxu0 %v10424_v32  ;;  %v8291_v32 = vld [vmem:[%s11887_s25 + $0xd8] sm:$0xff] }
 0xdc2   :  { %8179 = vmatpush1.bf16.msra.mxu0 %v10422_v48  ;;  %v10503_v48 = vld [vmem:[#allocation11 + $0x268] ss:$16 sps:$4 sm:$0xff]  }
 0xdc3   :  { %8180 = vmatprep.subr.bf16.mxu0 %v10430_v49  ;;  %v8275_v49 = vld [vmem:[%s11887_s25 + $0x58] sm:$0xff] }
 0xdc6   :  { %8181 = vmatpush1.bf16.msra.mxu0 %v10428_v50  ;;  %v10508_v50 = vld [vmem:[#allocation11 + $0x24c] ss:$16 sps:$4 sm:$0xff]  }
 0xdc7   :  { %8182 = vmatprep.subr.bf16.mxu0 %v10436_v51  ;;  %v8290_v51 = vld [vmem:[%s11887_s25 + $0xd0] sm:$0xff] }
 0xdca   :  { %8183 = vmatpush1.bf16.msra.mxu0 %v10434_v52  ;;  %v8274_v52 = vld [vmem:[%s11887_s25 + $0x50] sm:$0xff] }
 0xdcb   :  { %8184 = vmatprep.subr.bf16.mxu0 %v10442_v53  ;;  %v8289_v53 = vld [vmem:[%s11887_s25 + $0xc8] sm:$0xff] }
 0xdce   :  { %8185 = vmatpush1.bf16.msra.mxu0 %v10440_v54  ;;  %v10506_v54 = vld [vmem:[#allocation11 + $0x248] ss:$16 sps:$4 sm:$0xff]  }
 0xdcf   :  { %8186 = vmatprep.subr.bf16.mxu0 %v10448_v30  ;;  %v8273_v30 = vld [vmem:[%s11887_s25 + $0x48] sm:$0xff] }
 0xdd2   :  { %8187 = vmatpush2.bf16.msra.mxu0 %v10446_v31  ;;  %v10511_v31 = vld [vmem:[#allocation11 + $0x22c] ss:$16 sps:$4 sm:$0xff]  }
 0xdd3   :  { %8188 = vmatprep.subr.bf16.mxu0 %v10454_v33  ;;  %v8288_v33 = vld [vmem:[%s11887_s25 + $0xc0] sm:$0xff] }
 0xdd6   :  { %8189 = vmatpush2.bf16.msra.mxu0 %v10452_v11  ;;  %v8272_v11 = vld [vmem:[%s11887_s25 + $0x40] sm:$0xff] }
 0xdd7   :  { %8190 = vmatprep.subr.bf16.mxu0 %v10460_v55  ;;  %v8287_v55 = vld [vmem:[%s11887_s25 + $0xb8] sm:$0xff] }
 0xdda   :  { %8191 = vmatpush2.bf16.msra.mxu0 %v10458_v8  ;;  %v10509_v8 = vld [vmem:[#allocation11 + $0x228] ss:$16 sps:$4 sm:$0xff]  }
 0xddb   :  { %8192 = vmatprep.subr.bf16.mxu0 %v10466_v56  ;;  %v8271_v56 = vld [vmem:[%s11887_s25 + $0x38] sm:$0xff] }
 0xdde   :  { %8193 = vmatpush2.bf16.msra.mxu0 %v10464_v57  ;;  %v10514_v57 = vld [vmem:[#allocation11 + $0x20c] ss:$16 sps:$4 sm:$0xff]  }
 0xddf   :  { %8194 = vmatprep.subr.bf16.mxu0 %v10472_v59  ;;  %v8286_v59 = vld [vmem:[%s11887_s25 + $0xb0] sm:$0xff] }
 0xde2   :  { %8195 = vmatpush2.bf16.msra.mxu0 %v10470_v24  ;;  %v8270_v24 = vld [vmem:[%s11887_s25 + $0x30] sm:$0xff] }
 0xde3   :  { %8196 = vmatprep.subr.bf16.mxu0 %v10478_v21  ;;  %v8285_v21 = vld [vmem:[%s11887_s25 + $0xa8] sm:$0xff] }
 0xde4   :  { %v7234_v20 = vpop.f32.mrf.mxu0 }
 0xde5   :  { %v7235_v4 = vadd.f32 %v7234_v20, %v6469_v61  ;;  %v7275_v10 = vpop.f32.mrf.mxu1  ;;  %v10512_v61 = vld [vmem:[#allocation11 + $0x208] ss:$16 sps:$4 sm:$0xff]  }
 0xde6   :  { %v7236_v62 = vpop.f32.mrf.mxu0  ;;  %8197 = vmatpush2.bf16.msra.mxu0 %v10476_v14  ;;  %v8269_v14 = vld [vmem:[%s11887_s25 + $0x28] sm:$0xff] }
 0xde7   :  { %v7276_v43 = vadd.f32 %v7275_v10, %v7235_v4  ;;  %v7237_v0 = vadd.f32 %v7236_v62, %v6473_v22  ;;  %v7277_v6 = vpop.f32.mrf.mxu1  ;;  %8198 = vmatprep.subr.bf16.mxu0 %v10484_v60  ;;  %v10517_v22 = vld [vmem:[#allocation11 + $0x3ec] ss:$16 sps:$4 sm:$0xff]   ;;  %v10515_v20 = vld [vmem:[#allocation11 + $0x3e8] ss:$16 sps:$4 sm:$0xff]  }
 0xde8   :  { %v7238_v13 = vpop.f32.mrf.mxu0  ;;  %v8284_v60 = vld [vmem:[%s11887_s25 + $0xa0] sm:$0xff]  ;;  %v10518_v10 = vld [vmem:[#allocation11 + $0x3c8] ss:$16 sps:$4 sm:$0xff]  }
 0xde9   :  { %vm7284_vm7 = vcmp.ge.f32.partialorder %v7276_v43, 0.0  ;;  %v7288_v5 = vmul.f32 0.01, %v7276_v43  ;;  %v7278_v23 = vadd.f32 %v7277_v6, %v7237_v0  ;;  %v7279_v26 = vpop.f32.mrf.mxu1  ;;  %v10520_v4 = vld [vmem:[#allocation11 + $0x3cc] ss:$16 sps:$4 sm:$0xff]  }
 0xdea   :  { %v7239_v19 = vpop.f32.mrf.mxu0  ;;  %8199 = vmatpush2.bf16.msra.mxu0 %v10482_v9  ;;  %v10523_v62 = vld [vmem:[#allocation11 + $0x3ac] ss:$16 sps:$4 sm:$0xff]   ;;  %v10521_v9 = vld [vmem:[#allocation11 + $0x3a8] ss:$16 sps:$4 sm:$0xff]  }
 0xdeb   :  { %vm7285_vm8 = vcmp.ge.f32.partialorder %v7278_v23, 0.0  ;;  %v7289_v58 = vmul.f32 0.01, %v7278_v23  ;;  %v7280_v2 = vpop.f32.mrf.mxu1  ;;  %8200 = vmatprep.subr.bf16.mxu0 %v10490_v12  ;;  %v7292_v27 = vsel %vm7284_vm7, %v7276_v43, %v7288_v5  ;;  %v10526_v43 = vld [vmem:[#allocation11 + $0x38c] ss:$16 sps:$4 sm:$0xff]  }
 0xdec   :  { %v11649_v34 = vpack.c.bf16 %v7292_v27, %v7292_v27  ;;  %v10524_v0 = vld [vmem:[#allocation11 + $0x388] ss:$16 sps:$4 sm:$0xff]   ;;  %v10529_v6 = vld [vmem:[#allocation11 + $0x36c] ss:$16 sps:$4 sm:$0xff]  }
 0xded   :  { %v7293_v46 = vsel %vm7285_vm8, %v7278_v23, %v7289_v58  ;;  %v10527_v12 = vld [vmem:[#allocation11 + $0x368] ss:$16 sps:$4 sm:$0xff]   ;;  %v10532_v13 = vld [vmem:[#allocation11 + $0x34c] ss:$16 sps:$4 sm:$0xff]  }
 0xdee   :  { %8201 = vmatpush2.bf16.msra.mxu0 %v10488_v1  ;;  %v7297_v28 = vpack.c.bf16 %v7293_v46, %v7293_v46  ;;  %v10530_v5 = vld [vmem:[#allocation11 + $0x348] ss:$16 sps:$4 sm:$0xff]   ;;  %v10535_v23 = vld [vmem:[#allocation11 + $0x32c] ss:$16 sps:$4 sm:$0xff]  }
 0xdef   :  { %9294 = vmatprep.subr.mxu0 %v8295_v40  ;;  %v10533_v26 = vld [vmem:[#allocation11 + $0x328] ss:$16 sps:$4 sm:$0xff]   ;;  %v10538_v19 = vld [vmem:[#allocation11 + $0x30c] ss:$16 sps:$4 sm:$0xff]  }
 0xdf0   :  { %8161 = vmatprep.mubr.bf16.mxu1 %v7297_v28  ;;  %v10536_v1 = vld [vmem:[#allocation11 + $0x308] ss:$16 sps:$4 sm:$0xff]   ;;  %v8268_v58 = vld [vmem:[%s11887_s25 + $0x20] sm:$0xff]  ;;  %v8282_v46 = vld [vmem:[%s11887_s25 + $0x90] sm:$0xff] }
 0xdf1   :  { %8162 = vmatmul.mubr.bf16.vlgmr.msra.gmra.mxu1 %v11649_v34  ;;  %8203 = vmatmul.mubr.bf16.vlgmr.msra.gmra.mxu0 %v11642_v63  ;;  %v8278_v63 = vld [vmem:[%s11887_s25 + $0x70] sm:$0xff]  ;;  %v8283_v2 = vld [vmem:[%s11887_s25 + $0x98] sm:$0xff] }
 0xdf2   :  { %8212 = vmatpush1.bf16.msra.mxu1 %v10491_v29  ;;  %8243 = vmatprep.mubr.bf16.mxu1 %v7297_v28  ;;  %v8267_v27 = vld [vmem:[%s11887_s25 + $0x18] sm:$0xff]  ;;  %v8266_v28 = vld [vmem:[%s11887_s25 + $0x10] sm:$0xff]  ;;  %v8281_v29 = vld [vmem:[%s11887_s25 + $0x88] sm:$0xff] }
 0xdf3   :  { %8213 = vmatprep.subr.bf16.mxu1 %v10496_v35  ;;  %9295 = vmatpush3.msra.mxu0 %v8279_v41  ;;  %v8280_v35 = vld [vmem:[%s11887_s25 + $0x80] sm:$0xff]  ;;  %v8310_v40 = vld [vmem:[%s11887_s25 + $0x170] sm:$0xff]  ;;  %v8325_v41 = vld [vmem:[%s11887_s25 + $0x1e8] sm:$0xff] }
 0xdf4   :  { %9296 = vmatprep.subr.mxu0 %v8294_v42  ;;  %v8309_v42 = vld [vmem:[%s11887_s25 + $0x168] sm:$0xff] }
 0xdf5   :  { %9297 = vmatpush3.msra.mxu0 %v8278_v63  ;;  %v8324_v63 = vld [vmem:[%s11887_s25 + $0x1e0] sm:$0xff] }
 0xdf6   :  { %8214 = vmatpush1.bf16.msra.mxu1 %v10494_v36  ;;  %9298 = vmatprep.subr.mxu0 %v8293_v44  ;;  %v8264_v36 = vld [vmem:[%s11887_s25] sm:$0xff] }
 0xdf7   :  { %8215 = vmatprep.subr.bf16.mxu1 %v10499_v37  ;;  %9299 = vmatpush3.msra.mxu0 %v8277_v45  ;;  %v8327_v37 = vld [vmem:[%s11887_s25 + $0x1f8] sm:$0xff]  ;;  %v8308_v44 = vld [vmem:[%s11887_s25 + $0x160] sm:$0xff] }
 0xdf8   :  { %9300 = vmatprep.subr.mxu0 %v8292_v25  ;;  %v8307_v45 = vld [vmem:[%s11887_s25 + $0x158] sm:$0xff]  ;;  %v8306_v25 = vld [vmem:[%s11887_s25 + $0x150] sm:$0xff] }
 0xdf9   :  { %9301 = vmatpush3.msra.mxu0 %v8276_v3  ;;  %v8321_v3 = vld [vmem:[%s11887_s25 + $0x1c8] sm:$0xff] }
 0xdfa   :  { %8216 = vmatpush1.bf16.msra.mxu1 %v10497_v38  ;;  %9302 = vmatprep.subr.mxu0 %v8291_v32  ;;  %v8311_v38 = vld [vmem:[%s11887_s25 + $0x178] sm:$0xff]  ;;  %v8305_v32 = vld [vmem:[%s11887_s25 + $0x148] sm:$0xff] }
 0xdfb   :  { %8217 = vmatprep.subr.bf16.mxu1 %v10502_v39  ;;  %9303 = vmatpush3.msra.mxu0 %v8275_v49  ;;  %v8326_v39 = vld [vmem:[%s11887_s25 + $0x1f0] sm:$0xff]  ;;  %v8304_v49 = vld [vmem:[%s11887_s25 + $0x140] sm:$0xff] }
 0xdfc   :  { %9304 = vmatprep.subr.mxu0 %v8290_v51  ;;  %v8303_v51 = vld [vmem:[%s11887_s25 + $0x138] sm:$0xff] }
 0xdfd   :  { %9305 = vmatpush3.msra.mxu0 %v8274_v52  ;;  %v8318_v52 = vld [vmem:[%s11887_s25 + $0x1b0] sm:$0xff] }
 0xdfe   :  { %8218 = vmatpush1.bf16.msra.mxu1 %v10500_v7  ;;  %9306 = vmatprep.subr.mxu0 %v8289_v53  ;;  %v8323_v7 = vld [vmem:[%s11887_s25 + $0x1d8] sm:$0xff]  ;;  %v8302_v53 = vld [vmem:[%s11887_s25 + $0x130] sm:$0xff] }
 0xdff   :  { %8219 = vmatprep.subr.bf16.mxu1 %v10505_v47  ;;  %9307 = vmatpush3.msra.mxu0 %v8273_v30  ;;  %v8322_v47 = vld [vmem:[%s11887_s25 + $0x1d0] sm:$0xff]  ;;  %v8301_v30 = vld [vmem:[%s11887_s25 + $0x128] sm:$0xff] }
 0xe00   :  { %9308 = vmatprep.subr.mxu0 %v8288_v33 }
 0xe01   :  { %9309 = vmatpush3.msra.mxu0 %v8272_v11 }
 0xe02   :  { %8220 = vmatpush1.bf16.msra.mxu1 %v10503_v48  ;;  %9310 = vmatprep.subr.mxu0 %v8287_v55  ;;  %v8320_v48 = vld [vmem:[%s11887_s25 + $0x1c0] sm:$0xff] }
 0xe03   :  { %8221 = vmatprep.subr.bf16.mxu1 %v10508_v50  ;;  %9311 = vmatpush3.msra.mxu0 %v8271_v56  ;;  %v8319_v50 = vld [vmem:[%s11887_s25 + $0x1b8] sm:$0xff]  ;;  %v8300_v55 = vld [vmem:[%s11887_s25 + $0x120] sm:$0xff] }
 0xe04   :  { %9312 = vmatprep.subr.mxu0 %v8286_v59  ;;  %v8314_v59 = vld [vmem:[%s11887_s25 + $0x190] sm:$0xff] }
 0xe05   :  { %9313 = vmatpush3.msra.mxu0 %v8270_v24  ;;  %v8298_v24 = vld [vmem:[%s11887_s25 + $0x110] sm:$0xff] }
 0xe06   :  { %8222 = vmatpush1.bf16.msra.mxu1 %v10506_v54  ;;  %9314 = vmatprep.subr.mxu0 %v8285_v21  ;;  %v8317_v54 = vld [vmem:[%s11887_s25 + $0x1a8] sm:$0xff] }
 0xe07   :  { %8223 = vmatprep.subr.bf16.mxu1 %v10511_v31  ;;  %9315 = vmatpush3.msra.mxu0 %v8269_v14  ;;  %v8316_v31 = vld [vmem:[%s11887_s25 + $0x1a0] sm:$0xff]  ;;  %v8297_v14 = vld [vmem:[%s11887_s25 + $0x108] sm:$0xff] }
 0xe08   :  { %9316 = vmatprep.subr.mxu0 %v8284_v60  ;;  %v8296_v60 = vld [vmem:[%s11887_s25 + $0x100] sm:$0xff] }
 0xe09   :  { %9317 = vmatpush3.msra.mxu0 %v8268_v58 }
 0xe0a   :  { %8224 = vmatpush1.bf16.msra.mxu1 %v10509_v8  ;;  %9318 = vmatprep.subr.mxu0 %v8283_v2  ;;  %v8315_v8 = vld [vmem:[%s11887_s25 + $0x198] sm:$0xff] }
 0xe0b   :  { %8225 = vmatprep.subr.bf16.mxu1 %v10514_v57  ;;  %9319 = vmatpush3.msra.mxu0 %v8267_v27  ;;  %v8299_v57 = vld [vmem:[%s11887_s25 + $0x118] sm:$0xff] }
 0xe0c   :  { %9320 = vmatprep.subr.mxu0 %v8282_v46 }
 0xe0d   :  { %9321 = vmatpush3.msra.mxu0 %v8266_v28 }
 0xe0e   :  { %8226 = vmatpush1.bf16.msra.mxu1 %v10512_v61  ;;  %9322 = vmatprep.subr.mxu0 %v8281_v29  ;;  %v8313_v61 = vld [vmem:[%s11887_s25 + $0x188] sm:$0xff] }
 0xe0f   :  { %8227 = vmatprep.subr.bf16.mxu1 %v10517_v22  ;;  %v8312_v22 = vld [vmem:[%s11887_s25 + $0x180] sm:$0xff] }
 0xe12   :  { %8228 = vmatpush2.bf16.msra.mxu1 %v10515_v20  ;;  %v7426_v20 = vld [vmem:[%s11886_s24] sm:$0xf] }
 0xe13   :  { %8229 = vmatprep.subr.bf16.mxu1 %v10520_v4  ;;  %v7431_v4 = vrot.slane %v7426_v20, %v10937_v17  ;;  %v7443_v46 = vrot.slane %v7426_v20, %v10934_v16  ;;  %v9293_v16 = vld [vmem:[#allocation2] ss:$0 sm:$0xff] }
 0xe16   :  { %8230 = vmatpush2.bf16.msra.mxu1 %v10518_v10  ;;  %v7435_v10 = vrot.slane %v7426_v20, %v10931_v15  ;;  %v7439_v15 = vrot.slane %v7426_v20, %v10940_v18 }
 0xe17   :  { %8231 = vmatprep.subr.bf16.mxu1 %v10523_v62 }
 0xe1a   :  { %8232 = vmatpush2.bf16.msra.mxu1 %v10521_v9 }
 0xe1b   :  { %8233 = vmatprep.subr.bf16.mxu1 %v10526_v43 }
 0xe1e   :  { %8234 = vmatpush2.bf16.msra.mxu1 %v10524_v0 }
 0xe1f   :  { %8235 = vmatprep.subr.bf16.mxu1 %v10529_v6 }
 0xe22   :  { %8236 = vmatpush2.bf16.msra.mxu1 %v10527_v12 }
 0xe23   :  { %8237 = vmatprep.subr.bf16.mxu1 %v10532_v13 }
 0xe26   :  { %8238 = vmatpush2.bf16.msra.mxu1 %v10530_v5 }
 0xe27   :  { %8239 = vmatprep.subr.bf16.mxu1 %v10535_v23 }
 0xe2a   :  { %8240 = vmatpush2.bf16.msra.mxu1 %v10533_v26 }
 0xe2b   :  { %8241 = vmatprep.subr.bf16.mxu1 %v10538_v19 }
 0xe2e   :  { %8242 = vmatpush2.bf16.msra.mxu1 %v10536_v1 }
 0xe2f   :  { %9329 = vmatprep.subr.mxu1 %v8327_v37 }
 0xe31   :  { %8244 = vmatmul.mubr.bf16.vlgmr.msra.gmra.mxu1 %v11649_v34  ;;  %v8265_v34 = vld [vmem:[%s11887_s25 + $0x8] sm:$0xff] }
 0xe32   :  { %9323 = vmatpush3.msra.mxu0 %v8265_v34  ;;  %9330 = vmatpush3.msra.mxu1 %v8311_v38 }
 0xe33   :  { %9324 = vmatprep.subr.mxu0 %v8280_v35  ;;  %9331 = vmatprep.subr.mxu1 %v8326_v39 }
 0xe34   :  { %9325 = vmatpush3.msra.mxu0 %v8264_v36  ;;  %9332 = vmatpush3.msra.mxu1 %v8310_v40 }
 0xe35   :  { %9333 = vmatprep.subr.mxu1 %v8325_v41 }
 0xe36   :  { %9334 = vmatpush3.msra.mxu1 %v8309_v42 }
 0xe37   :  { %9335 = vmatprep.subr.mxu1 %v8324_v63 }
 0xe38   :  { %9336 = vmatpush3.msra.mxu1 %v8308_v44 }
 0xe39   :  { %9337 = vmatprep.subr.mxu1 %v8323_v7 }
 0xe3a   :  { %9338 = vmatpush3.msra.mxu1 %v8307_v45 }
 0xe3b   :  { %9339 = vmatprep.subr.mxu1 %v8322_v47  ;;  %v8475_v47 = vld [vmem:[%s11924_s14] sm:$0xff] }
 0xe3c   :  { %9340 = vmatpush3.msra.mxu1 %v8306_v25  ;;  %vm8476_vm10 = vcmp.gt.f32.partialorder %v8475_v47, 0.0 }
 0xe3d   :  { %9341 = vmatprep.subr.mxu1 %v8321_v3 }
 0xe3e   :  { %9342 = vmatpush3.msra.mxu1 %v8305_v32 }
 0xe3f   :  { %9343 = vmatprep.subr.mxu1 %v8320_v48 }
 0xe40   :  { %9344 = vmatpush3.msra.mxu1 %v8304_v49 }
 0xe41   :  { %9345 = vmatprep.subr.mxu1 %v8319_v50 }
 0xe42   :  { %9346 = vmatpush3.msra.mxu1 %v8303_v51 }
 0xe43   :  { %9347 = vmatprep.subr.mxu1 %v8318_v52 }
 0xe44   :  { %9348 = vmatpush3.msra.mxu1 %v8302_v53 }
 0xe45   :  { %9349 = vmatprep.subr.mxu1 %v8317_v54 }
 0xe46   :  { %9350 = vmatpush3.msra.mxu1 %v8301_v30 }
 0xe47   :  { %9351 = vmatprep.subr.mxu1 %v8316_v31 }
 0xe48   :  { %9352 = vmatpush3.msra.mxu1 %v8300_v55 }
 0xe49   :  { %9353 = vmatprep.subr.mxu1 %v8315_v8 }
 0xe4a   :  { %9354 = vmatpush3.msra.mxu1 %v8299_v57 }
 0xe4b   :  { %9355 = vmatprep.subr.mxu1 %v8314_v59 }
 0xe4c   :  { %9356 = vmatpush3.msra.mxu1 %v8298_v24 }
 0xe4d   :  { %9357 = vmatprep.subr.mxu1 %v8313_v61 }
 0xe4e   :  { %9358 = vmatpush3.msra.mxu1 %v8297_v14 }
 0xe4f   :  { %9359 = vmatprep.subr.mxu1 %v8312_v22 }
 0xe50   :  { %9360 = vmatpush3.msra.mxu1 %v8296_v60 }
 0xe71   :  { %v8122_v33 = vpop.f32.mrf.mxu0 }
 0xe72   :  { %v8123_v62 = vadd.f32 %v8122_v33, %v7431_v4 }
 0xe73   :  { %v8124_v11 = vpop.f32.mrf.mxu0 }
 0xe74   :  { %v8125_v0 = vadd.f32 %v8124_v11, %v7435_v10 }
 0xe75   :  { %v8126_v56 = vpop.f32.mrf.mxu0 }
 0xe77   :  { %v8127_v21 = vpop.f32.mrf.mxu0 }
 0xeb1   :  { %v8163_v9 = vpop.f32.mrf.mxu1  ;;  %v8204_v43 = vpop.f32.mrf.mxu0 }
 0xeb2   :  { %v8164_v6 = vadd.f32 %v8163_v9, %v8123_v62  ;;  %v8205_v28 = vadd.f32 %v8204_v43, %v7439_v15 }
 0xeb3   :  { %v8165_v12 = vpop.f32.mrf.mxu1  ;;  %v8206_v13 = vpop.f32.mrf.mxu0 }
 0xeb4   :  { %v8166_v5 = vadd.f32 %v8165_v12, %v8125_v0  ;;  %v8256_v23 = vmul.f32 0.01, %v8164_v6  ;;  %vm8252_vm13 = vcmp.ge.f32.partialorder %v8164_v6, 0.0  ;;  %v8207_v34 = vadd.f32 %v8206_v13, %v7443_v46 }
 0xeb5   :  { %v8167_v26 = vpop.f32.mrf.mxu1  ;;  %v8208_v19 = vpop.f32.mrf.mxu0 }
 0xeb6   :  { %v8257_v1 = vmul.f32 0.01, %v8166_v5  ;;  %vm8253_vm14 = vcmp.ge.f32.partialorder %v8166_v5, 0.0  ;;  %v8260_v17 = vsel %vm8252_vm13, %v8164_v6, %v8256_v23 }
 0xeb7   :  { %v8168_v58 = vpop.f32.mrf.mxu1  ;;  %v8209_v2 = vpop.f32.mrf.mxu0 }
 0xeb8   :  { %v8261_v27 = vsel %vm8253_vm14, %v8166_v5, %v8257_v1 }
 0xeb9   :  { %8399 = vmatprep.mubr.f32.mxu0 %v8261_v27 }
 0xeba   :  { %8400 = vmatmul.mubr.f32.vlgmr.msra.gmra.mxu0 %v8260_v17 }
 0xef1   :  { %v8245_v29 = vpop.f32.mrf.mxu1 }
 0xef2   :  { %v8246_v35 = vadd.f32 %v8245_v29, %v8205_v28 }
 0xef3   :  { %v8247_v36 = vpop.f32.mrf.mxu1 }
 0xef4   :  { %v8248_v37 = vadd.f32 %v8247_v36, %v8207_v34  ;;  %v8258_v38 = vmul.f32 0.01, %v8246_v35  ;;  %vm8254_vm15 = vcmp.ge.f32.partialorder %v8246_v35, 0.0 }
 0xef5   :  { %v8249_v39 = vpop.f32.mrf.mxu1 }
 0xef6   :  { %v8259_v40 = vmul.f32 0.01, %v8248_v37  ;;  %vm8255_vm0 = vcmp.ge.f32.partialorder %v8248_v37, 0.0  ;;  %v8262_v63 = vsel %vm8254_vm15, %v8246_v35, %v8258_v38 }
 0xef7   :  { %v8250_v41 = vpop.f32.mrf.mxu1 }
 0xef8   :  { %v8263_v42 = vsel %vm8255_vm0, %v8248_v37, %v8259_v40 }
 0xef9   :  { %8469 = vmatprep.mubr.f32.mxu1 %v8263_v42 }
 0xefa   :  { %8470 = vmatmul.mubr.f32.vlgmr.msra.gmra.mxu1 %v8262_v63 }
 0xf7a   :  { %v9326_v44 = vpop.f32.mrf.mxu0 }
 0xf7c   :  { %v9327_v18 = vpop.f32.mrf.mxu0 }
 0xf7d   :  { %v9328_v7 = vadd.f32 %v9327_v18, %v9326_v44 }
 0xf7f   :  { %v8402_v3 = vadd.f32 %v9328_v7, %v9293_v16 }
 0xfba   :  { %v9361_v45 = vpop.f32.mrf.mxu1 }
 0xfbc   :  { %v9362_v25 = vpop.f32.mrf.mxu1 }
 0xfbd   :  { %v9363_v32 = vadd.f32 %v9362_v25, %v9361_v45 }
 0xfbf   :  { %v8472_v48 = vadd.f32 %v9363_v32, %v8402_v3 }
 0xfc1   :  { %v8477_v49 = vsel %vm8476_vm10, %v8472_v48, -1e+30 }
 0xfc2   :  { %v8479_v50 = vsel %vm8478_vm9, %v8477_v49, -inf }
 0xfc3   :  { %v8480_v51 = vrot.slane %v8479_v50, 4 }
 0xfc5   :  { %v8481_v52 = vmax.f32 %v8479_v50, %v8480_v51 }
 0xfc7   :  { %v8482_v53 = vrot.slane %v8481_v52, 2 }
 0xfc9   :  { %v8483_v54 = vmax.f32 %v8481_v52, %v8482_v53 }
 0xfcb   :  { %v8484_v30 = vrot.slane %v8483_v54, 1 }
 0xfcd   :  { %v8485_v31 = vmax.f32 %v8483_v54, %v8484_v30 }
 0xfcf   :  { %v8486_v33 = vsub.f32 %v8477_v49, %v8485_v31 }
 0xfd1   :  { %v8487_v11 = vmul.f32 1.442695, %v8486_v33 }
 0xfd3   :  { %10575 = vpow2.f32 %v8487_v11 }
 0xfe0   :  { %v10576_v55 = vpop.eup %10575 }
 0xfe1   :  { %v8489_v8 = vsel %vm8478_vm9, %v10576_v55, 0.0 }
 0xfe2   :  { %v8490_v56 = vrot.slane %v8489_v8, 4 }
 0xfe4   :  { %v8491_v57 = vadd.f32 %v8490_v56, %v8489_v8 }
 0xfe6   :  { %v8492_v59 = vrot.slane %v8491_v57, 2 }
 0xfe8   :  { %v8493_v24 = vadd.f32 %v8492_v59, %v8491_v57 }
 0xfea   :  { %v8494_v21 = vrot.slane %v8493_v24, 1 }
 0xfec   :  { %v8495_v61 = vadd.f32 %v8494_v21, %v8493_v24 }
 0xfee   :  { %10577 = vrcp.f32 %v8495_v61 }
 0xffb   :  { %v10578_v14 = vpop.eup %10577 }
 0xffc   :  { %v8497_v22 = vmul.f32 %v10578_v14, %v10576_v55 }
 0xffe   :  { %8498 = vst.msk [vmem:[%s11889_s27] sm:$0xff] %vm8478_vm9, %v8497_v22 }
 0xfff   :  { %8503 = vsyncpa [#allocation4], 1 }
0x1000   :  { %8504 = vsyncpa [#allocation6], 1 }
0x1001   :  { %8505 = vsyncpa [#allocation9], 1 }
0x1002   :  { %8506 = vsyncpa [#allocation12], 1 }

</bundles_post_ra>
